<compile_context>
chip_gen: v7x
topology: tpu7x:2x2x1
jax: 0.10.0
libtpu: 0.0.40
codegen_flags: <defaults>
</compile_context>

<pallas_src>
import math

import jax
import jax.numpy as jnp
from jax import lax
from jax.experimental import pallas as pl
from jax.experimental.pallas import tpu as pltpu


def _make_kernel(num_heads, dk, has_pre, has_mask):
    """Builds a kernel specialized on head count and on which optional operands exist."""

    def kernel(*refs):
        (qx_ref, kx_ref, vx_ref,
         wq_ref, bq_ref, wk_ref, bk_ref, wv_ref, bv_ref,
         wo_ref, bo_ref) = refs[:11]
        idx = 11
        pre_ref = mask_ref = None
        if has_pre:
            pre_ref = refs[idx]
            idx += 1
        if has_mask:
            mask_ref = refs[idx]
            idx += 1
        z_ref, scores_ref, k_sc, v_sc, z_sc = refs[idx:idx + 5]

        t = pl.program_id(1)

        # K / V projections once per batch element; reused across all query tiles.
        @pl.when(t == 0)
        def _():
            kf = jnp.dot(kx_ref[0], wk_ref[...],
                         preferred_element_type=jnp.float32) + bk_ref[...]
            vf = jnp.dot(vx_ref[0], wv_ref[...],
                         preferred_element_type=jnp.float32) + bv_ref[...]
            k_sc[...] = kf.astype(k_sc.dtype)
            v_sc[...] = vf.astype(v_sc.dtype)

        # Q projection for this query tile (1/sqrt(dk) already folded into WQ/bQ).
        q = (jnp.dot(qx_ref[0], wq_ref[...],
                     preferred_element_type=jnp.float32) + bq_ref[...]
             ).astype(jnp.bfloat16)                           # (tq, H*dk)
        k = k_sc[...]                                         # (L,  H*dk) bf16
        v = v_sc[...]                                         # (L,  H*dk) bf16

        neg_fill = jnp.float32(-2 ** 15 + 1)                  # PyTorch masked_fill value
        if has_mask:
            is_masked = mask_ref[0] == 0.0                    # hoisted out of head loop

        for h in range(num_heads):                            # static unroll (small H)
            lo, hi = h * dk, (h + 1) * dk
            # scores_h = q_h @ k_h^T  (contract last dims; no explicit transpose)
            s = lax.dot_general(q[:, lo:hi], k[:, lo:hi],
                                (((1,), (1,)), ((), ())),
                                preferred_element_type=jnp.float32)   # (tq, L)
            if has_pre:
                s = s + pre_ref[0, h].astype(jnp.float32)
            if has_mask:
                s = jnp.where(is_masked, neg_fill, s)
            scores_ref[0, h] = s                              # pre-softmax, like PyTorch

            # softmax over the key axis (divide -> EUP reciprocal + multiply)
            m = jnp.max(s, axis=-1, keepdims=True)
            e = jnp.exp(s - m)
            inv = pl.reciprocal(jnp.sum(e, axis=-1, keepdims=True), approx=True)
            alpha = (e * inv).astype(jnp.bfloat16)
            # dropout(alpha) == identity in eval mode
            z_sc[:, lo:hi] = jnp.dot(alpha, v[:, lo:hi],
                                     preferred_element_type=jnp.float32
                                     ).astype(z_sc.dtype)

        out = jnp.dot(z_sc[...], wo_ref[...],
                      preferred_element_type=jnp.float32) + bo_ref[...]
        z_ref[0] = out.astype(z_ref.dtype)

    return kernel


def self_attention_realformer(qx, kx, vx,
                              wq, bq, wk, bk, wv, bv, wo, bo,
                              dk, multi_num,
                              pre_scores=None, mask_pad=None,
                              tq=None):
    """Forward of SelfAttention_Realformer.

    qx/kx/vx: (B, L, feaSize).  Weights in PyTorch nn.Linear layout
    (out_features, in_features); biases (out_features,).
    Returns (z, scores) like the PyTorch module (scores pre-softmax, f32).
    """
    B, L, C = qx.shape
    HD = dk * multi_num
    f32, bf16 = jnp.float32, jnp.bfloat16

    if tq is None:                     # pick a query-tile size that divides L
        tq = L
        for cand in (256, 128, 64, 32, 16, 8):
            if L % cand == 0:
                tq = cand
                break
    assert L % tq == 0, (L, tq)
    T = L // tq

    # Fold the 1/sqrt(dk) score scaling into WQ (weight and bias).
    scale = 1.0 / math.sqrt(dk)
    wq_m = (wq.T.astype(f32) * scale).astype(bf16)            # (C, HD)
    bq_v = (bq.astype(f32) * scale).reshape(1, HD)            # f32
    wk_m = wk.T.astype(bf16)
    bk_v = bk.reshape(1, HD).astype(f32)
    wv_m = wv.T.astype(bf16)
    bv_v = bv.reshape(1, HD).astype(f32)
    wo_m = wo.T.astype(bf16)                                  # (HD, C)
    bo_v = bo.reshape(1, C).astype(f32)

    has_pre = pre_scores is not None
    has_mask = mask_pad is not None

    args = [qx.astype(bf16), kx.astype(bf16), vx.astype(bf16),
            wq_m, bq_v, wk_m, bk_v, wv_m, bv_v, wo_m, bo_v]
    in_specs = [
        pl.BlockSpec((1, tq, C), lambda b, t: (b, t, 0)),     # qx (query tile)
        pl.BlockSpec((1, L, C), lambda b, t: (b, 0, 0)),      # kx (full, resident per b)
        pl.BlockSpec((1, L, C), lambda b, t: (b, 0, 0)),      # vx
        pl.BlockSpec((C, HD), lambda b, t: (0, 0)),           # WQ (constant -> resident)
        pl.BlockSpec((1, HD), lambda b, t: (0, 0)),           # bQ
        pl.BlockSpec((C, HD), lambda b, t: (0, 0)),           # WK
        pl.BlockSpec((1, HD), lambda b, t: (0, 0)),           # bK
        pl.BlockSpec((C, HD), lambda b, t: (0, 0)),           # WV
        pl.BlockSpec((1, HD), lambda b, t: (0, 0)),           # bV
        pl.BlockSpec((HD, C), lambda b, t: (0, 0)),           # WO
        pl.BlockSpec((1, C), lambda b, t: (0, 0)),            # bO
    ]
    if has_pre:
        args.append(pre_scores.astype(bf16))
        in_specs.append(pl.BlockSpec((1, multi_num, tq, L),
                                     lambda b, t: (b, 0, t, 0)))
    if has_mask:
        args.append(mask_pad.astype(bf16))
        in_specs.append(pl.BlockSpec((1, tq, L), lambda b, t: (b, t, 0)))

    kernel = _make_kernel(multi_num, dk, has_pre, has_mask)

    z, scores = pl.pallas_call(
        kernel,
        out_shape=(jax.ShapeDtypeStruct((B, L, C), f32),
                   jax.ShapeDtypeStruct((B, multi_num, L, L), f32)),
        grid_spec=pltpu.PrefetchScalarGridSpec(
            num_scalar_prefetch=0,
            grid=(B, T),
            in_specs=in_specs,
            out_specs=[
                pl.BlockSpec((1, tq, C), lambda b, t: (b, t, 0)),
                pl.BlockSpec((1, multi_num, tq, L), lambda b, t: (b, 0, t, 0)),
            ],
            scratch_shapes=[pltpu.VMEM((L, HD), bf16),        # K projection
                            pltpu.VMEM((L, HD), bf16),        # V projection
                            pltpu.VMEM((tq, HD), bf16)]),     # per-tile Z (pre-WO)
        compiler_params=pltpu.CompilerParams(
            dimension_semantics=("parallel", "arbitrary"),
            vmem_limit_bytes=32 * 1024 * 1024),
    )(*args)
    return z, scores


def _reference(qx, kx, vx, wq, bq, wk, bk, wv, bv, wo, bo, dk, num_heads,
               pre_scores=None, mask_pad=None):
    B, L, C = qx.shape
    hp = lax.Precision.HIGHEST

    def lin(x, w, b):
        return jnp.matmul(x, w.T, precision=hp) + b

    q = lin(qx, wq, bq).reshape(B, L, num_heads, dk).transpose(0, 2, 1, 3)
    k = lin(kx, wk, bk).reshape(B, L, num_heads, dk).transpose(0, 2, 1, 3)
    v = lin(vx, wv, bv).reshape(B, L, num_heads, dk).transpose(0, 2, 1, 3)
    scores = jnp.matmul(q, jnp.swapaxes(k, -1, -2), precision=hp) / math.sqrt(dk)
    if pre_scores is not None:
        scores = scores + pre_scores
    if mask_pad is not None:
        scores = jnp.where((mask_pad == 0)[:, None, :, :],
                           float(-2 ** 15 + 1), scores)
    alpha = jax.nn.softmax(scores, axis=3)
    z = jnp.matmul(alpha, v, precision=hp)
    z = z.transpose(0, 2, 1, 3).reshape(B, L, num_heads * dk)
    z = jnp.matmul(z, wo.T, precision=hp) + bo
    return z, scores


if __name__ == "__main__":
    key = jax.random.PRNGKey(0)
    # Lane-dense demo shapes: feaSize = dk*multiNum = 128, L = 128, tq = 64 (2 tiles).
    B, L, feaSize, dk, multiNum = 2, 128, 128, 32, 4
    HD = dk * multiNum
    ks = jax.random.split(key, 12)

    # Make inputs exactly bf16-representable so the f32 reference sees the same
    # data the kernel streams in bf16 (isolates kernel correctness).
    def q(x):
        return x.astype(jnp.bfloat16).astype(jnp.float32)

    qx = q(jax.random.normal(ks[0], (B, L, feaSize), dtype=jnp.float32))
    kx = q(jax.random.normal(ks[1], (B, L, feaSize), dtype=jnp.float32))
    vx = q(jax.random.normal(ks[2], (B, L, feaSize), dtype=jnp.float32))

    # PyTorch nn.Linear layout: weight (out, in), bias (out,)
    wq = q(jax.random.normal(ks[3], (HD, feaSize), dtype=jnp.float32) * 0.05)
    bq = q(jax.random.normal(ks[4], (HD,), dtype=jnp.float32) * 0.05)
    wk = q(jax.random.normal(ks[5], (HD, feaSize), dtype=jnp.float32) * 0.05)
    bk = q(jax.random.normal(ks[6], (HD,), dtype=jnp.float32) * 0.05)
    wv = q(jax.random.normal(ks[7], (HD, feaSize), dtype=jnp.float32) * 0.05)
    bv = q(jax.random.normal(ks[8], (HD,), dtype=jnp.float32) * 0.05)
    wo = q(jax.random.normal(ks[9], (feaSize, HD), dtype=jnp.float32) * 0.05)
    bo = q(jax.random.normal(ks[10], (feaSize,), dtype=jnp.float32) * 0.05)

    # Realformer residual scores and a padding mask (valid lengths 100 and 77).
    pre_scores = q(jax.random.normal(ks[11], (B, multiNum, L, L), dtype=jnp.float32) * 0.1)
    lengths = jnp.array([100, 77])
    valid = jnp.arange(L)[None, :] < lengths[:, None]                 # (B, L)
    mask_pad = (valid[:, :, None] & valid[:, None, :]).astype(jnp.float32)

    # Case 1: with preScores and maskPAD.
    z, scores = self_attention_realformer(qx, kx, vx, wq, bq, wk, bk, wv, bv,
                                          wo, bo, dk, multiNum,
                                          pre_scores=pre_scores,
                                          mask_pad=mask_pad, tq=64)
    z = jax.block_until_ready(z)
    scores = jax.block_until_ready(scores)

    z_ref, s_ref = _reference(qx, kx, vx, wq, bq, wk, bk, wv, bv, wo, bo,
                              dk, multiNum, pre_scores=pre_scores,
                              mask_pad=mask_pad)
    assert z.shape == (B, L, feaSize), z.shape
    assert scores.shape == (B, multiNum, L, L), scores.shape
    assert jnp.allclose(scores, s_ref, atol=2e-2, rtol=2e-2), \
        float(jnp.abs(scores - s_ref).max())
    assert jnp.allclose(z, z_ref, atol=2e-2, rtol=2e-2), \
        float(jnp.abs(z - z_ref).max())

    # Case 2: preScores=None, maskPAD=None (static variant without those operands).
    z2, s2 = self_attention_realformer(qx, kx, vx, wq, bq, wk, bk, wv, bv,
                                       wo, bo, dk, multiNum, tq=64)
    z2 = jax.block_until_ready(z2)
    s2 = jax.block_until_ready(s2)
    z2_ref, s2_ref = _reference(qx, kx, vx, wq, bq, wk, bk, wv, bv, wo, bo,
                                dk, multiNum)
    assert jnp.allclose(s2, s2_ref, atol=2e-2, rtol=2e-2), \
        float(jnp.abs(s2 - s2_ref).max())
    assert jnp.allclose(z2, z2_ref, atol=2e-2, rtol=2e-2), \
        float(jnp.abs(z2 - z2_ref).max())

    print("KERNEL_OK")
</pallas_src>

<mosaic_0001>
module attributes {stable_mosaic.version = 11 : i64} {
  func.func @kernel(%arg0: i32, %arg1: i32, %arg2: memref<1x64x128xbf16, #tpu.memory_space<vmem>>, %arg3: memref<1x128x128xbf16, #tpu.memory_space<vmem>>, %arg4: memref<1x128x128xbf16, #tpu.memory_space<vmem>>, %arg5: memref<128x128xbf16, #tpu.memory_space<vmem>>, %arg6: memref<1x128xf32, #tpu.memory_space<vmem>>, %arg7: memref<128x128xbf16, #tpu.memory_space<vmem>>, %arg8: memref<1x128xf32, #tpu.memory_space<vmem>>, %arg9: memref<128x128xbf16, #tpu.memory_space<vmem>>, %arg10: memref<1x128xf32, #tpu.memory_space<vmem>>, %arg11: memref<128x128xbf16, #tpu.memory_space<vmem>>, %arg12: memref<1x128xf32, #tpu.memory_space<vmem>>, %arg13: memref<1x4x64x128xbf16, #tpu.memory_space<vmem>>, %arg14: memref<1x64x128xbf16, #tpu.memory_space<vmem>>, %arg15: memref<1x64x128xf32, #tpu.memory_space<vmem>>, %arg16: memref<1x4x64x128xf32, #tpu.memory_space<vmem>>, %arg17: memref<128x128xbf16, #tpu.memory_space<vmem>>, %arg18: memref<128x128xbf16, #tpu.memory_space<vmem>>, %arg19: memref<64x128xbf16, #tpu.memory_space<vmem>>) attributes {dimension_semantics = [#tpu.dimension_semantics<parallel>, #tpu.dimension_semantics<arbitrary>], iteration_bounds = array<i64: 2, 2>, scalar_prefetch = 0 : i64, scratch_operands = 3 : i64, tpu.core_type = #tpu.core_type<tc>, window_params = [{transform_indices = @transform_0, window_bounds = array<i64: 1, 64, 128>}, {transform_indices = @transform_1, window_bounds = array<i64: 1, 128, 128>}, {transform_indices = @transform_2, window_bounds = array<i64: 1, 128, 128>}, {pipeline_mode = #tpu.pipeline_mode<synchronous>, transform_indices = @transform_3, window_bounds = array<i64: 128, 128>}, {pipeline_mode = #tpu.pipeline_mode<synchronous>, transform_indices = @transform_4, window_bounds = array<i64: 1, 128>}, {pipeline_mode = #tpu.pipeline_mode<synchronous>, transform_indices = @transform_5, window_bounds = array<i64: 128, 128>}, {pipeline_mode = #tpu.pipeline_mode<synchronous>, transform_indices = @transform_6, window_bounds = array<i64: 1, 128>}, {pipeline_mode = #tpu.pipeline_mode<synchronous>, transform_indices = @transform_7, window_bounds = array<i64: 128, 128>}, {pipeline_mode = #tpu.pipeline_mode<synchronous>, transform_indices = @transform_8, window_bounds = array<i64: 1, 128>}, {pipeline_mode = #tpu.pipeline_mode<synchronous>, transform_indices = @transform_9, window_bounds = array<i64: 128, 128>}, {pipeline_mode = #tpu.pipeline_mode<synchronous>, transform_indices = @transform_10, window_bounds = array<i64: 1, 128>}, {transform_indices = @transform_11, window_bounds = array<i64: 1, 4, 64, 128>}, {transform_indices = @transform_12, window_bounds = array<i64: 1, 64, 128>}, {transform_indices = @transform_13, window_bounds = array<i64: 1, 64, 128>}, {transform_indices = @transform_14, window_bounds = array<i64: 1, 4, 64, 128>}]} {
    %c0_i32 = arith.constant 0 : i32
    %0 = arith.cmpi eq, %arg1, %c0_i32 : i32
    %1 = arith.extui %0 : i1 to i32
    %c0_i32_0 = arith.constant 0 : i32
    %2 = arith.cmpi ne, %1, %c0_i32_0 : i32
    scf.if %2 {
      %c0_79 = arith.constant 0 : index
      %c0_80 = arith.constant 0 : index
      %c0_81 = arith.constant 0 : index
      %134 = vector.load %arg3[%c0_79, %c0_80, %c0_81] : memref<1x128x128xbf16, #tpu.memory_space<vmem>>, vector<1x128x128xbf16>
      %135 = vector.shape_cast %134 : vector<1x128x128xbf16> to vector<128x128xbf16>
      %c0_82 = arith.constant 0 : index
      %c0_83 = arith.constant 0 : index
      %136 = vector.load %arg7[%c0_82, %c0_83] : memref<128x128xbf16, #tpu.memory_space<vmem>>, vector<128x128xbf16>
      %cst_84 = arith.constant dense<0.000000e+00> : vector<128x128xf32>
      %137 = tpu.matmul %135, %136, %cst_84 {dimension_numbers = #tpu.dot_dimension_numbers<[1], [0], [0], [1], [0, 0, 1, 1], [], []>} : vector<128x128xbf16>, vector<128x128xbf16>, vector<128x128xf32> -> vector<128x128xf32>
      %c0_85 = arith.constant 0 : index
      %c0_86 = arith.constant 0 : index
      %138 = vector.load %arg8[%c0_85, %c0_86] : memref<1x128xf32, #tpu.memory_space<vmem>>, vector<1x128xf32>
      %139 = vector.broadcast %138 : vector<1x128xf32> to vector<128x128xf32>
      %140 = arith.addf %137, %139 : vector<128x128xf32>
      %c0_87 = arith.constant 0 : index
      %c0_88 = arith.constant 0 : index
      %c0_89 = arith.constant 0 : index
      %141 = vector.load %arg4[%c0_87, %c0_88, %c0_89] : memref<1x128x128xbf16, #tpu.memory_space<vmem>>, vector<1x128x128xbf16>
      %142 = vector.shape_cast %141 : vector<1x128x128xbf16> to vector<128x128xbf16>
      %c0_90 = arith.constant 0 : index
      %c0_91 = arith.constant 0 : index
      %143 = vector.load %arg9[%c0_90, %c0_91] : memref<128x128xbf16, #tpu.memory_space<vmem>>, vector<128x128xbf16>
      %cst_92 = arith.constant dense<0.000000e+00> : vector<128x128xf32>
      %144 = tpu.matmul %142, %143, %cst_92 {dimension_numbers = #tpu.dot_dimension_numbers<[1], [0], [0], [1], [0, 0, 1, 1], [], []>} : vector<128x128xbf16>, vector<128x128xbf16>, vector<128x128xf32> -> vector<128x128xf32>
      %c0_93 = arith.constant 0 : index
      %c0_94 = arith.constant 0 : index
      %145 = vector.load %arg10[%c0_93, %c0_94] : memref<1x128xf32, #tpu.memory_space<vmem>>, vector<1x128xf32>
      %146 = vector.broadcast %145 : vector<1x128xf32> to vector<128x128xf32>
      %147 = arith.addf %144, %146 : vector<128x128xf32>
      %148 = arith.truncf %140 : vector<128x128xf32> to vector<128x128xbf16>
      %c0_95 = arith.constant 0 : index
      %c0_96 = arith.constant 0 : index
      %149 = vector.load %arg17[%c0_95, %c0_96] : memref<128x128xbf16, #tpu.memory_space<vmem>>, vector<128x128xbf16>
      tpu.vector_store %arg17[%c0_95, %c0_96], %148 {strides = array<i32>} : memref<128x128xbf16, #tpu.memory_space<vmem>>, vector<128x128xbf16>,
      %150 = arith.truncf %147 : vector<128x128xf32> to vector<128x128xbf16>
      %c0_97 = arith.constant 0 : index
      %c0_98 = arith.constant 0 : index
      %151 = vector.load %arg18[%c0_97, %c0_98] : memref<128x128xbf16, #tpu.memory_space<vmem>>, vector<128x128xbf16>
      tpu.vector_store %arg18[%c0_97, %c0_98], %150 {strides = array<i32>} : memref<128x128xbf16, #tpu.memory_space<vmem>>, vector<128x128xbf16>,
    } else {
    }
    %c0 = arith.constant 0 : index
    %c0_1 = arith.constant 0 : index
    %c0_2 = arith.constant 0 : index
    %3 = vector.load %arg2[%c0, %c0_1, %c0_2] : memref<1x64x128xbf16, #tpu.memory_space<vmem>>, vector<1x64x128xbf16>
    %4 = vector.shape_cast %3 : vector<1x64x128xbf16> to vector<64x128xbf16>
    %c0_3 = arith.constant 0 : index
    %c0_4 = arith.constant 0 : index
    %5 = vector.load %arg5[%c0_3, %c0_4] : memref<128x128xbf16, #tpu.memory_space<vmem>>, vector<128x128xbf16>
    %cst = arith.constant dense<0.000000e+00> : vector<64x128xf32>
    %6 = tpu.matmul %4, %5, %cst {dimension_numbers = #tpu.dot_dimension_numbers<[1], [0], [0], [1], [0, 0, 1, 1], [], []>} : vector<64x128xbf16>, vector<128x128xbf16>, vector<64x128xf32> -> vector<64x128xf32>
    %c0_5 = arith.constant 0 : index
    %c0_6 = arith.constant 0 : index
    %7 = vector.load %arg6[%c0_5, %c0_6] : memref<1x128xf32, #tpu.memory_space<vmem>>, vector<1x128xf32>
    %8 = vector.broadcast %7 : vector<1x128xf32> to vector<64x128xf32>
    %9 = arith.addf %6, %8 : vector<64x128xf32>
    %10 = arith.truncf %9 : vector<64x128xf32> to vector<64x128xbf16>
    %c0_7 = arith.constant 0 : index
    %c0_8 = arith.constant 0 : index
    %11 = vector.load %arg17[%c0_7, %c0_8] : memref<128x128xbf16, #tpu.memory_space<vmem>>, vector<128x128xbf16>
    %c0_9 = arith.constant 0 : index
    %c0_10 = arith.constant 0 : index
    %12 = vector.load %arg18[%c0_9, %c0_10] : memref<128x128xbf16, #tpu.memory_space<vmem>>, vector<128x128xbf16>
    %c0_11 = arith.constant 0 : index
    %c0_12 = arith.constant 0 : index
    %c0_13 = arith.constant 0 : index
    %13 = vector.load %arg14[%c0_11, %c0_12, %c0_13] : memref<1x64x128xbf16, #tpu.memory_space<vmem>>, vector<1x64x128xbf16>
    %14 = vector.shape_cast %13 : vector<1x64x128xbf16> to vector<64x128xbf16>
    %cst_14 = arith.constant 0.000000e+00 : bf16
    %15 = vector.broadcast %cst_14 : bf16 to vector<64x128xbf16>
    %16 = arith.cmpf oeq, %14, %15 : vector<64x128xbf16>
    %17 = vector.extract_strided_slice %10 {offsets = [0, 0], sizes = [64, 32], strides = [1, 1]} : vector<64x128xbf16> to vector<64x32xbf16>
    %18 = vector.extract_strided_slice %11 {offsets = [0, 0], sizes = [128, 32], strides = [1, 1]} : vector<128x128xbf16> to vector<128x32xbf16>
    %cst_15 = arith.constant dense<0.000000e+00> : vector<64x128xf32>
    %19 = tpu.matmul %17, %18, %cst_15 {dimension_numbers = #tpu.dot_dimension_numbers<[1], [1], [0], [0], [0, 0, 1, 0], [], []>} : vector<64x32xbf16>, vector<128x32xbf16>, vector<64x128xf32> -> vector<64x128xf32>
    %c0_16 = arith.constant 0 : index
    %c0_17 = arith.constant 0 : index
    %c0_18 = arith.constant 0 : index
    %c0_19 = arith.constant 0 : index
    %20 = vector.load %arg13[%c0_16, %c0_17, %c0_18, %c0_19] : memref<1x4x64x128xbf16, #tpu.memory_space<vmem>>, vector<1x1x64x128xbf16>
    %21 = vector.shape_cast %20 : vector<1x1x64x128xbf16> to vector<64x128xbf16>
    %22 = arith.extf %21 : vector<64x128xbf16> to vector<64x128xf32>
    %23 = arith.addf %19, %22 : vector<64x128xf32>
    %cst_20 = arith.constant -3.276700e+04 : f32
    %24 = vector.broadcast %cst_20 : f32 to vector<64x128xf32>
    %25 = arith.select %16, %24, %23 : vector<64x128xi1>, vector<64x128xf32>
    %c0_21 = arith.constant 0 : index
    %c0_22 = arith.constant 0 : index
    %c0_23 = arith.constant 0 : index
    %c0_24 = arith.constant 0 : index
    %26 = vector.load %arg16[%c0_21, %c0_22, %c0_23, %c0_24] : memref<1x4x64x128xf32, #tpu.memory_space<vmem>>, vector<1x1x64x128xf32>
    %27 = vector.shape_cast %26 : vector<1x1x64x128xf32> to vector<64x128xf32>
    %28 = vector.shape_cast %25 : vector<64x128xf32> to vector<1x1x64x128xf32>
    tpu.vector_store %arg16[%c0_21, %c0_22, %c0_23, %c0_24], %28 {strides = array<i32>} : memref<1x4x64x128xf32, #tpu.memory_space<vmem>>, vector<1x1x64x128xf32>,
    %cst_25 = arith.constant dense<0xFF800000> : vector<64xf32>
    %29 = vector.multi_reduction <maximumf>, %25, %cst_25 [1] : vector<64x128xf32> to vector<64xf32>
    %30 = vector.shape_cast %29 : vector<64xf32> to vector<64x1xf32>
    %31 = vector.broadcast %30 : vector<64x1xf32> to vector<64x128xf32>
    %32 = arith.subf %25, %31 : vector<64x128xf32>
    %33 = math.exp %32 : vector<64x128xf32>
    %cst_26 = arith.constant dense<0.000000e+00> : vector<64xf32>
    %34 = vector.multi_reduction <add>, %33, %cst_26 [1] : vector<64x128xf32> to vector<64xf32>
    %35 = vector.shape_cast %34 : vector<64xf32> to vector<64x1xf32>
    %36 = tpu.reciprocal %35 {approx = true} : vector<64x1xf32> -> vector<64x1xf32>
    %37 = vector.broadcast %36 : vector<64x1xf32> to vector<64x128xf32>
    %38 = arith.mulf %33, %37 : vector<64x128xf32>
    %39 = arith.truncf %38 : vector<64x128xf32> to vector<64x128xbf16>
    %40 = vector.extract_strided_slice %12 {offsets = [0, 0], sizes = [128, 32], strides = [1, 1]} : vector<128x128xbf16> to vector<128x32xbf16>
    %cst_27 = arith.constant dense<0.000000e+00> : vector<64x32xf32>
    %41 = tpu.matmul %39, %40, %cst_27 {dimension_numbers = #tpu.dot_dimension_numbers<[1], [0], [0], [1], [0, 0, 1, 1], [], []>} : vector<64x128xbf16>, vector<128x32xbf16>, vector<64x32xf32> -> vector<64x32xf32>
    %42 = arith.truncf %41 : vector<64x32xf32> to vector<64x32xbf16>
    %c0_28 = arith.constant 0 : index
    %c0_29 = arith.constant 0 : index
    %43 = vector.load %arg19[%c0_28, %c0_29] : memref<64x128xbf16, #tpu.memory_space<vmem>>, vector<64x32xbf16>
    tpu.vector_store %arg19[%c0_28, %c0_29], %42 {strides = array<i32>} : memref<64x128xbf16, #tpu.memory_space<vmem>>, vector<64x32xbf16>,
    %44 = vector.extract_strided_slice %10 {offsets = [0, 32], sizes = [64, 32], strides = [1, 1]} : vector<64x128xbf16> to vector<64x32xbf16>
    %45 = vector.extract_strided_slice %11 {offsets = [0, 32], sizes = [128, 32], strides = [1, 1]} : vector<128x128xbf16> to vector<128x32xbf16>
    %cst_30 = arith.constant dense<0.000000e+00> : vector<64x128xf32>
    %46 = tpu.matmul %44, %45, %cst_30 {dimension_numbers = #tpu.dot_dimension_numbers<[1], [1], [0], [0], [0, 0, 1, 0], [], []>} : vector<64x32xbf16>, vector<128x32xbf16>, vector<64x128xf32> -> vector<64x128xf32>
    %c0_31 = arith.constant 0 : index
    %c1 = arith.constant 1 : index
    %c0_32 = arith.constant 0 : index
    %c0_33 = arith.constant 0 : index
    %47 = vector.load %arg13[%c0_31, %c1, %c0_32, %c0_33] : memref<1x4x64x128xbf16, #tpu.memory_space<vmem>>, vector<1x1x64x128xbf16>
    %48 = vector.shape_cast %47 : vector<1x1x64x128xbf16> to vector<64x128xbf16>
    %49 = arith.extf %48 : vector<64x128xbf16> to vector<64x128xf32>
    %50 = arith.addf %46, %49 : vector<64x128xf32>
    %cst_34 = arith.constant -3.276700e+04 : f32
    %51 = vector.broadcast %cst_34 : f32 to vector<64x128xf32>
    %52 = arith.select %16, %51, %50 : vector<64x128xi1>, vector<64x128xf32>
    %c0_35 = arith.constant 0 : index
    %c1_36 = arith.constant 1 : index
    %c0_37 = arith.constant 0 : index
    %c0_38 = arith.constant 0 : index
    %53 = vector.load %arg16[%c0_35, %c1_36, %c0_37, %c0_38] : memref<1x4x64x128xf32, #tpu.memory_space<vmem>>, vector<1x1x64x128xf32>
    %54 = vector.shape_cast %53 : vector<1x1x64x128xf32> to vector<64x128xf32>
    %55 = vector.shape_cast %52 : vector<64x128xf32> to vector<1x1x64x128xf32>
    tpu.vector_store %arg16[%c0_35, %c1_36, %c0_37, %c0_38], %55 {strides = array<i32>} : memref<1x4x64x128xf32, #tpu.memory_space<vmem>>, vector<1x1x64x128xf32>,
    %cst_39 = arith.constant dense<0xFF800000> : vector<64xf32>
    %56 = vector.multi_reduction <maximumf>, %52, %cst_39 [1] : vector<64x128xf32> to vector<64xf32>
    %57 = vector.shape_cast %56 : vector<64xf32> to vector<64x1xf32>
    %58 = vector.broadcast %57 : vector<64x1xf32> to vector<64x128xf32>
    %59 = arith.subf %52, %58 : vector<64x128xf32>
    %60 = math.exp %59 : vector<64x128xf32>
    %cst_40 = arith.constant dense<0.000000e+00> : vector<64xf32>
    %61 = vector.multi_reduction <add>, %60, %cst_40 [1] : vector<64x128xf32> to vector<64xf32>
    %62 = vector.shape_cast %61 : vector<64xf32> to vector<64x1xf32>
    %63 = tpu.reciprocal %62 {approx = true} : vector<64x1xf32> -> vector<64x1xf32>
    %64 = vector.broadcast %63 : vector<64x1xf32> to vector<64x128xf32>
    %65 = arith.mulf %60, %64 : vector<64x128xf32>
    %66 = arith.truncf %65 : vector<64x128xf32> to vector<64x128xbf16>
    %67 = vector.extract_strided_slice %12 {offsets = [0, 32], sizes = [128, 32], strides = [1, 1]} : vector<128x128xbf16> to vector<128x32xbf16>
    %cst_41 = arith.constant dense<0.000000e+00> : vector<64x32xf32>
    %68 = tpu.matmul %66, %67, %cst_41 {dimension_numbers = #tpu.dot_dimension_numbers<[1], [0], [0], [1], [0, 0, 1, 1], [], []>} : vector<64x128xbf16>, vector<128x32xbf16>, vector<64x32xf32> -> vector<64x32xf32>
    %69 = arith.truncf %68 : vector<64x32xf32> to vector<64x32xbf16>
    %c0_42 = arith.constant 0 : index
    %c32 = arith.constant 32 : index
    %70 = vector.load %arg19[%c0_42, %c32] : memref<64x128xbf16, #tpu.memory_space<vmem>>, vector<64x32xbf16>
    tpu.vector_store %arg19[%c0_42, %c32], %69 {strides = array<i32>} : memref<64x128xbf16, #tpu.memory_space<vmem>>, vector<64x32xbf16>,
    %71 = vector.extract_strided_slice %10 {offsets = [0, 64], sizes = [64, 32], strides = [1, 1]} : vector<64x128xbf16> to vector<64x32xbf16>
    %72 = vector.extract_strided_slice %11 {offsets = [0, 64], sizes = [128, 32], strides = [1, 1]} : vector<128x128xbf16> to vector<128x32xbf16>
    %cst_43 = arith.constant dense<0.000000e+00> : vector<64x128xf32>
    %73 = tpu.matmul %71, %72, %cst_43 {dimension_numbers = #tpu.dot_dimension_numbers<[1], [1], [0], [0], [0, 0, 1, 0], [], []>} : vector<64x32xbf16>, vector<128x32xbf16>, vector<64x128xf32> -> vector<64x128xf32>
    %c0_44 = arith.constant 0 : index
    %c2 = arith.constant 2 : index
    %c0_45 = arith.constant 0 : index
    %c0_46 = arith.constant 0 : index
    %74 = vector.load %arg13[%c0_44, %c2, %c0_45, %c0_46] : memref<1x4x64x128xbf16, #tpu.memory_space<vmem>>, vector<1x1x64x128xbf16>
    %75 = vector.shape_cast %74 : vector<1x1x64x128xbf16> to vector<64x128xbf16>
    %76 = arith.extf %75 : vector<64x128xbf16> to vector<64x128xf32>
    %77 = arith.addf %73, %76 : vector<64x128xf32>
    %cst_47 = arith.constant -3.276700e+04 : f32
    %78 = vector.broadcast %cst_47 : f32 to vector<64x128xf32>
    %79 = arith.select %16, %78, %77 : vector<64x128xi1>, vector<64x128xf32>
    %c0_48 = arith.constant 0 : index
    %c2_49 = arith.constant 2 : index
    %c0_50 = arith.constant 0 : index
    %c0_51 = arith.constant 0 : index
    %80 = vector.load %arg16[%c0_48, %c2_49, %c0_50, %c0_51] : memref<1x4x64x128xf32, #tpu.memory_space<vmem>>, vector<1x1x64x128xf32>
    %81 = vector.shape_cast %80 : vector<1x1x64x128xf32> to vector<64x128xf32>
    %82 = vector.shape_cast %79 : vector<64x128xf32> to vector<1x1x64x128xf32>
    tpu.vector_store %arg16[%c0_48, %c2_49, %c0_50, %c0_51], %82 {strides = array<i32>} : memref<1x4x64x128xf32, #tpu.memory_space<vmem>>, vector<1x1x64x128xf32>,
    %cst_52 = arith.constant dense<0xFF800000> : vector<64xf32>
    %83 = vector.multi_reduction <maximumf>, %79, %cst_52 [1] : vector<64x128xf32> to vector<64xf32>
    %84 = vector.shape_cast %83 : vector<64xf32> to vector<64x1xf32>
    %85 = vector.broadcast %84 : vector<64x1xf32> to vector<64x128xf32>
    %86 = arith.subf %79, %85 : vector<64x128xf32>
    %87 = math.exp %86 : vector<64x128xf32>
    %cst_53 = arith.constant dense<0.000000e+00> : vector<64xf32>
    %88 = vector.multi_reduction <add>, %87, %cst_53 [1] : vector<64x128xf32> to vector<64xf32>
    %89 = vector.shape_cast %88 : vector<64xf32> to vector<64x1xf32>
    %90 = tpu.reciprocal %89 {approx = true} : vector<64x1xf32> -> vector<64x1xf32>
    %91 = vector.broadcast %90 : vector<64x1xf32> to vector<64x128xf32>
    %92 = arith.mulf %87, %91 : vector<64x128xf32>
    %93 = arith.truncf %92 : vector<64x128xf32> to vector<64x128xbf16>
    %94 = vector.extract_strided_slice %12 {offsets = [0, 64], sizes = [128, 32], strides = [1, 1]} : vector<128x128xbf16> to vector<128x32xbf16>
    %cst_54 = arith.constant dense<0.000000e+00> : vector<64x32xf32>
    %95 = tpu.matmul %93, %94, %cst_54 {dimension_numbers = #tpu.dot_dimension_numbers<[1], [0], [0], [1], [0, 0, 1, 1], [], []>} : vector<64x128xbf16>, vector<128x32xbf16>, vector<64x32xf32> -> vector<64x32xf32>
    %96 = arith.truncf %95 : vector<64x32xf32> to vector<64x32xbf16>
    %c0_55 = arith.constant 0 : index
    %c64 = arith.constant 64 : index
    %97 = vector.load %arg19[%c0_55, %c64] : memref<64x128xbf16, #tpu.memory_space<vmem>>, vector<64x32xbf16>
    tpu.vector_store %arg19[%c0_55, %c64], %96 {strides = array<i32>} : memref<64x128xbf16, #tpu.memory_space<vmem>>, vector<64x32xbf16>,
    %98 = vector.extract_strided_slice %10 {offsets = [0, 96], sizes = [64, 32], strides = [1, 1]} : vector<64x128xbf16> to vector<64x32xbf16>
    %99 = vector.extract_strided_slice %11 {offsets = [0, 96], sizes = [128, 32], strides = [1, 1]} : vector<128x128xbf16> to vector<128x32xbf16>
    %cst_56 = arith.constant dense<0.000000e+00> : vector<64x128xf32>
    %100 = tpu.matmul %98, %99, %cst_56 {dimension_numbers = #tpu.dot_dimension_numbers<[1], [1], [0], [0], [0, 0, 1, 0], [], []>} : vector<64x32xbf16>, vector<128x32xbf16>, vector<64x128xf32> -> vector<64x128xf32>
    %c0_57 = arith.constant 0 : index
    %c3 = arith.constant 3 : index
    %c0_58 = arith.constant 0 : index
    %c0_59 = arith.constant 0 : index
    %101 = vector.load %arg13[%c0_57, %c3, %c0_58, %c0_59] : memref<1x4x64x128xbf16, #tpu.memory_space<vmem>>, vector<1x1x64x128xbf16>
    %102 = vector.shape_cast %101 : vector<1x1x64x128xbf16> to vector<64x128xbf16>
    %103 = arith.extf %102 : vector<64x128xbf16> to vector<64x128xf32>
    %104 = arith.addf %100, %103 : vector<64x128xf32>
    %cst_60 = arith.constant -3.276700e+04 : f32
    %105 = vector.broadcast %cst_60 : f32 to vector<64x128xf32>
    %106 = arith.select %16, %105, %104 : vector<64x128xi1>, vector<64x128xf32>
    %c0_61 = arith.constant 0 : index
    %c3_62 = arith.constant 3 : index
    %c0_63 = arith.constant 0 : index
    %c0_64 = arith.constant 0 : index
    %107 = vector.load %arg16[%c0_61, %c3_62, %c0_63, %c0_64] : memref<1x4x64x128xf32, #tpu.memory_space<vmem>>, vector<1x1x64x128xf32>
    %108 = vector.shape_cast %107 : vector<1x1x64x128xf32> to vector<64x128xf32>
    %109 = vector.shape_cast %106 : vector<64x128xf32> to vector<1x1x64x128xf32>
    tpu.vector_store %arg16[%c0_61, %c3_62, %c0_63, %c0_64], %109 {strides = array<i32>} : memref<1x4x64x128xf32, #tpu.memory_space<vmem>>, vector<1x1x64x128xf32>,
    %cst_65 = arith.constant dense<0xFF800000> : vector<64xf32>
    %110 = vector.multi_reduction <maximumf>, %106, %cst_65 [1] : vector<64x128xf32> to vector<64xf32>
    %111 = vector.shape_cast %110 : vector<64xf32> to vector<64x1xf32>
    %112 = vector.broadcast %111 : vector<64x1xf32> to vector<64x128xf32>
    %113 = arith.subf %106, %112 : vector<64x128xf32>
    %114 = math.exp %113 : vector<64x128xf32>
    %cst_66 = arith.constant dense<0.000000e+00> : vector<64xf32>
    %115 = vector.multi_reduction <add>, %114, %cst_66 [1] : vector<64x128xf32> to vector<64xf32>
    %116 = vector.shape_cast %115 : vector<64xf32> to vector<64x1xf32>
    %117 = tpu.reciprocal %116 {approx = true} : vector<64x1xf32> -> vector<64x1xf32>
    %118 = vector.broadcast %117 : vector<64x1xf32> to vector<64x128xf32>
    %119 = arith.mulf %114, %118 : vector<64x128xf32>
    %120 = arith.truncf %119 : vector<64x128xf32> to vector<64x128xbf16>
    %121 = vector.extract_strided_slice %12 {offsets = [0, 96], sizes = [128, 32], strides = [1, 1]} : vector<128x128xbf16> to vector<128x32xbf16>
    %cst_67 = arith.constant dense<0.000000e+00> : vector<64x32xf32>
    %122 = tpu.matmul %120, %121, %cst_67 {dimension_numbers = #tpu.dot_dimension_numbers<[1], [0], [0], [1], [0, 0, 1, 1], [], []>} : vector<64x128xbf16>, vector<128x32xbf16>, vector<64x32xf32> -> vector<64x32xf32>
    %123 = arith.truncf %122 : vector<64x32xf32> to vector<64x32xbf16>
    %c0_68 = arith.constant 0 : index
    %c96 = arith.constant 96 : index
    %124 = vector.load %arg19[%c0_68, %c96] : memref<64x128xbf16, #tpu.memory_space<vmem>>, vector<64x32xbf16>
    tpu.vector_store %arg19[%c0_68, %c96], %123 {strides = array<i32>} : memref<64x128xbf16, #tpu.memory_space<vmem>>, vector<64x32xbf16>,
    %c0_69 = arith.constant 0 : index
    %c0_70 = arith.constant 0 : index
    %125 = vector.load %arg19[%c0_69, %c0_70] : memref<64x128xbf16, #tpu.memory_space<vmem>>, vector<64x128xbf16>
    %c0_71 = arith.constant 0 : index
    %c0_72 = arith.constant 0 : index
    %126 = vector.load %arg11[%c0_71, %c0_72] : memref<128x128xbf16, #tpu.memory_space<vmem>>, vector<128x128xbf16>
    %cst_73 = arith.constant dense<0.000000e+00> : vector<64x128xf32>
    %127 = tpu.matmul %125, %126, %cst_73 {dimension_numbers = #tpu.dot_dimension_numbers<[1], [0], [0], [1], [0, 0, 1, 1], [], []>} : vector<64x128xbf16>, vector<128x128xbf16>, vector<64x128xf32> -> vector<64x128xf32>
    %c0_74 = arith.constant 0 : index
    %c0_75 = arith.constant 0 : index
    %128 = vector.load %arg12[%c0_74, %c0_75] : memref<1x128xf32, #tpu.memory_space<vmem>>, vector<1x128xf32>
    %129 = vector.broadcast %128 : vector<1x128xf32> to vector<64x128xf32>
    %130 = arith.addf %127, %129 : vector<64x128xf32>
    %c0_76 = arith.constant 0 : index
    %c0_77 = arith.constant 0 : index
    %c0_78 = arith.constant 0 : index
    %131 = vector.load %arg15[%c0_76, %c0_77, %c0_78] : memref<1x64x128xf32, #tpu.memory_space<vmem>>, vector<1x64x128xf32>
    %132 = vector.shape_cast %131 : vector<1x64x128xf32> to vector<64x128xf32>
    %133 = vector.shape_cast %130 : vector<64x128xf32> to vector<1x64x128xf32>
    tpu.vector_store %arg15[%c0_76, %c0_77, %c0_78], %133 {strides = array<i32>} : memref<1x64x128xf32, #tpu.memory_space<vmem>>, vector<1x64x128xf32>,
    return
  }
  func.func @transform_0(%arg0: i32, %arg1: i32) -> (i32, i32, i32) {
    %c0_i32 = arith.constant 0 : i32
    %c0_i32_0 = arith.constant 0 : i32
    return %arg0, %arg1, %c0_i32 : i32, i32, i32
  }
  func.func @transform_1(%arg0: i32, %arg1: i32) -> (i32, i32, i32) {
    %c0_i32 = arith.constant 0 : i32
    %c0_i32_0 = arith.constant 0 : i32
    %c0_i32_1 = arith.constant 0 : i32
    return %arg0, %c0_i32, %c0_i32_0 : i32, i32, i32
  }
  func.func @transform_2(%arg0: i32, %arg1: i32) -> (i32, i32, i32) {
    %c0_i32 = arith.constant 0 : i32
    %c0_i32_0 = arith.constant 0 : i32
    %c0_i32_1 = arith.constant 0 : i32
    return %arg0, %c0_i32, %c0_i32_0 : i32, i32, i32
  }
  func.func @transform_3(%arg0: i32, %arg1: i32) -> (i32, i32) {
    %c0_i32 = arith.constant 0 : i32
    %c0_i32_0 = arith.constant 0 : i32
    %c0_i32_1 = arith.constant 0 : i32
    return %c0_i32, %c0_i32_0 : i32, i32
  }
  func.func @transform_4(%arg0: i32, %arg1: i32) -> (i32, i32) {
    %c0_i32 = arith.constant 0 : i32
    %c0_i32_0 = arith.constant 0 : i32
    %c0_i32_1 = arith.constant 0 : i32
    return %c0_i32, %c0_i32_0 : i32, i32
  }
  func.func @transform_5(%arg0: i32, %arg1: i32) -> (i32, i32) {
    %c0_i32 = arith.constant 0 : i32
    %c0_i32_0 = arith.constant 0 : i32
    %c0_i32_1 = arith.constant 0 : i32
    return %c0_i32, %c0_i32_0 : i32, i32
  }
  func.func @transform_6(%arg0: i32, %arg1: i32) -> (i32, i32) {
    %c0_i32 = arith.constant 0 : i32
    %c0_i32_0 = arith.constant 0 : i32
    %c0_i32_1 = arith.constant 0 : i32
    return %c0_i32, %c0_i32_0 : i32, i32
  }
  func.func @transform_7(%arg0: i32, %arg1: i32) -> (i32, i32) {
    %c0_i32 = arith.constant 0 : i32
    %c0_i32_0 = arith.constant 0 : i32
    %c0_i32_1 = arith.constant 0 : i32
    return %c0_i32, %c0_i32_0 : i32, i32
  }
  func.func @transform_8(%arg0: i32, %arg1: i32) -> (i32, i32) {
    %c0_i32 = arith.constant 0 : i32
    %c0_i32_0 = arith.constant 0 : i32
    %c0_i32_1 = arith.constant 0 : i32
    return %c0_i32, %c0_i32_0 : i32, i32
  }
  func.func @transform_9(%arg0: i32, %arg1: i32) -> (i32, i32) {
    %c0_i32 = arith.constant 0 : i32
    %c0_i32_0 = arith.constant 0 : i32
    %c0_i32_1 = arith.constant 0 : i32
    return %c0_i32, %c0_i32_0 : i32, i32
  }
  func.func @transform_10(%arg0: i32, %arg1: i32) -> (i32, i32) {
    %c0_i32 = arith.constant 0 : i32
    %c0_i32_0 = arith.constant 0 : i32
    %c0_i32_1 = arith.constant 0 : i32
    return %c0_i32, %c0_i32_0 : i32, i32
  }
  func.func @transform_11(%arg0: i32, %arg1: i32) -> (i32, i32, i32, i32) {
    %c0_i32 = arith.constant 0 : i32
    %c0_i32_0 = arith.constant 0 : i32
    %c0_i32_1 = arith.constant 0 : i32
    return %arg0, %c0_i32, %arg1, %c0_i32_0 : i32, i32, i32, i32
  }
  func.func @transform_12(%arg0: i32, %arg1: i32) -> (i32, i32, i32) {
    %c0_i32 = arith.constant 0 : i32
    %c0_i32_0 = arith.constant 0 : i32
    return %arg0, %arg1, %c0_i32 : i32, i32, i32
  }
  func.func @transform_13(%arg0: i32, %arg1: i32) -> (i32, i32, i32) {
    %c0_i32 = arith.constant 0 : i32
    %c0_i32_0 = arith.constant 0 : i32
    return %arg0, %arg1, %c0_i32 : i32, i32, i32
  }
  func.func @transform_14(%arg0: i32, %arg1: i32) -> (i32, i32, i32, i32) {
    %c0_i32 = arith.constant 0 : i32
    %c0_i32_0 = arith.constant 0 : i32
    %c0_i32_1 = arith.constant 0 : i32
    return %arg0, %c0_i32, %arg1, %c0_i32_0 : i32, i32, i32, i32
  }
}

</mosaic_0001>

<bundles_post_ra>
// kernel: tpu_custom_call.1
= control target key start
LH: loop header
LB: loop body
LE: loop exit
PB: predicated region body
PF: predicated region fallthrough
CT: control target
= control target key end

     0   :  { %s6246_s0 = inlined_call_operand.hbm [shape: bf16[2,128,128], index: 0, kind: input, shape index: {}]   ;;  %s6247_s1 = inlined_call_operand.hbm [shape: bf16[2,128,128], index: 1, kind: input, shape index: {}]   ;;  %s6248_s2 = inlined_call_operand.hbm [shape: bf16[2,128,128], index: 2, kind: input, shape index: {}]   ;;  %s6249_s3 = inlined_call_operand.hbm [shape: bf16[128,128], index: 3, kind: input, shape index: {}]   ;;  %s6250_s4 = inlined_call_operand.vmem [shape: f32[1,128], index: 4, kind: input, shape index: {}]   ;;  %s6251_s5 = inlined_call_operand.hbm [shape: bf16[128,128], index: 5, kind: input, shape index: {}]   ;;  %s6252_s6 = inlined_call_operand.vmem [shape: f32[1,128], index: 6, kind: input, shape index: {}]   ;;  %s6253_s7 = inlined_call_operand.hbm [shape: bf16[128,128], index: 7, kind: input, shape index: {}]   ;;  %s6254_s8 = inlined_call_operand.vmem [shape: f32[1,128], index: 8, kind: input, shape index: {}]   ;;  %s6255_s9 = inlined_call_operand.hbm [shape: bf16[128,128], index: 9, kind: input, shape index: {}]   ;;  %s6256_s10 = inlined_call_operand.vmem [shape: f32[1,128], index: 10, kind: input, shape index: {}]   ;;  %s6257_s11 = inlined_call_operand.hbm [shape: bf16[2,4,128,128], index: 11, kind: input, shape index: {}]   ;;  %s6258_s12 = inlined_call_operand.hbm [shape: bf16[2,128,128], index: 12, kind: input, shape index: {}]   ;;  %s6259_s13 = inlined_call_operand.hbm [shape: f32[2,128,128], index: 13, kind: output, shape index: {0}]   ;;  %s6260_s14 = inlined_call_operand.hbm [shape: f32[2,4,128,128], index: 14, kind: output, shape index: {1}]  }
   0x1   :  { %6294 = sst [smem:[#allocation50_spill]] %s6246_s0 }
   0x2   :  { %6295 = sst [smem:[#allocation51_spill]] %s6247_s1 }
   0x3   :  { %6296 = sst [smem:[#allocation52_spill]] %s6250_s4 }
   0x4   :  { %6297 = sst [smem:[#allocation53_spill]] %s6252_s6 }
   0x5   :  { %6298 = sst [smem:[#allocation54_spill]] %s6254_s8 }
   0x6   :  { %6299 = sst [smem:[#allocation55_spill]] %s6256_s10 }
   0x7   :  { %6300 = sst [smem:[#allocation56_spill]] %s6258_s12 }
   0x8   :  { %6301 = sst [smem:[#allocation57_spill]] %s6259_s13 }
   0x9   :  { %6302 = sst [smem:[#allocation58_spill]] %s6260_s14 }
   0xa   :  { %20 = vsyncpa [#allocation6], 0 }
   0xb   :  { %22 = vsyncpa [#allocation6 + $0x1], 0 }
   0xc   :  { %23 = vsyncpa [#allocation9], 0 }
   0xd   :  { %25 = vsyncpa [#allocation9 + $0x1], 0 }
   0xe   :  { %26 = vsyncpa [#allocation12], 0 }
   0xf   :  { %27 = vsyncpa [#allocation15], 0 }
  0x10   :  { %28 = vsyncpa [#allocation18], 0 }
  0x11   :  { %30 = vsyncpa [#allocation18 + $0x1], 0 }
  0x12   :  { %31 = vsyncpa [#allocation7], 0 }
  0x13   :  { %33 = vsyncpa [#allocation7 + $0x1], 0 }
  0x14   :  { %34 = vsyncpa [#allocation22], 0 }
  0x15   :  { %36 = vsyncpa [#allocation22 + $0x1], 0  ;;  %s4915_s29 = smov 0   ;;  %s4917_s30 = smov 0  }
  0x16   :  { %s4919_s15 = smov 0   ;;  %s4921_s16 = smov 0  }
  0x17   :  { %s4923_s17 = smov 0   ;;  %s4925_s18 = smov 0  }
  0x18   :  { %s4927_s19 = smov 0   ;;  %s4929_s20 = smov 0  }
  0x19   :  { %s4931_s21 = smov 0   ;;  %s4933_s22 = smov 0  }
  0x1a   :  { %s4935_s23 = smov 0  }
  0x1b LB: > { %6303 = sst [smem:[#allocation35_spill]] %s4771_s30  ;;  %s4971_s24 = sadd.s32 4294967295, %s4807_s23   ;;  %s4807_s23 = sphi %s4935_s23, %s42_s23   ;;  %s4803_s22 = sphi %s4933_s22, %s6394_s22   ;;  %s4799_s21 = sphi %s4931_s21, %s6393_s21   ;;  %s4795_s20 = sphi %s4929_s20, %s6392_s20   ;;  %s4791_s19 = sphi %s4927_s19, %s6391_s19   ;;  %s4787_s18 = sphi %s4925_s18, %s6390_s18   ;;  %s4783_s17 = sphi %s4923_s17, %s6389_s17   ;;  %s4779_s16 = sphi %s4921_s16, %s6383_s16   ;;  %s4775_s15 = sphi %s4919_s15, %s6388_s15   ;;  %s4771_s30 = sphi %s4917_s30, %s6387_s30   ;;  %s4767_s29 = sphi %s4915_s29, %s6381_s29  }
  0x1c   : > { %6304 = sst [smem:[#allocation36_spill]] %s4779_s16  ;;  %s3320_s25 = sadd.s32 4294967294, %s4807_s23  }
  0x1d   : > { %6305 = sst [smem:[#allocation37_spill]] %s4783_s17  ;;  %s51_s26 = sadd.s32 1, %s4799_s21 }
  0x1e   : > { %6306 = sst [smem:[#allocation38_spill]] %s4791_s19  ;;  %s54_s27 = sadd.s32 1, %s4803_s22 }
  0x1f   : > { %6307 = sst [smem:[#allocation39_spill]] %s4795_s20  ;;  %p52_p0 = scmp.ge.s32.totalorder %s51_s26, 2 }
  0x20   : > { %6308 = sst [smem:[#allocation40_spill]] %s4971_s24  ;;  %s63_s28 = sadd.s32 1, %s4787_s18 }
  0x21   : > { %p70_p1 = scmp.ne.s32.totalorder %s4787_s18, %s4783_s17  ;;  %p71_p2 = scmp.eq.s32.totalorder %s4807_s23, 0 }
  0x22   : > { %s6396_s26 = smov (%p52_p0, %s51_s26), 0  ;;  %s6398_s27 = smov (!%p52_p0, %s54_s27), %s4803_s22 }
  0x23   : > { %6309 = sst [smem:[#allocation41_spill]] %s6396_s26  ;;  %s59_s14 = ssub.s32 %s4799_s21, %s6396_s26 }
  0x24   : > { %p4990_p3 = por %p71_p2, %p70_p1  ;;  %p56_p4 = scmp.ge.s32.totalorder %s6398_s27, 2 }
  0x25   : > { %p6267_p5 = scmp.ne.s32.totalorder %s4783_s17, %s4779_s16  ;;  %p6278_p6 = scmp.eq.s32.totalorder %s4971_s24, 0 }
  0x26   : > { %s6310_s13 = scalar_select %p4990_p3, 1, 0 }
  0x27   : > { %s89_s10 = sadd.s32 1, %s4775_s15  ;;  %s6400_s27 = smov (%p56_p4, %s6398_s27), 0 }
  0x28   : > { %6311 = sst [smem:[#allocation42_spill]] %s6400_s27  ;;  %p5005_p7 = por %p6278_p6, %p6267_p5 }
  0x29   : > { %p96_p8 = scmp.ne.s32.totalorder %s4775_s15, %s4771_s30  ;;  %s58_s20 = ssub.s32 %s4803_s22, %s6400_s27 }
  0x2a   : > { %s6312_s26 = scalar_select %p5005_p7, 1, 0 }
  0x2b   : > { %p102_p9 = scmp.ne.s32.totalorder %s4771_s30, %s4767_s29  ;;  %s60_s4 = sor.u32 %s59_s14, %s58_s20 }
  0x2c   : > { %6313 = sst [smem:[#allocation43_spill]] %s6312_s26  ;;  %p87_p10 = scmp.eq.s32.totalorder %s58_s20, 0 }
  0x2d   : > { %p61_p11 = scmp.eq.s32.totalorder %s60_s4, 0  ;;  %p5017_p12 = por %p96_p8, %p71_p2 }
  0x2e   : > { %s5022_s6 = scalar_select %p87_p10, %s4775_s15, %s89_s10  }
  0x2f   : > { %s6314_s8 = scalar_select %p5017_p12, 1, 0 }
  0x30   : > { %6315 = sst [smem:[#allocation44_spill]] %s5022_s6  ;;  %p5029_p13 = por %p102_p9, %p6278_p6 }
  0x31   : > { %s5025_s19 = scalar_select %p61_p11, %s4787_s18, %s63_s28  }
  0x32   : > { %s6317_s26 = scalar_select %p5029_p13, 1, 0 }
  0x33   : > { %6316 = sst [smem:[#allocation45_spill]] %s5025_s19  ;;  %p378_p0 = scmp.eq.s32.totalorder %s4971_s24, 3 }
  0x34   : > { %6318 = sst [smem:[#allocation46_spill]] %s6317_s26  ;;  %p384_p4 = scmp.eq.s32.totalorder %s3320_s25, 3 }
  0x35   : > { %p3321_p5 = scmp.ge.s32.totalorder %s4807_s23, 1  ;;  %p5038_p7 = por %p378_p0, %p70_p1 }
  0x36   : > { %p419_p2 = scmp.lt.s32.totalorder %s4807_s23, 5  ;;  %p6321_p8 = scmp.ne.s32.totalorder %s4783_s17, %s4779_s16 }
  0x37   : > { %s6319_s4 = scalar_select %p5038_p7, 1, 0 }
  0x38   : > { %p5046_p3 = por %p384_p4, %p6321_p8  ;;  %p5050_p10 = pnand %p3321_p5, %p419_p2 }
  0x39   : > { %6320 = sst [smem:[#allocation47_spill]] %s6319_s4  ;;  %s4809_s29 = smov [#allocation11]  }
  0x3a   : > { %s6322_s10 = scalar_select %p5046_p3, 1, 0 }
  0x3b   : > { %s6324_s14 = scalar_select %p5050_p10, 1, 0 }
  0x3c   : > { %6323 = sst [smem:[#allocation48_spill]] %s6322_s10  ;;  %s431_s20 = sshll.u32 %s4809_s29, 4  ;;  %s5056_s20 = int_to_ptr.vmem [resolvable:$true] %s431_s20 }
  0x3d   : > { %6325 = sst [smem:[#allocation49_spill]] %s6324_s14  ;;  %p4102_p9 = pneg %p5050_p10 }
  0x3e   : > { %s4810_s28 = smov [#allocation14]   ;;  %s4811_s19 = smov [#allocation13]  }
  0x3f   : > { %p5060_p1 = pnand %p4102_p9, %p6278_p6  ;;  %s463_s27 = sshll.u32 %s4810_s28, 4  ;;  %s5064_s27 = int_to_ptr.vmem [resolvable:$true] %s463_s27 }
  0x40   : > { %s5066_s6 = sshll.u32 %s4811_s19, 4  ;;  %s4441_s29 = scalar_lea.hbm %s6249_s3, 1024  ;;  %s448_s6 = int_to_ptr.vmem [resolvable:$true] %s5066_s6 }
  0x41   : > { %p4442_p5 = scmp.ne.s32.totalorder %s6249_s3, %s4441_s29  ;;  %p5076_p11 = pneg %p5060_p1 }
  0x42   : > { %p4448_p2 = scmp.lt.u32.totalorder %s4441_s29, %s6249_s3 }
  0x43   : > { %p4444_p0 = pnand %p5076_p11, %p4442_p5 }
  0x45   : > { %p4445_p4 = pneg %p4444_p0 }
  0x47   : > { %p4450_p8 = pnand %p4448_p2, %p4445_p4 }
  0x49   : > { %4453 = shalt.err (!%p4450_p8)
}
  0x4a   : > { %s4454_s16 = scalar_lea.vmem %s5056_s20, 1024  ;;  %p4462_p7 = scmp.lt.s32.totalorder %s5056_s20, %s5056_s20 }
  0x4b   : > { %p4455_p9 = scmp.ne.s32.totalorder %s5056_s20, %s4454_s16  ;;  %p4463_p13 = scmp.lt.s32.totalorder %s4454_s16, %s4454_s16 }
  0x4d   : > { %p4457_p6 = pnand %p4455_p9, %p5076_p11  ;;  %p4464_p5 = por %p4463_p13, %p4462_p7 }
  0x4f   : > { %p4458_p3 = pneg %p4457_p6 }
  0x51   : > { %p4465_p0 = pnand %p4464_p5, %p4458_p3 }
  0x53   : > { %4468 = shalt.err (!%p4465_p0)
}
  0x54   : > { %s4812_s26 = smov 64   ;;  %s4813_s4 = smov 4  }
  0x55   : > { %4105 = dma.hbm_to_vmem [thread:$0]  (!%p5060_p1), %s6249_s3, 1024, %s5056_s20, [#allocation12], %s4812_s26, %s4812_s26, %s4813_s4  }
  0x56   : > { %s4469_s16 = scalar_lea.hbm %s6253_s7, 1024 }
  0x57   : > { %p4470_p3 = scmp.ne.s32.totalorder %s6253_s7, %s4469_s16  ;;  %p4476_p13 = scmp.lt.u32.totalorder %s4469_s16, %s6253_s7 }
  0x59   : > { %p4472_p6 = pnand %p4470_p3, %p5076_p11 }
  0x5b   : > { %p4473_p7 = pneg %p4472_p6 }
  0x5d   : > { %p4478_p4 = pnand %p4476_p13, %p4473_p7 }
  0x5f   : > { %4481 = shalt.err (!%p4478_p4)
}
  0x60   : > { %s4482_s20 = scalar_lea.vmem %s5064_s27, 1024  ;;  %p4490_p5 = scmp.lt.s32.totalorder %s5064_s27, %s5064_s27 }
  0x61   : > { %p4483_p2 = scmp.ne.s32.totalorder %s5064_s27, %s4482_s20  ;;  %p4491_p0 = scmp.lt.s32.totalorder %s4482_s20, %s4482_s20 }
  0x63   : > { %p4485_p8 = pnand %p4483_p2, %p5076_p11  ;;  %p4492_p3 = por %p4491_p0, %p4490_p5 }
  0x65   : > { %p4486_p9 = pneg %p4485_p8 }
  0x67   : > { %p4493_p6 = pnand %p4492_p3, %p4486_p9 }
  0x69   : > { %4496 = shalt.err (!%p4493_p6)
}
  0x6a   : > { %4111 = dma.hbm_to_vmem [thread:$0]  (!%p5060_p1), %s6253_s7, 1024, %s5064_s27, [#allocation15], %s4812_s26, %s4812_s26, %s4813_s4  }
  0x6b   : > { %s4497_s10 = scalar_lea.hbm %s6251_s5, 1024 }
  0x6c   : > { %p4498_p7 = scmp.ne.s32.totalorder %s6251_s5, %s4497_s10  ;;  %p4504_p2 = scmp.lt.u32.totalorder %s4497_s10, %s6251_s5 }
  0x6e   : > { %p4500_p13 = pnand %p4498_p7, %p5076_p11 }
  0x70   : > { %p4501_p4 = pneg %p4500_p13 }
  0x72   : > { %p4506_p8 = pnand %p4504_p2, %p4501_p4 }
  0x74   : > { %4509 = shalt.err (!%p4506_p8)
}
  0x75   : > { %s4510_s20 = scalar_lea.vmem %s448_s6, 1024  ;;  %p4518_p3 = scmp.lt.s32.totalorder %s448_s6, %s448_s6 }
  0x76   : > { %p4511_p9 = scmp.ne.s32.totalorder %s448_s6, %s4510_s20  ;;  %p4519_p6 = scmp.lt.s32.totalorder %s4510_s20, %s4510_s20 }
  0x78   : > { %p4513_p5 = pnand %p4511_p9, %p5076_p11  ;;  %p4520_p10 = por %p4519_p6, %p4518_p3 }
  0x7a   : > { %p4514_p0 = pneg %p4513_p5 }
  0x7c   : > { %p4521_p12 = pnand %p4520_p10, %p4514_p0 }
  0x7e   : > { %4524 = shalt.err (!%p4521_p12)
}
  0x7f   : > { %4108 = dma.hbm_to_vmem [thread:$0]  (!%p5060_p1), %s6251_s5, 1024, %s448_s6, [#allocation12], %s4812_s26, %s4812_s26, %s4813_s4  }
  0x80   : > { %s4814_s17 = smov [#allocation16]   ;;  %s4525_s29 = scalar_lea.hbm %s6255_s9, 1024 }
  0x81   : > { %s479_s24 = sshll.u32 %s4814_s17, 4  ;;  %p4526_p12 = scmp.ne.s32.totalorder %s6255_s9, %s4525_s29  ;;  %s480_s24 = int_to_ptr.vmem [resolvable:$true] %s479_s24 }
  0x82   : > { %p4532_p13 = scmp.lt.u32.totalorder %s4525_s29, %s6255_s9 }
  0x83   : > { %p4528_p10 = pnand %p4526_p12, %p5076_p11 }
  0x85   : > { %p4529_p7 = pneg %p4528_p10 }
  0x87   : > { %p4534_p4 = pnand %p4532_p13, %p4529_p7 }
  0x89   : > { %4537 = shalt.err (!%p4534_p4)
}
  0x8a   : > { %s4538_s6 = scalar_lea.vmem %s480_s24, 1024  ;;  %p4546_p5 = scmp.lt.s32.totalorder %s480_s24, %s480_s24 }
  0x8b   : > { %p4539_p2 = scmp.ne.s32.totalorder %s480_s24, %s4538_s6  ;;  %p4547_p0 = scmp.lt.s32.totalorder %s4538_s6, %s4538_s6 }
  0x8d   : > { %p4541_p8 = pnand %p4539_p2, %p5076_p11  ;;  %p4548_p3 = por %p4547_p0, %p4546_p5 }
  0x8f   : > { %p4542_p9 = pneg %p4541_p8 }
  0x91   : > { %p4549_p6 = pnand %p4548_p3, %p4542_p9 }
  0x93   : > { %4552 = shalt.err (!%p4549_p6)
}
  0x94   : > { %4114 = dma.hbm_to_vmem [thread:$0]  (!%p5060_p1), %s6255_s9, 1024, %s480_s24, [#allocation15], %s4812_s26, %s4812_s26, %s4813_s4  }
  0x95   : > { %p3326_p12 = scmp.ge.s32.totalorder %s4807_s23, 4 }
  0x96   : > { %s6288_s30 = sand.u32 (!%p3326_p12), 1, %s4807_s23   ;;  %s521_s17 = sand.u32 (!%p3326_p12), 1, %s4775_s15  }
  0x97   : > { %492 = sbr.rel (%p3326_p12) target bundleno = 280 (0x118), region = 48  ;;  %s5172_s14 = sshll.u32 (!%p3326_p12), %s521_s17, 6 }
  0x98   : > { %s3490_s25 = sshll.u32 (!%p3326_p12), %s4803_s22, 10  ;;  %s6328_s1 = sld [smem:[#allocation51_spill]] (!%p3326_p12) }
  0x99   : > { %s523_s4 = scalar_lea.vmem (!%p3326_p12), [#allocation8], %s5172_s14  ;;  %s5187_s28 = scalar_lea.sflag (!%p3326_p12), [#allocation9], %s6288_s30 }
  0x9a   : > { %s530_s24 = sshll.u32 (!%p3326_p12), %s523_s4, 4  ;;  %p6329_p11 = scmp.ne.s32.totalorder (!%p3326_p12), %s6314_s8, 0  ;;  %s5183_s24 = int_to_ptr.vmem [resolvable:$true] %s530_s24 }
  0x9e   : > { %s5180_s26 = scalar_lea.hbm %s6328_s1, %s3490_s25  ;;  %s4557_s6 = scalar_lea.hbm %s6328_s1, 2048 }
  0x9f   : > { %s4553_s19 = scalar_lea.hbm %s5180_s26, 1024  ;;  %p4558_p13 = scmp.lt.u32.totalorder %s5180_s26, %s6328_s1 }
  0xa0   : > { %p4554_p1 = scmp.ne.s32.totalorder %s5180_s26, %s4553_s19  ;;  %p4559_p4 = scmp.lt.u32.totalorder %s4557_s6, %s4553_s19 }
  0xa1   : > { %p4561_p8 = scmp.lt.u32.totalorder %s4553_s19, %s5180_s26 }
  0xa2   : > { %p4555_p10 = pnand %p4554_p1, %p6329_p11  ;;  %p4560_p2 = por %p4559_p4, %p4558_p13 }
  0xa4   : > { %p4556_p7 = pneg %p4555_p10  ;;  %p4562_p9 = por %p4561_p8, %p4560_p2 }
  0xa6   : > { %p4563_p5 = pnand %p4562_p9, %p4556_p7 }
  0xa8   : > { %4566 = shalt.err (!%p4563_p5)
}
  0xa9   : > { %s4567_s17 = scalar_lea.vmem %s5183_s24, 1024  ;;  %s4815_s10 = smov [#allocation8]  }
  0xaa   : > { %p4568_p0 = scmp.ne.s32.totalorder %s5183_s24, %s4567_s17  ;;  %s4571_s29 = sshll.u32 %s4815_s10, 4  ;;  %s4572_s29 = int_to_ptr.vmem [resolvable:$false] %s4571_s29 }
  0xab   : > { %s4573_s4 = scalar_lea.vmem %s4572_s29, 2048  ;;  %p4574_p12 = scmp.lt.s32.totalorder %s5183_s24, %s4572_s29 }
  0xac   : > { %p4569_p3 = pnand %p4568_p0, %p6329_p11  ;;  %p4575_p1 = scmp.lt.s32.totalorder %s4573_s4, %s4567_s17 }
  0xae   : > { %p4570_p6 = pneg %p4569_p3  ;;  %p4576_p10 = por %p4575_p1, %p4574_p12 }
  0xb0   : > { %p4577_p13 = pnand %p4576_p10, %p4570_p6 }
  0xb2   : > { %4580 = shalt.err (!%p4577_p13)
}
  0xb3   : > { %s6291_s19 = smov 64   ;;  %s6293_s16 = smov 4  }
  0xb4   : > { %4068 = dma.hbm_to_vmem [thread:$0]  (%p6329_p11), %s5180_s26, 1024, %s5183_s24, %s5187_s28, %s6291_s19, %s6291_s19, %s6293_s16  }
  0xb5   : > { %s5219_s27 = scalar_lea.hbm %s6248_s2, %s3490_s25  ;;  %s544_s12 = scalar_lea.vmem [#allocation10], %s5172_s14 }
  0xb6   : > { %s551_s17 = sshll.u32 %s544_s12, 4  ;;  %s5223_s10 = sand.u32 1, %s4787_s18   ;;  %s5244_s17 = int_to_ptr.vmem [resolvable:$true] %s551_s17 }
  0xb7   : > { %s6290_s29 = sshll.u32 %s4799_s21, 3  ;;  %s6289_s4 = sshll.u32 %s5223_s10, 5 }
  0xb8   : > { %s3329_s30 = sshll.u32 %s4803_s22, 4  ;;  %s500_s26 = scalar_lea.vmem [#allocation5], %s6289_s4 }
  0xb9   : > { %s5230_s1 = sadd.s32 %s3329_s30, %s6290_s29  ;;  %s509_s25 = sshll.u32 %s500_s26, 4  ;;  %s5235_s25 = int_to_ptr.vmem [resolvable:$true] %s509_s25 }
  0xba   : > { %s3330_s24 = sshll.u32 %s5230_s1, 6  ;;  %s6330_s0 = sld [smem:[#allocation50_spill]] }
  0xbb   : > { %s497_s30 = scalar_lea.sflag [#allocation6], %s5223_s10  ;;  %p6331_p4 = scmp.ne.s32.totalorder %s6310_s13, 0 }
  0xc0   : > { %s5242_s6 = scalar_lea.hbm %s6330_s0, %s3330_s24  ;;  %s4585_s29 = scalar_lea.hbm %s6330_s0, 2048 }
  0xc1   : > { %s4581_s12 = scalar_lea.hbm %s5242_s6, 512  ;;  %p4586_p9 = scmp.lt.u32.totalorder %s5242_s6, %s6330_s0 }
  0xc2   : > { %p4582_p7 = scmp.ne.s32.totalorder %s5242_s6, %s4581_s12  ;;  %p4587_p5 = scmp.lt.u32.totalorder %s4585_s29, %s4581_s12 }
  0xc3   : > { %p4589_p3 = scmp.lt.u32.totalorder %s4581_s12, %s5242_s6 }
  0xc4   : > { %p4583_p2 = pnand %p4582_p7, %p6331_p4  ;;  %p4588_p0 = por %p4587_p5, %p4586_p9 }
  0xc6   : > { %p4584_p8 = pneg %p4583_p2  ;;  %p4590_p6 = por %p4589_p3, %p4588_p0 }
  0xc8   : > { %p4591_p12 = pnand %p4590_p6, %p4584_p8 }
  0xca   : > { %4594 = shalt.err (!%p4591_p12)
}
  0xcb   : > { %s4595_s20 = scalar_lea.vmem %s5235_s25, 512  ;;  %s4818_s4 = smov [#allocation5]  }
  0xcc   : > { %p4596_p1 = scmp.ne.s32.totalorder %s5235_s25, %s4595_s20  ;;  %s4599_s26 = sshll.u32 %s4818_s4, 4  ;;  %s4600_s26 = int_to_ptr.vmem [resolvable:$false] %s4599_s26 }
  0xcd   : > { %s4601_s19 = scalar_lea.vmem %s4600_s26, 1024  ;;  %p4602_p7 = scmp.lt.s32.totalorder %s5235_s25, %s4600_s26 }
  0xce   : > { %p4597_p10 = pnand %p4596_p1, %p6331_p4  ;;  %p4603_p2 = scmp.lt.s32.totalorder %s4601_s19, %s4595_s20 }
  0xd0   : > { %p4598_p13 = pneg %p4597_p10  ;;  %p4604_p9 = por %p4603_p2, %p4602_p7 }
  0xd2   : > { %p4605_p5 = pnand %p4604_p9, %p4598_p13 }
  0xd4   : > { %4608 = shalt.err (!%p4605_p5)
}
  0xd5   : > { %s6332_s29 = smov 64   ;;  %s4609_s12 = scalar_lea.hbm %s5219_s27, 1024 }
  0xd6   : > { %4067 = dma.hbm_to_vmem [thread:$0]  (%p6331_p4), %s5242_s6, 512, %s5235_s25, %s497_s30, %s6332_s29, %s6332_s29, %s6293_s16  }
  0xd7   : > { %p4610_p8 = scmp.ne.s32.totalorder %s5219_s27, %s4609_s12  ;;  %s4613_s4 = scalar_lea.hbm %s6248_s2, 2048 }
  0xd8   : > { %p4614_p6 = scmp.lt.u32.totalorder %s5219_s27, %s6248_s2  ;;  %p4615_p12 = scmp.lt.u32.totalorder %s4613_s4, %s4609_s12 }
  0xd9   : > { %p4611_p0 = pnand %p4610_p8, %p6329_p11  ;;  %p4617_p10 = scmp.lt.u32.totalorder %s4609_s12, %s5219_s27 }
  0xda   : > { %p4616_p1 = por %p4615_p12, %p4614_p6 }
  0xdb   : > { %p4612_p3 = pneg %p4611_p0 }
  0xdc   : > { %p4618_p13 = por %p4617_p10, %p4616_p1 }
  0xde   : > { %p4619_p7 = pnand %p4618_p13, %p4612_p3 }
  0xe0   : > { %4622 = shalt.err (!%p4619_p7)
}
  0xe1   : > { %s4623_s25 = scalar_lea.vmem %s5244_s17, 1024  ;;  %s4819_s6 = smov [#allocation10]  }
  0xe2   : > { %p4624_p2 = scmp.ne.s32.totalorder %s5244_s17, %s4623_s25  ;;  %s4627_s30 = sshll.u32 %s4819_s6, 4  ;;  %s4628_s30 = int_to_ptr.vmem [resolvable:$false] %s4627_s30 }
  0xe3   : > { %s4629_s14 = scalar_lea.vmem %s4628_s30, 2048  ;;  %p4630_p8 = scmp.lt.s32.totalorder %s5244_s17, %s4628_s30 }
  0xe4   : > { %p4625_p9 = pnand %p4624_p2, %p6329_p11  ;;  %p4631_p0 = scmp.lt.s32.totalorder %s4629_s14, %s4623_s25 }
  0xe6   : > { %p4626_p5 = pneg %p4625_p9  ;;  %p4632_p6 = por %p4631_p0, %p4630_p8 }
  0xe8   : > { %p4633_p12 = pnand %p4632_p6, %p4626_p5 }
  0xea   : > { %4636 = shalt.err (!%p4633_p12)
}
  0xeb   : > { %4069 = dma.hbm_to_vmem [thread:$0]  (%p6329_p11), %s5219_s27, 1024, %s5244_s17, %s5187_s28, %s6332_s29, %s6332_s29, %s6293_s16  }
  0xec   : > { %s3337_s12 = sshll.u32 %s5223_s10, 7  ;;  %s3339_s20 = sshll.u32 %s4803_s22, 6 }
  0xed   : > { %s6333_s4 = sshll.u32 %s4799_s21, 3  ;;  %s565_s8 = scalar_lea.vmem [#allocation17], %s3337_s12 }
  0xee   : > { %s571_s26 = sadd.s32 %s3339_s20, %s6333_s4  ;;  %s586_s19 = sshll.u32 %s565_s8, 4  ;;  %s587_s19 = int_to_ptr.vmem [resolvable:$true] %s586_s19 }
  0xef   : > { %s3340_s25 = sshll.u32 %s571_s26, 6  ;;  %s4820_s28 = smov 1024  }
  0xf0   : > { %s4070_s6 = scalar_select %p6331_p4, [#allocation0], [#allocation27] }
  0xf1   : > { %4071 = sst [smem:[#allocation24]] (%p6331_p4), %s4820_s28  ;;  %s4821_s17 = smov 512  }
  0xf2   : > { %s578_s27 = sld [smem:[%s4070_s6]]   ;;  %s4822_s30 = smov 8  }
  0xf3   : > { %4072 = sst [smem:[#allocation24 + $0x1]] (%p6331_p4), %s4821_s17  ;;  %s4823_s14 = smov 64  }
  0xf4   : > { %4073 = sst [smem:[#allocation24 + $0x2]] (%p6331_p4), %s4822_s30  ;;  %s573_s4 = scalar_lea.hbm %s6257_s11, %s3340_s25 }
  0xf5   : > { %4074 = sst [smem:[#allocation24 + $0x3]] (%p6331_p4), %s4823_s14  ;;  %s4824_s26 = smov 4  }
  0xf6   : > { %4075 = sst [smem:[#allocation24 + $0x4]] (%p6331_p4), %s4823_s14  ;;  %s6334_s28 = sand.u32 1, %s4807_s23  }
  0xf7   : > { %4076 = sst [smem:[#allocation24 + $0x5]] (%p6331_p4), %s4824_s26  ;;  %s5321_s17 = scalar_lea.sflag [#allocation18], %s6334_s28 }
  0xf8   : > { %s3341_s8 = sshll.u32 %s578_s27, 26  ;;  %s4825_s30 = smov [#allocation23]  }
  0xf9   : > { %s3342_s6 = sadd.s32 134217728, %s3341_s8  ;;  %s6336_s14 = sshll.u32 %s5223_s10, 5 }
  0xfa   : > { %4077 = dma.general (%p6331_p4), %s573_s4, 2048, %s587_s19, %s5321_s17, %s4825_s30, [#allocation24], %s3342_s6, 0  }
  0xfb   : > { %s6335_s12 = sld [smem:[#allocation56_spill]]  ;;  %s613_s27 = scalar_lea.vmem [#allocation19], %s6336_s14 }
  0xfc   : > { %s622_s20 = sshll.u32 %s613_s27, 4  ;;  %s5335_s20 = int_to_ptr.vmem [resolvable:$true] %s622_s20 }
 0x101   : > { %s5331_s25 = scalar_lea.hbm %s6335_s12, %s3330_s24  ;;  %s4641_s16 = scalar_lea.hbm %s6335_s12, 2048 }
 0x102   : > { %s4637_s26 = scalar_lea.hbm %s5331_s25, 512  ;;  %p4642_p10 = scmp.lt.u32.totalorder %s5331_s25, %s6335_s12 }
 0x103   : > { %p4638_p11 = scmp.ne.s32.totalorder %s5331_s25, %s4637_s26  ;;  %p4643_p13 = scmp.lt.u32.totalorder %s4641_s16, %s4637_s26 }
 0x104   : > { %p4645_p2 = scmp.lt.u32.totalorder %s4637_s26, %s5331_s25 }
 0x105   : > { %p4639_p3 = pnand %p4638_p11, %p6331_p4  ;;  %p4644_p7 = por %p4643_p13, %p4642_p10 }
 0x107   : > { %p4640_p1 = pneg %p4639_p3  ;;  %p4646_p9 = por %p4645_p2, %p4644_p7 }
 0x109   : > { %p4647_p5 = pnand %p4646_p9, %p4640_p1 }
 0x10b   : > { %4650 = shalt.err (!%p4647_p5)
}
 0x10c   : > { %s4651_s10 = scalar_lea.vmem %s5335_s20, 512  ;;  %s4826_s4 = smov [#allocation19]  }
 0x10d   : > { %p4652_p8 = scmp.ne.s32.totalorder %s5335_s20, %s4651_s10  ;;  %s4655_s8 = sshll.u32 %s4826_s4, 4  ;;  %s4656_s8 = int_to_ptr.vmem [resolvable:$false] %s4655_s8 }
 0x10e   : > { %s4657_s6 = scalar_lea.vmem %s4656_s8, 1024  ;;  %p4658_p12 = scmp.lt.s32.totalorder %s5335_s20, %s4656_s8 }
 0x10f   : > { %p4653_p0 = pnand %p4652_p8, %p6331_p4  ;;  %p4659_p11 = scmp.lt.s32.totalorder %s4657_s6, %s4651_s10 }
 0x111   : > { %p4654_p6 = pneg %p4653_p0  ;;  %p4660_p3 = por %p4659_p11, %p4658_p12 }
 0x113   : > { %p4661_p10 = pnand %p4660_p3, %p4654_p6 }
 0x115   : > { %4664 = shalt.err (!%p4661_p10)
}
 0x116   : > { %s6337_s28 = smov 4  }
 0x117   : > { %4078 = dma.hbm_to_vmem [thread:$0]  (%p6331_p4), %s5331_s25, 512, %s5335_s20, %s5321_s17, %s6332_s29, %s6332_s29, %s6337_s28  }
 0x118 PF: > { %s6338_s30 = sld [smem:[#allocation49_spill]] }
 0x11e   : > { %p6339_p1 = scmp.ne.s32.totalorder %s6338_s30, 0 }
 0x11f   : > { %s6340_s14 = sld [smem:[#allocation37_spill]] (!%p6339_p1)  ;;  %s6341_s27 = sld [smem:[#allocation43_spill]] (!%p6339_p1) }
 0x120   : > { %634 = sbr.rel (%p6339_p1) target bundleno = 3889 (0xf31), region = 72 }
 0x125   : > { %s5365_s26 = sand.u32 (!%p6339_p1), 1, %s6340_s14   ;;  %p6342_p13 = scmp.ne.s32.totalorder (!%p6339_p1), %s6341_s27, 0 }
 0x126   : > { %s3348_s1 = sshll.u32 (!%p6339_p1), %s5365_s26, 5  ;;  %s637_s0 = scalar_lea.sflag (!%p6339_p1), [#allocation6], %s5365_s26 }
 0x127   : > { %s5369_s13 = scalar_lea.vmem [#allocation5], %s3348_s1 }
 0x128   : > { %4738 = dma.done.wait (%p6342_p13), %s637_s0, 512  }
 0x129   : > { %4740 = vsyncadd (%p6342_p13), %s637_s0, 4294966784  ;;  %s6343_s29 = sld [smem:[#allocation40_spill]]  ;;  %s6344_s17 = sld [smem:[#allocation35_spill]] }
 0x12a   : > { %s6345_s25 = sld [smem:[#allocation46_spill]] }
 0x12f   : > { %s645_s20 = sand.u32 1, %s6343_s29   ;;  %s647_s16 = sand.u32 1, %s6344_s17  }
 0x130   : > { %s3349_s24 = sshll.u32 %s647_s16, 6  ;;  %s646_s19 = scalar_lea.sflag [#allocation9], %s645_s20 }
 0x131   : > { %s5377_s10 = scalar_lea.vmem [#allocation8], %s3349_s24  ;;  %p6346_p4 = scmp.ne.s32.totalorder %s6345_s25, 0 }
 0x133   : > { %4742 = dma.done.wait (%p6346_p4), %s646_s19, 2048  }
 0x134   : > { %4744 = vsyncadd (%p6346_p4), %s646_s19, 4294965248  ;;  %s5383_s4 = scalar_lea.vmem [#allocation10], %s3349_s24  ;;  %p6347_p7 = scmp.eq.s32.totalorder %s6343_s29, 0 }
 0x136   : > { %4746 = dma.done.wait (%p6347_p7), [#allocation12], 2048   ;;  %p6348_p2 = pmov %p6347_p7 }
 0x138   : > { %4748 = vsyncadd (%p6348_p2), [#allocation12], 4294965248  ;;  %p6349_p9 = pmov %p6348_p2 }
 0x139   : > { %p6350_p5 = pmov %p6348_p2 }
 0x13a   : > { %4750 = dma.done.wait (%p6349_p9), [#allocation15], 2048  }
 0x13b   : > { %4752 = vsyncadd (%p6350_p5), [#allocation15], 4294965248  ;;  %s3355_s8 = sshll.u32 %s5365_s26, 7  ;;  %s680_s6 = scalar_lea.sflag [#allocation18], %s645_s20 }
 0x13c   : > { %s5394_s28 = scalar_lea.vmem [#allocation17], %s3355_s8 }
 0x13d   : > { %4754 = dma.done.wait (%p6342_p13), %s680_s6, 2560  }
 0x13e   : > { %4756 = vsyncadd (%p6342_p13), %s680_s6, 4294964736  ;;  %s3357_s30 = sshll.u32 %s5365_s26, 6  ;;  %s3358_s14 = sshll.u32 %s5365_s26, 8 }
 0x13f   : > { %s5402_s0 = scalar_lea.vmem [#allocation19], %s3348_s1  ;;  %s5404_s17 = scalar_lea.vmem [#allocation20], %s3357_s30 }
 0x140   : > { %s5406_s29 = scalar_lea.vmem [#allocation21], %s3358_s14  ;;  %s6351_s25 = sld [smem:[#allocation38_spill]] }
 0x146   : > { %p3359_p8 = scmp.ne.s32.totalorder %s6351_s25, 0 }
 0x147   : > { %v4245_v0 = vld [vmem:[#allocation13] sm:$0xff] (!%p3359_p8)   ;;  %v4247_v2 = vld [vmem:[#allocation13 + $0x8] sm:$0xff] (!%p3359_p8)   ;;  %v4249_v4 = vld [vmem:[#allocation13 + $0x10] sm:$0xff] (!%p3359_p8)   ;;  %s6352_s20 = sld [smem:[#allocation53_spill]] (!%p3359_p8)  ;;  %s6353_s19 = sld [smem:[#allocation54_spill]] (!%p3359_p8) }
 0x148   : > { %773 = sbr.rel (%p3359_p8) target bundleno = 605 (0x25d), region = 112  ;;  %v4246_v1 = vld [vmem:[#allocation14] sm:$0xff] (!%p3359_p8)   ;;  %3723 = vmatprep.subr.bf16.mxu0 (!%p3359_p8), %v4245_v0  ;;  %v4248_v3 = vld [vmem:[#allocation14 + $0x8] sm:$0xff] (!%p3359_p8)   ;;  %v4250_v5 = vld [vmem:[#allocation14 + $0x10] sm:$0xff] (!%p3359_p8)  }
 0x149   : > { %3755 = vmatprep.subr.bf16.mxu1 (!%p3359_p8), %v4246_v1  ;;  %3724 = vmatpush3.bf16.msra.mxu0 (!%p3359_p8), %v4245_v0  ;;  %v4251_v6 = vld [vmem:[#allocation13 + $0x18] sm:$0xff] (!%p3359_p8)   ;;  %v4253_v8 = vld [vmem:[#allocation13 + $0x20] sm:$0xff] (!%p3359_p8)   ;;  %v4255_v10 = vld [vmem:[#allocation13 + $0x28] sm:$0xff] (!%p3359_p8)  }
 0x14a   : > { %3756 = vmatpush3.bf16.msra.mxu1 (!%p3359_p8), %v4246_v1  ;;  %3725 = vmatprep.subr.bf16.mxu0 (!%p3359_p8), %v4247_v2  ;;  %v4252_v7 = vld [vmem:[#allocation14 + $0x18] sm:$0xff] (!%p3359_p8)   ;;  %v4254_v9 = vld [vmem:[#allocation14 + $0x20] sm:$0xff] (!%p3359_p8)   ;;  %v4256_v11 = vld [vmem:[#allocation14 + $0x28] sm:$0xff] (!%p3359_p8)  }
 0x14b   : > { %3757 = vmatprep.subr.bf16.mxu1 (!%p3359_p8), %v4248_v3  ;;  %v4261_v12 = vld [vmem:[%s5377_s10] sm:$0xff] (!%p3359_p8)   ;;  %v4257_v14 = vld [vmem:[#allocation13 + $0x30] sm:$0xff] (!%p3359_p8)   ;;  %v4259_v16 = vld [vmem:[#allocation13 + $0x38] sm:$0xff] (!%p3359_p8)  }
 0x14c   : > { %v4262_v13 = vld [vmem:[%s5383_s4] sm:$0xff] (!%p3359_p8)   ;;  %3739 = vmatprep.mubr.bf16.mxu0 (!%p3359_p8), %v4261_v12  ;;  %v4258_v15 = vld [vmem:[#allocation14 + $0x30] sm:$0xff] (!%p3359_p8)   ;;  %v4260_v17 = vld [vmem:[#allocation14 + $0x38] sm:$0xff] (!%p3359_p8)  }
 0x14d   : > { %3726 = vmatpush3.bf16.msra.mxu0 (!%p3359_p8), %v4247_v2  ;;  %3771 = vmatprep.mubr.bf16.mxu1 (!%p3359_p8), %v4262_v13  ;;  %v4263_v18 = vld [vmem:[%s5377_s10 + $0x8] sm:$0xff] (!%p3359_p8)   ;;  %v4265_v20 = vld [vmem:[%s5377_s10 + $0x10] sm:$0xff] (!%p3359_p8)   ;;  %v4267_v22 = vld [vmem:[%s5377_s10 + $0x18] sm:$0xff] (!%p3359_p8)  }
 0x14e   : > { %3758 = vmatpush3.bf16.msra.mxu1 (!%p3359_p8), %v4248_v3  ;;  %3727 = vmatprep.subr.bf16.mxu0 (!%p3359_p8), %v4249_v4  ;;  %v4264_v19 = vld [vmem:[%s5383_s4 + $0x8] sm:$0xff] (!%p3359_p8)   ;;  %v4266_v21 = vld [vmem:[%s5383_s4 + $0x10] sm:$0xff] (!%p3359_p8)   ;;  %v4268_v23 = vld [vmem:[%s5383_s4 + $0x18] sm:$0xff] (!%p3359_p8)  }
 0x14f   : > { %3759 = vmatprep.subr.bf16.mxu1 %v4250_v5  ;;  %v4269_v24 = vld [vmem:[%s5377_s10 + $0x20] sm:$0xff]   ;;  %v4271_v26 = vld [vmem:[%s5377_s10 + $0x28] sm:$0xff]   ;;  %v4273_v28 = vld [vmem:[%s5377_s10 + $0x30] sm:$0xff]  }
 0x150   : > { %v4270_v25 = vld [vmem:[%s5383_s4 + $0x20] sm:$0xff]   ;;  %v4272_v27 = vld [vmem:[%s5383_s4 + $0x28] sm:$0xff]   ;;  %v4274_v29 = vld [vmem:[%s5383_s4 + $0x30] sm:$0xff]  }
 0x151   : > { %3728 = vmatpush3.bf16.msra.mxu0 %v4249_v4  ;;  %v4275_v30 = vld [vmem:[%s5377_s10 + $0x38] sm:$0xff]   ;;  %v5428_v33 = vld [vmem:[%s6352_s20] ss:$0 sm:$0xff] }
 0x152   : > { %3760 = vmatpush3.bf16.msra.mxu1 %v4250_v5  ;;  %3729 = vmatprep.subr.bf16.mxu0 %v4251_v6  ;;  %v4276_v31 = vld [vmem:[%s5383_s4 + $0x38] sm:$0xff]   ;;  %v5433_v35 = vld [vmem:[%s6353_s19] ss:$0 sm:$0xff] }
 0x153   : > { %3761 = vmatprep.subr.bf16.mxu1 %v4252_v7 }
 0x155   : > { %3730 = vmatpush3.bf16.msra.mxu0 %v4251_v6 }
 0x156   : > { %3762 = vmatpush3.bf16.msra.mxu1 %v4252_v7  ;;  %3731 = vmatprep.subr.bf16.mxu0 %v4253_v8 }
 0x157   : > { %3763 = vmatprep.subr.bf16.mxu1 %v4254_v9 }
 0x159   : > { %3732 = vmatpush3.bf16.msra.mxu0 %v4253_v8 }
 0x15a   : > { %3764 = vmatpush3.bf16.msra.mxu1 %v4254_v9  ;;  %3733 = vmatprep.subr.bf16.mxu0 %v4255_v10 }
 0x15b   : > { %3765 = vmatprep.subr.bf16.mxu1 %v4256_v11 }
 0x15d   : > { %3734 = vmatpush3.bf16.msra.mxu0 %v4255_v10 }
 0x15e   : > { %3766 = vmatpush3.bf16.msra.mxu1 %v4256_v11  ;;  %3735 = vmatprep.subr.bf16.mxu0 %v4257_v14 }
 0x15f   : > { %3767 = vmatprep.subr.bf16.mxu1 %v4258_v15 }
 0x161   : > { %3736 = vmatpush3.bf16.msra.mxu0 %v4257_v14 }
 0x162   : > { %3768 = vmatpush3.bf16.msra.mxu1 %v4258_v15  ;;  %3737 = vmatprep.subr.bf16.mxu0 %v4259_v16 }
 0x163   : > { %3769 = vmatprep.subr.bf16.mxu1 %v4260_v17 }
 0x165   : > { %3738 = vmatpush3.bf16.msra.mxu0 %v4259_v16 }
 0x166   : > { %3770 = vmatpush3.bf16.msra.mxu1 %v4260_v17 }
 0x168   : > { %3740 = vmatmul.mubr.bf16.vlgmr.msra.gmra.mrb[0].mxu0 %v4263_v18 }
 0x169   : > { %3772 = vmatmul.mubr.bf16.vlgmr.msra.gmra.mrb[0].mxu1 %v4264_v19  ;;  %3743 = vmatprep.mubr.bf16.mxu0 %v4265_v20 }
 0x16a   : > { %3775 = vmatprep.mubr.bf16.mxu1 %v4266_v21 }
 0x170   : > { %3744 = vmatmul.mubr.bf16.gmra.mrb[4].mxu0 %v4267_v22 }
 0x171   : > { %3776 = vmatmul.mubr.bf16.gmra.mrb[4].mxu1 %v4268_v23  ;;  %3747 = vmatprep.mubr.bf16.mxu0 %v4269_v24 }
 0x172   : > { %3779 = vmatprep.mubr.bf16.mxu1 %v4270_v25 }
 0x178   : > { %3748 = vmatmul.mubr.bf16.gmra.mrb[8].mxu0 %v4271_v26 }
 0x179   : > { %3780 = vmatmul.mubr.bf16.gmra.mrb[8].mxu1 %v4272_v27  ;;  %3751 = vmatprep.mubr.bf16.mxu0 %v4273_v28 }
 0x17a   : > { %3783 = vmatprep.mubr.bf16.mxu1 %v4274_v29 }
 0x180   : > { %3752 = vmatmul.mubr.bf16.gmra.mrb[12].mxu0 %v4275_v30 }
 0x181   : > { %3784 = vmatmul.mubr.bf16.gmra.mrb[12].mxu1 %v4276_v31 }
 0x23b   : > { %v3741_v32 = vpop.f32.mrb[0].mxu0 }
 0x23c   : > { %v3773_v34 = vpop.f32.mrb[0].mxu1  ;;  %v943_v36 = vpop.f32.mrb[1].mxu0  ;;  %v952_v39 = vadd.f32 %v3741_v32, %v5428_v33 }
 0x23d   : > { %v1175_v37 = vpop.f32.mrb[1].mxu1  ;;  %v3742_v38 = vpop.f32.mrb[2].mxu0  ;;  %v1184_v43 = vadd.f32 %v3773_v34, %v5433_v35  ;;  %v944_v44 = vadd.f32 %v5428_v33, %v943_v36 }
 0x23e   : > { %v955_v40 = vadd.f32 %v3742_v38, %v5428_v33  ;;  %v3774_v41 = vpop.f32.mrb[2].mxu1  ;;  %v946_v42 = vpop.f32.mrb[3].mxu0  ;;  %v1176_v48 = vadd.f32 %v5433_v35, %v1175_v37 }
 0x23f   : > { %v1187_v45 = vadd.f32 %v3774_v41, %v5433_v35  ;;  %v947_v46 = vadd.f32 %v5428_v33, %v946_v42  ;;  %v1178_v47 = vpop.f32.mrb[3].mxu1 }
 0x240   : > { %v1239_v49 = vpack.c.bf16 %v955_v40, %v952_v39  ;;  %v1179_v50 = vadd.f32 %v5433_v35, %v1178_v47 }
 0x241   : > { %v1255_v51 = vpack.c.bf16 %v1187_v45, %v1184_v43  ;;  %v1238_v52 = vpack.c.bf16 %v947_v46, %v944_v44 }
 0x242   : > { %1247 = vst [vmem:[#allocation2 + $0x8] sm:$0xff] %v1239_v49  ;;  %v1254_v53 = vpack.c.bf16 %v1179_v50, %v1176_v48 }
 0x243   : > { %1263 = vst [vmem:[#allocation3 + $0x8] sm:$0xff] %v1255_v51  ;;  %1246 = vst [vmem:[#allocation2] sm:$0xff] %v1238_v52  ;;  %v3745_v54 = vpop.f32.mrb[4].mxu0 }
 0x244   : > { %1262 = vst [vmem:[#allocation3] sm:$0xff] %v1254_v53  ;;  %v3777_v55 = vpop.f32.mrb[4].mxu1  ;;  %v959_v56 = vpop.f32.mrb[5].mxu0  ;;  %v968_v59 = vadd.f32 %v3745_v54, %v5428_v33 }
 0x245   : > { %v1191_v57 = vpop.f32.mrb[5].mxu1  ;;  %v3746_v58 = vpop.f32.mrb[6].mxu0  ;;  %v1200_v63 = vadd.f32 %v3777_v55, %v5433_v35  ;;  %v960_v0 = vadd.f32 %v5428_v33, %v959_v56 }
 0x246   : > { %v971_v60 = vadd.f32 %v3746_v58, %v5428_v33  ;;  %v3778_v61 = vpop.f32.mrb[6].mxu1  ;;  %v962_v62 = vpop.f32.mrb[7].mxu0  ;;  %v1192_v4 = vadd.f32 %v5433_v35, %v1191_v57 }
 0x247   : > { %v1203_v1 = vadd.f32 %v3778_v61, %v5433_v35  ;;  %v963_v2 = vadd.f32 %v5428_v33, %v962_v62  ;;  %v1194_v3 = vpop.f32.mrb[7].mxu1 }
 0x248   : > { %v1241_v5 = vpack.c.bf16 %v971_v60, %v968_v59  ;;  %v1195_v6 = vadd.f32 %v5433_v35, %v1194_v3 }
 0x249   : > { %v1257_v7 = vpack.c.bf16 %v1203_v1, %v1200_v63  ;;  %v1240_v8 = vpack.c.bf16 %v963_v2, %v960_v0 }
 0x24a   : > { %1249 = vst [vmem:[#allocation2 + $0x18] sm:$0xff] %v1241_v5  ;;  %v1256_v9 = vpack.c.bf16 %v1195_v6, %v1192_v4 }
 0x24b   : > { %1265 = vst [vmem:[#allocation3 + $0x18] sm:$0xff] %v1257_v7  ;;  %1248 = vst [vmem:[#allocation2 + $0x10] sm:$0xff] %v1240_v8  ;;  %v3749_v10 = vpop.f32.mrb[8].mxu0 }
 0x24c   : > { %1264 = vst [vmem:[#allocation3 + $0x10] sm:$0xff] %v1256_v9  ;;  %v3781_v11 = vpop.f32.mrb[8].mxu1  ;;  %v975_v12 = vpop.f32.mrb[9].mxu0  ;;  %v984_v15 = vadd.f32 %v3749_v10, %v5428_v33 }
 0x24d   : > { %v1207_v13 = vpop.f32.mrb[9].mxu1  ;;  %v3750_v14 = vpop.f32.mrb[10].mxu0  ;;  %v1216_v19 = vadd.f32 %v3781_v11, %v5433_v35  ;;  %v976_v20 = vadd.f32 %v5428_v33, %v975_v12 }
 0x24e   : > { %v987_v16 = vadd.f32 %v3750_v14, %v5428_v33  ;;  %v3782_v17 = vpop.f32.mrb[10].mxu1  ;;  %v978_v18 = vpop.f32.mrb[11].mxu0  ;;  %v1208_v24 = vadd.f32 %v5433_v35, %v1207_v13 }
 0x24f   : > { %v1219_v21 = vadd.f32 %v3782_v17, %v5433_v35  ;;  %v979_v22 = vadd.f32 %v5428_v33, %v978_v18  ;;  %v1210_v23 = vpop.f32.mrb[11].mxu1 }
 0x250   : > { %v1243_v25 = vpack.c.bf16 %v987_v16, %v984_v15  ;;  %v1211_v26 = vadd.f32 %v5433_v35, %v1210_v23 }
 0x251   : > { %v1259_v27 = vpack.c.bf16 %v1219_v21, %v1216_v19  ;;  %v1242_v28 = vpack.c.bf16 %v979_v22, %v976_v20 }
 0x252   : > { %1251 = vst [vmem:[#allocation2 + $0x28] sm:$0xff] %v1243_v25  ;;  %v1258_v29 = vpack.c.bf16 %v1211_v26, %v1208_v24 }
 0x253   : > { %1267 = vst [vmem:[#allocation3 + $0x28] sm:$0xff] %v1259_v27  ;;  %1250 = vst [vmem:[#allocation2 + $0x20] sm:$0xff] %v1242_v28  ;;  %v3753_v30 = vpop.f32.mrb[12].mxu0 }
 0x254   : > { %1266 = vst [vmem:[#allocation3 + $0x20] sm:$0xff] %v1258_v29  ;;  %v3785_v31 = vpop.f32.mrb[12].mxu1  ;;  %v991_v32 = vpop.f32.mrb[13].mxu0  ;;  %v1000_v37 = vadd.f32 %v3753_v30, %v5428_v33 }
 0x255   : > { %v1223_v34 = vpop.f32.mrb[13].mxu1  ;;  %v3754_v36 = vpop.f32.mrb[14].mxu0  ;;  %v1232_v41 = vadd.f32 %v3785_v31, %v5433_v35  ;;  %v992_v42 = vadd.f32 %v5428_v33, %v991_v32 }
 0x256   : > { %v1003_v38 = vadd.f32 %v3754_v36, %v5428_v33  ;;  %v3786_v39 = vpop.f32.mrb[14].mxu1  ;;  %v994_v40 = vpop.f32.mrb[15].mxu0  ;;  %v1224_v46 = vadd.f32 %v5433_v35, %v1223_v34 }
 0x257   : > { %v1235_v43 = vadd.f32 %v3786_v39, %v5433_v35  ;;  %v995_v44 = vadd.f32 %v5428_v33, %v994_v40  ;;  %v1226_v45 = vpop.f32.mrb[15].mxu1 }
 0x258   : > { %v1245_v47 = vpack.c.bf16 %v1003_v38, %v1000_v37  ;;  %v1227_v48 = vadd.f32 %v5433_v35, %v1226_v45 }
 0x259   : > { %v1261_v49 = vpack.c.bf16 %v1235_v43, %v1232_v41  ;;  %v1244_v50 = vpack.c.bf16 %v995_v44, %v992_v42 }
 0x25a   : > { %1253 = vst [vmem:[#allocation2 + $0x38] sm:$0xff] %v1245_v47  ;;  %v1260_v51 = vpack.c.bf16 %v1227_v48, %v1224_v46 }
 0x25b   : > { %1269 = vst [vmem:[#allocation3 + $0x38] sm:$0xff] %v1261_v49  ;;  %1252 = vst [vmem:[#allocation2 + $0x30] sm:$0xff] %v1244_v50 }
 0x25c   : > { %1268 = vst [vmem:[#allocation3 + $0x30] sm:$0xff] %v1260_v51 }
 0x25d PF: > { %v4277_v52 = vld [vmem:[#allocation11] sm:$0xff]   ;;  %v4278_v53 = vld [vmem:[#allocation11 + $0x8] sm:$0xff]   ;;  %v4279_v33 = vld [vmem:[#allocation11 + $0x10] sm:$0xff]   ;;  %vm1490_vm0 = vcmask 261120   ;;  %s6354_s4 = sld [smem:[#allocation52_spill]]  ;;  %v4827_v41 = vmov 0  }
 0x25e   : > { %3787 = vmatprep.subr.bf16.mxu0 %v4277_v52  ;;  %v4280_v54 = vld [vmem:[#allocation11 + $0x18] sm:$0xff]   ;;  %v4285_v55 = vld [vmem:[%s5369_s13] sm:$0xff]   ;;  %v5470_v57 = vld [vmem:[#allocation2 + $0x8] sm:$0xff]  ;;  %s4828_s8 = smov 96   ;;  %s4829_s6 = smov 64  }
 0x25f   : > { %3788 = vmatpush3.bf16.msra.mxu0 %v4277_v52  ;;  %3803 = vmatprep.mubr.bf16.mxu0 %v4285_v55  ;;  %v4281_v35 = vld [vmem:[#allocation11 + $0x20] sm:$0xff]   ;;  %v4282_v59 = vld [vmem:[#allocation11 + $0x28] sm:$0xff]   ;;  %v1507_v60 = vsel %vm1490_vm0, %v5470_v57, 0  ;;  %v4283_v61 = vld [vmem:[#allocation11 + $0x30] sm:$0xff]   ;;  %s4830_s30 = smov 32   ;;  %s6372_s14 = sld [smem:[#allocation39_spill]] }
 0x260   : > { %3789 = vmatprep.subr.bf16.mxu0 %v4278_v53  ;;  %v5468_v56 = vld [vmem:[#allocation2] sm:$0xff]  ;;  %v5480_v62 = vld [vmem:[#allocation2 + $0x10] sm:$0xff]  ;;  %v4284_v63 = vld [vmem:[#allocation11 + $0x38] sm:$0xff]   ;;  %s6373_s27 = sld [smem:[#allocation55_spill]]  ;;  %s3017_s19 = sshll.u32 %s5404_s17, 4  ;;  %s6158_s19 = int_to_ptr.vmem [resolvable:$true] %s3017_s19 }
 0x261   : > { %4027 = vmatprep.subr.msk.bf16.mxu1 %vm1490_vm0, %v5468_v56  ;;  %v1504_v58 = vsel %vm1490_vm0, %v5468_v56, 0  ;;  %v1510_v0 = vsel %vm1490_vm0, %v5480_v62, 0  ;;  %v5486_v1 = vld [vmem:[#allocation2 + $0x18] sm:$0xff]  ;;  %v4286_v2 = vld [vmem:[%s5369_s13 + $0x8] sm:$0xff]   ;;  %v4287_v3 = vld [vmem:[%s5369_s13 + $0x10] sm:$0xff]   ;;  %s4831_s25 = smov [#allocation20]  }
 0x262   : > { %3812 = vmatpush3.bf16.xpose.msra.mxu1 %v1504_v58  ;;  %v1513_v4 = vsel %vm1490_vm0, %v5486_v1, 0  ;;  %v5494_v5 = vld [vmem:[#allocation2 + $0x20] sm:$0xff]  ;;  %v4288_v6 = vld [vmem:[%s5369_s13 + $0x18] sm:$0xff]   ;;  %v5501_v8 = vld [vmem:[#allocation2 + $0x28] sm:$0xff]  ;;  %s6374_s13 = sld [smem:[#allocation47_spill]] }
 0x263   : > { %3790 = vmatpush3.bf16.msra.mxu0 %v4278_v53  ;;  %4028 = vmatprep.subr.msk.bf16.mxu1 %vm1490_vm0, %v5470_v57  ;;  %v1516_v7 = vsel %vm1490_vm0, %v5494_v5, 0  ;;  %v1519_v9 = vsel %vm1490_vm0, %v5501_v8, 0  ;;  %v5507_v10 = vld [vmem:[#allocation2 + $0x30] sm:$0xff]  ;;  %v5513_v12 = vld [vmem:[#allocation2 + $0x38] sm:$0xff]  ;;  %v3394_v15 = vld [vmem:[%s6354_s4] ss:$0 sm:$0xff] }
 0x264   : > { %3791 = vmatprep.subr.bf16.mxu0 %v4279_v33  ;;  %v1522_v11 = vsel %vm1490_vm0, %v5507_v10, 0  ;;  %v1525_v13 = vsel %vm1490_vm0, %v5513_v12, 0  ;;  %v1460_v37 = vld [vmem:[%s5402_s0 + $0x8] sm:$0xf]  ;;  %v1458_v38 = vld [vmem:[%s5402_s0] sm:$0xf] }
 0x265   : > { %v1461_v39 = vld [vmem:[%s5402_s0 + $0xc] sm:$0xf]  ;;  %vm1468_vm1 = vcmp.eq.bf16.partialorder %v1460_v37, 0  ;;  %v1459_v40 = vld [vmem:[%s5402_s0 + $0x4] sm:$0xf]  ;;  %vm1466_vm2 = vcmp.eq.bf16.partialorder %v1458_v38, 0 }
 0x266   : > { %vm1469_vm3 = vcmp.eq.bf16.partialorder %v1461_v39, 0  ;;  %v1594_v42 = vsel %vm1468_vm1, 65537, %v4827_v41  ;;  %vm1467_vm4 = vcmp.eq.bf16.partialorder %v1459_v40, 0  ;;  %v3556_v43 = vld [vmem:[%s5394_s28 + $0x8] sm:$0xff]   ;;  %v1592_v44 = vsel %vm1466_vm2, 65537, %v4827_v41  ;;  %v3493_v45 = vld [vmem:[%s5394_s28] sm:$0xff]  }
 0x267   : > { %3792 = vmatpush3.bf16.msra.mxu0 %v4279_v33  ;;  %v1595_v46 = vsel %vm1469_vm3, 65537, %v4827_v41  ;;  %v1464_v47 = vld [vmem:[%s5402_s0 + $0x18] sm:$0xf]  ;;  %v1602_v48 = vunpack.c.l.b16 %v1594_v42  ;;  %v1593_v49 = vsel %vm1467_vm4, 65537, %v4827_v41  ;;  %v1462_v50 = vld [vmem:[%s5402_s0 + $0x10] sm:$0xf]  ;;  %v3498_v51 = vunpack.c.l.bf16 %v3556_v43 }
 0x268   : > { %3793 = vmatprep.subr.bf16.mxu0 %v4280_v54  ;;  %v1600_v52 = vunpack.c.l.b16 %v1592_v44  ;;  %v1465_v53 = vld [vmem:[%s5402_s0 + $0x1c] sm:$0xf]  ;;  %v3494_v33 = vunpack.c.l.bf16 %v3493_v45  ;;  %vm1472_vm5 = vcmp.eq.bf16.partialorder %v1464_v47, 0  ;;  %v1463_v55 = vld [vmem:[%s5402_s0 + $0x14] sm:$0xf]  ;;  %v1601_v58 = vunpack.c.l.b16 %v1593_v49  ;;  %v4433_v38 = vld [vmem:[#allocation3 + $0x8] sm:$0xff] }
 0x269   : > { %vm1470_vm6 = vcmp.eq.bf16.partialorder %v1462_v50, 0  ;;  %vm5548_vm7 = vcmp.ne.s32.totalorder %v1602_v48, 0  ;;  %vm1473_vm8 = vcmp.eq.bf16.partialorder %v1465_v53, 0  ;;  %vm1471_vm10 = vcmp.eq.bf16.partialorder %v1463_v55, 0  ;;  %v5653_v55 = vld [vmem:[#allocation3 + $0x10] sm:$0xff]  ;;  %v4434_v42 = vld [vmem:[#allocation3 + $0x20] sm:$0xff] }
 0x26a   : > { %3814 = vmatpush3.bf16.xpose.msra.mxu1 %v1507_v60  ;;  %v3495_v60 = vunpack.c.h.bf16 %v3493_v45  ;;  %vm5552_vm9 = vcmp.ne.s32.totalorder %v1600_v52, 0  ;;  %vm5566_vm12 = vcmp.ne.s32.totalorder %v1601_v58, 0  ;;  %v5661_v58 = vld [vmem:[#allocation3 + $0x20] sm:$0xff]  ;;  %v4436_v45 = vld [vmem:[#allocation3 + $0x10] sm:$0xff]  ;;  %v4438_v49 = vld [vmem:[#allocation3 + $0x28] sm:$0xff]  ;;  %vm2494_vm2 = vcmask 785920  }
 0x26b   : > { %3794 = vmatpush3.bf16.msra.mxu0 %v4280_v54  ;;  %4029 = vmatprep.subr.msk.bf16.mxu1 %vm1490_vm0, %v5480_v62  ;;  %v1603_v54 = vunpack.c.l.b16 %v1595_v46  ;;  %vm2843_vm3 = vcmask 1048320   ;;  %s3483_s20 = sshll.u32 %s6372_s14, 4  ;;  %s4665_s0 = scalar_lea.vmem %s6158_s19, 1024 }
 0x26c   : > { %3795 = vmatprep.subr.bf16.mxu0 %v4281_v35  ;;  %p4666_p0 = scmp.ne.s32.totalorder %s6158_s19, %s4665_s0  ;;  %p6376_p6 = scmp.ne.s32.totalorder %s6374_s13, 0 }
 0x26d   : > { %vm5556_vm11 = vcmp.ne.s32.totalorder %v1603_v54, 0  ;;  %v5648_v54 = vld [vmem:[#allocation3 + $0x8] sm:$0xff] }
 0x26e   : > { %p4667_p12 = pnand %p4666_p0, %p6376_p6 }
 0x26f   : > { %3796 = vmatpush3.bf16.msra.mxu0 %v4281_v35  ;;  %v3499_v35 = vunpack.c.h.bf16 %v3556_v43 }
 0x270   : > { %3797 = vmatprep.subr.bf16.mxu0 %v4282_v59  ;;  %p4668_p11 = pneg %p4667_p12 }
 0x272   : > { %3816 = vmatpush3.bf16.xpose.msra.mxu1 %v1510_v0 }
 0x273   : > { %3798 = vmatpush3.bf16.msra.mxu0 %v4282_v59  ;;  %4030 = vmatprep.subr.msk.bf16.mxu1 %vm1490_vm0, %v5486_v1 }
 0x274   : > { %3799 = vmatprep.subr.bf16.mxu0 %v4283_v61 }
 0x277   : > { %3800 = vmatpush3.bf16.msra.mxu0 %v4283_v61 }
 0x278   : > { %3801 = vmatprep.subr.bf16.mxu0 %v4284_v63 }
 0x27a   : > { %3818 = vmatpush3.bf16.xpose.msra.mxu1 %v1513_v4 }
 0x27b   : > { %3802 = vmatpush3.bf16.msra.mxu0 %v4284_v63  ;;  %4031 = vmatprep.subr.msk.bf16.mxu1 %vm1490_vm0, %v5494_v5 }
 0x27e   : > { %3804 = vmatmul.mubr.bf16.vlgmr.msra.gmra.mrb[0].mxu0 %v4286_v2 }
 0x27f   : > { %3807 = vmatprep.mubr.bf16.mxu0 %v4287_v3  ;;  %v1598_v3 = vsel %vm1472_vm5, 65537, %v4827_v41 }
 0x282   : > { %3820 = vmatpush3.bf16.xpose.msra.mxu1 %v1516_v7 }
 0x283   : > { %4032 = vmatprep.subr.msk.bf16.mxu1 %vm1490_vm0, %v5501_v8 }
 0x286   : > { %3808 = vmatmul.mubr.bf16.gmra.mrb[4].mxu0 %v4288_v6 }
 0x28a   : > { %3822 = vmatpush3.bf16.xpose.msra.mxu1 %v1519_v9  ;;  %v3558_v9 = vld [vmem:[%s5394_s28 + $0x18] sm:$0xff]  }
 0x28b   : > { %4033 = vmatprep.subr.msk.bf16.mxu1 %vm1490_vm0, %v5507_v10 }
 0x292   : > { %3824 = vmatpush3.bf16.xpose.msra.mxu1 %v1522_v11  ;;  %v1596_v11 = vsel %vm1470_vm6, 65537, %v4827_v41 }
 0x293   : > { %4034 = vmatprep.subr.msk.bf16.mxu1 %vm1490_vm0, %v5513_v12 }
 0x29a   : > { %3826 = vmatpush3.bf16.xpose.msra.mxu1 %v1525_v13 }
 0x351   : > { %v3805_v14 = vpop.f32.mrb[0].mxu0 }
 0x352   : > { %v1407_v16 = vpop.f32.mrb[1].mxu0  ;;  %v1416_v18 = vadd.f32 %v3805_v14, %v3394_v15 }
 0x353   : > { %v3806_v17 = vpop.f32.mrb[2].mxu0  ;;  %v1408_v21 = vadd.f32 %v3394_v15, %v1407_v16  ;;  %v3557_v16 = vld [vmem:[%s5394_s28 + $0x10] sm:$0xff]  }
 0x354   : > { %v1419_v19 = vadd.f32 %v3806_v17, %v3394_v15  ;;  %v1410_v20 = vpop.f32.mrb[3].mxu0  ;;  %v3503_v39 = vunpack.c.h.bf16 %v3557_v16 }
 0x355   : > { %v1411_v22 = vadd.f32 %v3394_v15, %v1410_v20 }
 0x356   : > { %v5522_v23 = vpack.c.bf16 %v1419_v19, %v1416_v18  ;;  %v1599_v18 = vsel %vm1473_vm8, 65537, %v4827_v41 }
 0x357   : > { %v5524_v24 = vpack.c.bf16 %v1411_v22, %v1408_v21  ;;  %v1606_v21 = vunpack.c.l.b16 %v1598_v3  ;;  %v1597_v22 = vsel %vm1471_vm10, 65537, %v4827_v41 }
 0x359   : > { %v3809_v25 = vpop.f32.mrb[4].mxu0  ;;  %3827 = vmatprep.mubr.msk.bf16.mxu1 %vm1490_vm0, %v5524_v24  ;;  %vm5595_vm13 = vcmp.ne.s32.totalorder %v1606_v21, 0 }
 0x35a   : > { %v1432_v26 = vadd.f32 %v3809_v25, %v3394_v15  ;;  %v1423_v27 = vpop.f32.mrb[5].mxu0  ;;  %3828 = vmatmul.mubr.msk.bf16.vlgmr.msra.gmra.mrb[0].mxu1 %vm1490_vm0, %v5522_v23 }
 0x35b   : > { %v1424_v28 = vadd.f32 %v3394_v15, %v1423_v27  ;;  %v3810_v29 = vpop.f32.mrb[6].mxu0  ;;  %v1604_v27 = vunpack.c.l.b16 %v1596_v11 }
 0x35c   : > { %v1435_v30 = vadd.f32 %v3810_v29, %v3394_v15  ;;  %v1426_v31 = vpop.f32.mrb[7].mxu0 }
 0x35d   : > { %v1427_v32 = vadd.f32 %v3394_v15, %v1426_v31  ;;  %v3507_v31 = vunpack.c.h.bf16 %v3558_v9  ;;  %vm5600_vm14 = vcmp.ne.s32.totalorder %v1604_v27, 0 }
 0x35e   : > { %v5530_v34 = vpack.c.bf16 %v1435_v30, %v1432_v26  ;;  %v3506_v26 = vunpack.c.l.bf16 %v3558_v9  ;;  %v1607_v30 = vunpack.c.l.b16 %v1599_v18 }
 0x35f   : > { %v5532_v36 = vpack.c.bf16 %v1427_v32, %v1424_v28  ;;  %v3502_v28 = vunpack.c.l.bf16 %v3557_v16  ;;  %v1605_v32 = vunpack.c.l.b16 %v1597_v22  ;;  %v5686_v22 = vld [vmem:[#allocation3 + $0x30] sm:$0xff] }
 0x360   : > { %vm5604_vm15 = vcmp.ne.s32.totalorder %v1607_v30, 0 }
 0x361   : > { %3831 = vmatprep.mubr.msk.bf16.mxu1 %vm1490_vm0, %v5532_v36  ;;  %vm5612_vm1 = vcmp.ne.s32.totalorder %v1605_v32, 0 }
 0x362   : > { %3832 = vmatmul.mubr.msk.bf16.gmra.mrb[4].mxu1 %vm1490_vm0, %v5530_v34 }
 0x42d   : > { %v3829_v59 = vpop.f32.mrb[0].mxu1 }
 0x42e   : > { %v1570_v63 = vadd.f32 %v3829_v59, %v3498_v51  ;;  %v1561_v0 = vpop.f32.mrb[1].mxu1  ;;  %v5665_v59 = vld [vmem:[#allocation3 + $0x28] sm:$0xff] }
 0x42f   : > { %v1562_v4 = vadd.f32 %v3494_v33, %v1561_v0  ;;  %v3830_v6 = vpop.f32.mrb[2].mxu1  ;;  %v5646_v33 = vld [vmem:[#allocation3] sm:$0xff] }
 0x430   : > { %v1573_v13 = vadd.f32 %v3830_v6, %v3499_v35  ;;  %v1564_v14 = vpop.f32.mrb[3].mxu1  ;;  %v5563_v15 = vsel %vm5548_vm7, -32767.0, %v1570_v63  ;;  %3835 = vmatprep.subr.bf16.mxu0 %v5646_v33  ;;  %v5657_v35 = vld [vmem:[#allocation3 + $0x18] sm:$0xff] }
 0x431   : > { %v1565_v19 = vadd.f32 %v3495_v60, %v1564_v14  ;;  %1636 = vmax.xlane.f32.xlu1 %v5563_v15  ;;  %1626 = vst [vmem:[%s5406_s29 + $0x10] sm:$0xff] %v5563_v15  ;;  %v5576_v20 = vsel %vm5552_vm9, -32767.0, %v1562_v4  ;;  %3836 = vmatpush3.bf16.msra.mxu0 %v5646_v33 }
 0x432   : > { %1632 = vmax.xlane.f32.xlu0 %v5576_v20  ;;  %1624 = vst [vmem:[%s5406_s29] sm:$0xff] %v5576_v20  ;;  %v5584_v25 = vsel %vm5556_vm11, -32767.0, %v1573_v13  ;;  %3837 = vmatprep.subr.bf16.mxu0 %v5648_v54 }
 0x433   : > { %1627 = vst [vmem:[%s5406_s29 + $0x18] sm:$0xff] %v5584_v25  ;;  %v5590_v29 = vsel %vm5566_vm12, -32767.0, %v1565_v19 }
 0x434   : > { %1625 = vst [vmem:[%s5406_s29 + $0x8] sm:$0xff] %v5590_v29 }
 0x435   : > { %1638 = vmax.xlane.f32.xlu1 %v5584_v25  ;;  %v3833_v37 = vpop.f32.mrb[4].mxu1  ;;  %3838 = vmatpush3.bf16.msra.mxu0 %v5648_v54 }
 0x436   : > { %v1586_v40 = vadd.f32 %v3833_v37, %v3506_v26  ;;  %v1577_v41 = vpop.f32.mrb[5].mxu1  ;;  %1634 = vmax.xlane.f32.xlu0 %v5590_v29  ;;  %3839 = vmatprep.subr.bf16.mxu0 %v5653_v55 }
 0x437   : > { %v1578_v43 = vadd.f32 %v3502_v28, %v1577_v41  ;;  %v3834_v44 = vpop.f32.mrb[6].mxu1 }
 0x438   : > { %v1589_v46 = vadd.f32 %v3834_v44, %v3507_v31  ;;  %v5610_v47 = vsel %vm5595_vm13, -32767.0, %v1586_v40  ;;  %v1580_v48 = vpop.f32.mrb[7].mxu1 }
 0x439   : > { %1630 = vst [vmem:[%s5406_s29 + $0x30] sm:$0xff] %v5610_v47  ;;  %v1581_v50 = vadd.f32 %v3503_v39, %v1580_v48  ;;  %v5620_v51 = vsel %vm5600_vm14, -32767.0, %v1578_v43  ;;  %3840 = vmatpush3.bf16.msra.mxu0 %v5653_v55 }
 0x43a   : > { %1644 = vmax.xlane.f32.xlu0 %v5610_v47  ;;  %v5625_v52 = vsel %vm5604_vm15, -32767.0, %v1589_v46  ;;  %1628 = vst [vmem:[%s5406_s29 + $0x20] sm:$0xff] %v5620_v51  ;;  %3841 = vmatprep.subr.bf16.mxu0 %v5657_v35 }
 0x43b   : > { %1646 = vmax.xlane.f32.xlu1 %v5625_v52  ;;  %1631 = vst [vmem:[%s5406_s29 + $0x38] sm:$0xff] %v5625_v52  ;;  %v5634_v53 = vsel %vm5612_vm1, -32767.0, %v1581_v50 }
 0x43c   : > { %1629 = vst [vmem:[%s5406_s29 + $0x28] sm:$0xff] %v5634_v53 }
 0x43d   : > { %3842 = vmatpush3.bf16.msra.mxu0 %v5657_v35 }
 0x43e   : > { %1640 = vmax.xlane.f32.xlu0 %v5620_v51  ;;  %3843 = vmatprep.subr.bf16.mxu0 %v5661_v58 }
 0x43f   : > { %1642 = vmax.xlane.f32.xlu1 %v5634_v53 }
 0x441   : > { %3844 = vmatpush3.bf16.msra.mxu0 %v5661_v58 }
 0x442   : > { %3845 = vmatprep.subr.bf16.mxu0 %v5665_v59 }
 0x445   : > { %3846 = vmatpush3.bf16.msra.mxu0 %v5665_v59 }
 0x446   : > { %3847 = vmatprep.subr.bf16.mxu0 %v5686_v22 }
 0x449   : > { %3848 = vmatpush3.bf16.msra.mxu0 %v5686_v22 }
 0x450   : > { %1820 = vrot.lane.b32.xlu1 %v5470_v57, %s4828_s8 }
 0x454   : > { %1822 = vrot.lane.b32.xlu1 %v5480_v62, %s4828_s8 }
 0x458   : > { %1824 = vrot.lane.b32.xlu1 %v5486_v1, %s4828_s8 }
 0x4be   : > { %v1637_v60 = vpop.xlane.xlu1 %1636 }
 0x4bf   : > { %v1650_v63 = vsub.f32 %v5563_v15, %v1637_v60  ;;  %v1633_v0 = vpop.xlane.xlu0 %1632 }
 0x4c0   : > { %v1648_v3 = vsub.f32 %v5576_v20, %v1633_v0 }
 0x4c1   : > { %v1660_v4 = vmul.f32 1.442695, %v1650_v63 }
 0x4c2   : > { %v1656_v6 = vmul.f32 1.442695, %v1648_v3  ;;  %v1639_v9 = vpop.xlane.xlu1 %1638 }
 0x4c3   : > { %4297 = vpow2.f32 %v1660_v4  ;;  %v1651_v11 = vsub.f32 %v5584_v25, %v1639_v9  ;;  %v1635_v13 = vpop.xlane.xlu0 %1634  ;;  %v5690_v25 = vld [vmem:[#allocation3 + $0x38] sm:$0xff] }
 0x4c4   : > { %v1649_v14 = vsub.f32 %v5590_v29, %v1635_v13  ;;  %4299 = vpow2.f32 %v1656_v6  ;;  %3849 = vmatprep.subr.bf16.mxu0 %v5690_v25 }
 0x4c5   : > { %v1662_v16 = vmul.f32 1.442695, %v1651_v11  ;;  %3850 = vmatpush3.bf16.msra.mxu0 %v5690_v25 }
 0x4c6   : > { %v1658_v15 = vmul.f32 1.442695, %v1649_v14 }
 0x4c7   : > { %4301 = vpow2.f32 %v1662_v16  ;;  %v1645_v26 = vpop.xlane.xlu0 %1644 }
 0x4c8   : > { %4303 = vpow2.f32 %v1658_v15  ;;  %v1647_v27 = vpop.xlane.xlu1 %1646  ;;  %v1654_v28 = vsub.f32 %v5610_v47, %v1645_v26 }
 0x4c9   : > { %v1655_v37 = vsub.f32 %v5625_v52, %v1647_v27 }
 0x4ca   : > { %v1668_v30 = vmul.f32 1.442695, %v1654_v28 }
 0x4cb   : > { %v1641_v29 = vpop.xlane.xlu0 %1640  ;;  %v1670_v41 = vmul.f32 1.442695, %v1655_v37 }
 0x4cc   : > { %v1652_v31 = vsub.f32 %v5620_v51, %v1641_v29  ;;  %v1643_v32 = vpop.xlane.xlu1 %1642  ;;  %4305 = vpow2.f32 %v1668_v30 }
 0x4cd   : > { %v5674_v18 = vpop.eup %4297  ;;  %v1653_v40 = vsub.f32 %v5634_v53, %v1643_v32 }
 0x4ce   : > { %1676 = vadd.xlane.f32.xlu0 %v5674_v18  ;;  %v5677_v19 = vpop.eup %4299  ;;  %v1664_v39 = vmul.f32 1.442695, %v1652_v31 }
 0x4cf   : > { %v1666_v43 = vmul.f32 1.442695, %v1653_v40 }
 0x4d0   : > { %4307 = vpow2.f32 %v1664_v39  ;;  %v1821_v50 = vpop.permute.xlu1 %1820 }
 0x4d1   : > { %v5679_v20 = vpop.eup %4301  ;;  %4309 = vpow2.f32 %v1670_v41  ;;  %v1850_v29 = vsel %vm1490_vm0, %v1821_v50, 0 }
 0x4d2   : > { %1678 = vadd.xlane.f32.xlu1 %v5679_v20  ;;  %1672 = vadd.xlane.f32.xlu0 %v5677_v19  ;;  %v5683_v21 = vpop.eup %4303  ;;  %4311 = vpow2.f32 %v1666_v43 }
 0x4d4   : > { %v1823_v51 = vpop.permute.xlu1 %1822 }
 0x4d6   : > { %1674 = vadd.xlane.f32.xlu1 %v5683_v21  ;;  %v5704_v44 = vpop.eup %4305 }
 0x4d8   : > { %v1825_v52 = vpop.permute.xlu1 %1824 }
 0x4da   : > { %v5707_v46 = vpop.eup %4307 }
 0x4db   : > { %v5710_v47 = vpop.eup %4309 }
 0x4dc   : > { %v5712_v48 = vpop.eup %4311 }
 0x4e7   : > { %1828 = vrot.lane.b32.xlu1 %v5501_v8, %s4828_s8 }
 0x4e8   : > { %1818 = vrot.lane.b32.xlu0 %v5468_v56, %s4828_s8 }
 0x4eb   : > { %1830 = vrot.lane.b32.xlu1 %v5507_v10, %s4828_s8 }
 0x507   : > { %1684 = vadd.xlane.f32.xlu0 %v5704_v44 }
 0x50b   : > { %1680 = vadd.xlane.f32.xlu0 %v5707_v46 }
 0x50f   : > { %1682 = vadd.xlane.f32.xlu1 %v5712_v48  ;;  %1686 = vadd.xlane.f32.xlu0 %v5710_v47 }
 0x520   : > { %1832 = vrot.lane.b32.xlu1 %v5513_v12, %s4828_s8 }
 0x524   : > { %1804 = vrot.lane.b32.xlu1 %v5522_v23, %s4828_s8 }
 0x525   : > { %1826 = vrot.lane.b32.xlu0 %v5494_v5, %s4828_s8 }
 0x528   : > { %1808 = vrot.lane.b32.xlu1 %v5530_v34, %s4828_s8 }
 0x529   : > { %1802 = vrot.lane.b32.xlu0 %v5524_v24, %s4828_s8 }
 0x52c   : > { %2038 = vrot.lane.b32.xlu1 %v5648_v54, %s4828_s8 }
 0x52d   : > { %1806 = vrot.lane.b32.xlu0 %v5532_v36, %s4828_s8 }
 0x530   : > { %2042 = vrot.lane.b32.xlu1 %v5657_v35, %s4828_s8 }
 0x531   : > { %2036 = vrot.lane.b32.xlu0 %v5646_v33, %s4828_s8 }
 0x534   : > { %2046 = vrot.lane.b32.xlu1 %v5665_v59, %s4828_s8 }
 0x535   : > { %2040 = vrot.lane.b32.xlu0 %v5653_v55, %s4828_s8 }
 0x539   : > { %2044 = vrot.lane.b32.xlu0 %v5661_v58, %s4828_s8 }
 0x53d   : > { %2048 = vrot.lane.b32.xlu0 %v5686_v22, %s4828_s8 }
 0x55b   : > { %v1677_v53 = vpop.xlane.xlu0 %1676 }
 0x55f   : > { %v1679_v60 = vpop.xlane.xlu1 %1678  ;;  %v1673_v63 = vpop.xlane.xlu0 %1672 }
 0x560   : > { %4313 = vrcp.f32 %v1679_v60 }
 0x561   : > { %4315 = vrcp.f32 %v1673_v63 }
 0x562   : > { %4317 = vrcp.f32 %v1677_v53 }
 0x563   : > { %v1675_v0 = vpop.xlane.xlu1 %1674  ;;  %v1819_v3 = vpop.permute.xlu0 %1818 }
 0x564   : > { %4319 = vrcp.f32 %v1675_v0  ;;  %4035 = vmatprep.subr.msk.bf16.mxu0 %vm1490_vm0, %v1819_v3  ;;  %v1847_v28 = vsel %vm1490_vm0, %v1819_v3, 0 }
 0x56a   : > { %v4314_v4 = vpop.eup %4313 }
 0x56b   : > { %v4316_v6 = vpop.eup %4315  ;;  %v1699_v13 = vmul.f32 %v4314_v4, %v5679_v20  ;;  %v1829_v20 = vpop.permute.xlu1 %1828 }
 0x56c   : > { %v4318_v9 = vpop.eup %4317  ;;  %v1696_v14 = vmul.f32 %v4316_v6, %v5677_v19  ;;  %v1853_v19 = vsel %vm1490_vm0, %v1823_v51, 0  ;;  %v1862_v60 = vsel %vm1490_vm0, %v1829_v20, 0 }
 0x56d   : > { %v1698_v15 = vmul.f32 %v4318_v9, %v5674_v18  ;;  %v1856_v18 = vsel %vm1490_vm0, %v1825_v52, 0 }
 0x56e   : > { %v4320_v11 = vpop.eup %4319 }
 0x56f   : > { %v1697_v16 = vmul.f32 %v4320_v11, %v5683_v21  ;;  %v1705_v27 = vpack.c.bf16 %v1699_v13, %v1698_v15  ;;  %v1831_v30 = vpop.permute.xlu1 %1830 }
 0x571   : > { %v1704_v26 = vpack.c.bf16 %v1697_v16, %v1696_v14 }
 0x573   : > { %3851 = vmatprep.mubr.bf16.mxu0 %v1704_v26 }
 0x574   : > { %3852 = vmatmul.mubr.bf16.vlgmr.msra.gmra.mrb[8].mxu0 %v1705_v27 }
 0x575   : > { %3860 = vmatpush3.bf16.xpose.msra.mxu0 %v1847_v28 }
 0x576   : > { %4036 = vmatprep.subr.msk.bf16.mxu0 %vm1490_vm0, %v1821_v50 }
 0x57d   : > { %3862 = vmatpush3.bf16.xpose.msra.mxu0 %v1850_v29 }
 0x57e   : > { %4037 = vmatprep.subr.msk.bf16.mxu0 %vm1490_vm0, %v1823_v51 }
 0x585   : > { %3864 = vmatpush3.bf16.xpose.msra.mxu0 %v1853_v19 }
 0x586   : > { %4038 = vmatprep.subr.msk.bf16.mxu0 %vm1490_vm0, %v1825_v52 }
 0x58d   : > { %3866 = vmatpush3.bf16.xpose.msra.mxu0 %v1856_v18 }
 0x594   : > { %v1685_v21 = vpop.xlane.xlu0 %1684 }
 0x598   : > { %v1681_v31 = vpop.xlane.xlu0 %1680 }
 0x599   : > { %4321 = vrcp.f32 %v1681_v31 }
 0x59a   : > { %4323 = vrcp.f32 %v1685_v21 }
 0x59c   : > { %v1683_v32 = vpop.xlane.xlu1 %1682  ;;  %v1687_v37 = vpop.xlane.xlu0 %1686 }
 0x59d   : > { %4325 = vrcp.f32 %v1683_v32 }
 0x59e   : > { %4327 = vrcp.f32 %v1687_v37 }
 0x5a0   : > { %v1827_v39 = vpop.permute.xlu0 %1826  ;;  %v1833_v9 = vpop.permute.xlu1 %1832 }
 0x5a1   : > { %4039 = vmatprep.subr.msk.bf16.mxu0 %vm1490_vm0, %v1827_v39  ;;  %v1859_v40 = vsel %vm1490_vm0, %v1827_v39, 0 }
 0x5a2   : > { %3868 = vmatpush3.bf16.xpose.msra.mxu0 %v1859_v40 }
 0x5a3   : > { %4040 = vmatprep.subr.msk.bf16.mxu0 %vm1490_vm0, %v1829_v20  ;;  %v4322_v41 = vpop.eup %4321 }
 0x5a4   : > { %v4324_v43 = vpop.eup %4323  ;;  %v1700_v52 = vmul.f32 %v4322_v41, %v5707_v46  ;;  %v1803_v6 = vpop.permute.xlu0 %1802  ;;  %v1865_v46 = vsel %vm1490_vm0, %v1831_v30, 0 }
 0x5a5   : > { %v1702_v63 = vmul.f32 %v4324_v43, %v5704_v44  ;;  %v1868_v44 = vsel %vm1490_vm0, %v1833_v9, 0  ;;  %v3560_v43 = vld [vmem:[%s5394_s28 + $0x28] sm:$0xff]  }
 0x5a7   : > { %v4326_v50 = vpop.eup %4325 }
 0x5a8   : > { %v4328_v51 = vpop.eup %4327  ;;  %v1701_v53 = vmul.f32 %v4326_v50, %v5712_v48  ;;  %v1807_v48 = vpop.permute.xlu0 %1806  ;;  %v3559_v50 = vld [vmem:[%s5394_s28 + $0x20] sm:$0xff]  }
 0x5a9   : > { %v1703_v0 = vmul.f32 %v4328_v51, %v5710_v47  ;;  %v1805_v47 = vpop.permute.xlu1 %1804  ;;  %v3514_v51 = vunpack.c.l.bf16 %v3560_v43 }
 0x5aa   : > { %3870 = vmatpush3.bf16.xpose.msra.mxu0 %v1862_v60  ;;  %v1706_v3 = vpack.c.bf16 %v1701_v53, %v1700_v52  ;;  %v3510_v52 = vunpack.c.l.bf16 %v3559_v50  ;;  %v3515_v53 = vunpack.c.h.bf16 %v3560_v43 }
 0x5ab   : > { %4041 = vmatprep.subr.msk.bf16.mxu0 %vm1490_vm0, %v1831_v30  ;;  %v1707_v4 = vpack.c.bf16 %v1703_v0, %v1702_v63  ;;  %v3511_v63 = vunpack.c.h.bf16 %v3559_v50 }
 0x5ac   : > { %3855 = vmatprep.mubr.bf16.mxu0 %v1706_v3  ;;  %v2037_v28 = vpop.permute.xlu0 %2036 }
 0x5ad   : > { %3856 = vmatmul.mubr.bf16.gmra.mrb[12].mxu0 %v1707_v4  ;;  %v1809_v11 = vpop.permute.xlu1 %1808  ;;  %3883 = vmatprep.subr.bf16.mxu1 %v2037_v28 }
 0x5ae   : > { %3875 = vmatprep.mubr.msk.bf16.mxu0 %vm1490_vm0, %v1803_v6  ;;  %3884 = vmatpush3.bf16.msra.mxu1 %v2037_v28 }
 0x5b0   : > { %v2041_v19 = vpop.permute.xlu0 %2040 }
 0x5b1   : > { %v2039_v29 = vpop.permute.xlu1 %2038 }
 0x5b2   : > { %3872 = vmatpush3.bf16.xpose.msra.mxu0 %v1865_v46  ;;  %3885 = vmatprep.subr.bf16.mxu1 %v2039_v29  ;;  %v3562_v46 = vld [vmem:[%s5394_s28 + $0x38] sm:$0xff]  }
 0x5b3   : > { %4042 = vmatprep.subr.msk.bf16.mxu0 %vm1490_vm0, %v1833_v9  ;;  %3886 = vmatpush3.bf16.msra.mxu1 %v2039_v29 }
 0x5b4   : > { %3887 = vmatprep.subr.bf16.mxu1 %v2041_v19  ;;  %v2045_v20 = vpop.permute.xlu0 %2044 }
 0x5b5   : > { %v2043_v18 = vpop.permute.xlu1 %2042 }
 0x5b7   : > { %3888 = vmatpush3.bf16.msra.mxu1 %v2041_v19 }
 0x5b8   : > { %3889 = vmatprep.subr.bf16.mxu1 %v2043_v18  ;;  %v2049_v30 = vpop.permute.xlu0 %2048 }
 0x5b9   : > { %v2047_v21 = vpop.permute.xlu1 %2046 }
 0x5ba   : > { %3874 = vmatpush3.bf16.xpose.msra.mxu0 %v1868_v44 }
 0x5bb   : > { %3890 = vmatpush3.bf16.msra.mxu1 %v2043_v18 }
 0x5bc   : > { %3891 = vmatprep.subr.bf16.mxu1 %v2045_v20 }
 0x5bf   : > { %3892 = vmatpush3.bf16.msra.mxu1 %v2045_v20 }
 0x5c0   : > { %3893 = vmatprep.subr.bf16.mxu1 %v2047_v21 }
 0x5c1   : > { %3876 = vmatmul.mubr.msk.bf16.vlgmr.msra.gmra.mrb[16].mxu0 %vm1490_vm0, %v1805_v47 }
 0x5c2   : > { %3879 = vmatprep.mubr.msk.bf16.mxu0 %vm1490_vm0, %v1807_v48  ;;  %v3561_v48 = vld [vmem:[%s5394_s28 + $0x30] sm:$0xff]  }
 0x5c3   : > { %3894 = vmatpush3.bf16.msra.mxu1 %v2047_v21  ;;  %v3519_v29 = vunpack.c.h.bf16 %v3561_v48 }
 0x5c4   : > { %3895 = vmatprep.subr.bf16.mxu1 %v2049_v30 }
 0x5c7   : > { %3896 = vmatpush3.bf16.msra.mxu1 %v2049_v30 }
 0x5c9   : > { %3880 = vmatmul.mubr.msk.bf16.gmra.mrb[20].mxu0 %vm1490_vm0, %v1809_v11 }
 0x647   : > { %v3853_v13 = vpop.f32.mrb[8].mxu0 }
 0x648   : > { %v1742_v14 = vpop.f32.mrb[9].mxu0 }
 0x649   : > { %v3854_v16 = vpop.f32.mrb[10].mxu0 }
 0x64a   : > { %v1774_v15 = vpack.c.bf16 %v3854_v16, %v3853_v13  ;;  %v1745_v26 = vpop.f32.mrb[11].mxu0 }
 0x64b   : > { %v1773_v27 = vpack.c.bf16 %v1745_v26, %v1742_v14  ;;  %v3522_v14 = vunpack.c.l.bf16 %v3562_v46  ;;  %v3518_v26 = vunpack.c.l.bf16 %v3561_v48 }
 0x64c   : > { %1778 = vst.msk [vmem:[#allocation4 + $0x8] sm:$0xff] %vm1490_vm0, %v1774_v15 }
 0x64d   : > { %1777 = vst.msk [vmem:[#allocation4] sm:$0xff] %vm1490_vm0, %v1773_v27  ;;  %v3523_v27 = vunpack.c.h.bf16 %v3562_v46 }
 0x680   : > { %v3857_v31 = vpop.f32.mrb[12].mxu0 }
 0x681   : > { %v1758_v32 = vpop.f32.mrb[13].mxu0 }
 0x682   : > { %v3858_v37 = vpop.f32.mrb[14].mxu0 }
 0x683   : > { %v1776_v39 = vpack.c.bf16 %v3858_v37, %v3857_v31  ;;  %v1761_v40 = vpop.f32.mrb[15].mxu0 }
 0x684   : > { %v1775_v41 = vpack.c.bf16 %v1761_v40, %v1758_v32 }
 0x685   : > { %1780 = vst.msk [vmem:[#allocation4 + $0x18] sm:$0xff] %vm1490_vm0, %v1776_v39 }
 0x686   : > { %1779 = vst.msk [vmem:[#allocation4 + $0x10] sm:$0xff] %vm1490_vm0, %v1775_v41 }
 0x694   : > { %v3877_v60 = vpop.f32.mrb[16].mxu0 }
 0x695   : > { %v1913_v0 = vadd.f32 %v3877_v60, %v3514_v51  ;;  %v1904_v3 = vpop.f32.mrb[17].mxu0 }
 0x696   : > { %v1905_v4 = vadd.f32 %v3510_v52, %v1904_v3  ;;  %v3878_v6 = vpop.f32.mrb[18].mxu0 }
 0x697   : > { %v1916_v9 = vadd.f32 %v3878_v6, %v3515_v53  ;;  %v1907_v44 = vpop.f32.mrb[19].mxu0  ;;  %v1937_v47 = vsel %vm5548_vm7, -32767.0, %v1913_v0 }
 0x698   : > { %v1908_v11 = vadd.f32 %v3511_v63, %v1907_v44  ;;  %1956 = vmax.xlane.f32.xlu0 %v1937_v47  ;;  %3425 = vst [vmem:[%s5406_s29 + $0x50] sm:$0xff] %v1937_v47  ;;  %v1935_v13 = vsel %vm5552_vm9, -32767.0, %v1905_v4 }
 0x699   : > { %3423 = vst [vmem:[%s5406_s29 + $0x40] sm:$0xff] %v1935_v13  ;;  %v1938_v16 = vsel %vm5556_vm11, -32767.0, %v1916_v9 }
 0x69a   : > { %v1936_v15 = vsel %vm5566_vm12, -32767.0, %v1908_v11  ;;  %3426 = vst [vmem:[%s5406_s29 + $0x58] sm:$0xff] %v1938_v16 }
 0x69b   : > { %1954 = vmax.xlane.f32.xlu1 %v1936_v15  ;;  %3424 = vst [vmem:[%s5406_s29 + $0x48] sm:$0xff] %v1936_v15 }
 0x69c   : > { %1952 = vmax.xlane.f32.xlu0 %v1935_v13  ;;  %v3881_v28 = vpop.f32.mrb[20].mxu0 }
 0x69d   : > { %v1929_v19 = vadd.f32 %v3881_v28, %v3522_v14  ;;  %v1920_v18 = vpop.f32.mrb[21].mxu0 }
 0x69e   : > { %v1921_v20 = vadd.f32 %v3518_v26, %v1920_v18  ;;  %v3882_v21 = vpop.f32.mrb[22].mxu0 }
 0x69f   : > { %v1932_v30 = vadd.f32 %v3882_v21, %v3523_v27  ;;  %v1923_v31 = vpop.f32.mrb[23].mxu0  ;;  %v1941_v32 = vsel %vm5595_vm13, -32767.0, %v1929_v19 }
 0x6a0   : > { %v1924_v37 = vadd.f32 %v3519_v29, %v1923_v31  ;;  %1958 = vmax.xlane.f32.xlu0 %v1938_v16  ;;  %3429 = vst [vmem:[%s5406_s29 + $0x70] sm:$0xff] %v1941_v32  ;;  %v1939_v39 = vsel %vm5600_vm14, -32767.0, %v1921_v20 }
 0x6a1   : > { %v1942_v40 = vsel %vm5604_vm15, -32767.0, %v1932_v30  ;;  %3427 = vst [vmem:[%s5406_s29 + $0x60] sm:$0xff] %v1939_v39 }
 0x6a2   : > { %3430 = vst [vmem:[%s5406_s29 + $0x78] sm:$0xff] %v1942_v40  ;;  %v1940_v41 = vsel %vm5612_vm1, -32767.0, %v1924_v37 }
 0x6a3   : > { %3428 = vst [vmem:[%s5406_s29 + $0x68] sm:$0xff] %v1940_v41 }
 0x6ac   : > { %2050 = vrot.lane.b32.xlu1 %v5690_v25, %s4828_s8 }
 0x6b6   : > { %2175 = vrot.lane.b32.xlu0 %v5468_v56, %s4829_s6 }
 0x6d0   : > { %1966 = vmax.xlane.f32.xlu1 %v1942_v40 }
 0x6d4   : > { %1962 = vmax.xlane.f32.xlu1 %v1940_v41 }
 0x6d5   : > { %1964 = vmax.xlane.f32.xlu0 %v1941_v32 }
 0x6d9   : > { %1960 = vmax.xlane.f32.xlu0 %v1939_v39 }
 0x6e5   : > { %2177 = vrot.lane.b32.xlu1 %v5470_v57, %s4829_s6 }
 0x725   : > { %v1957_v43 = vpop.xlane.xlu0 %1956 }
 0x726   : > { %v1970_v50 = vsub.f32 %v1937_v47, %v1957_v43 }
 0x728   : > { %v1980_v51 = vmul.f32 1.442695, %v1970_v50  ;;  %v1955_v52 = vpop.xlane.xlu1 %1954 }
 0x729   : > { %v1969_v53 = vsub.f32 %v1936_v15, %v1955_v52  ;;  %v1953_v60 = vpop.xlane.xlu0 %1952 }
 0x72a   : > { %4329 = vpow2.f32 %v1980_v51  ;;  %v1968_v63 = vsub.f32 %v1935_v13, %v1953_v60 }
 0x72b   : > { %v1978_v0 = vmul.f32 1.442695, %v1969_v53 }
 0x72c   : > { %v1976_v3 = vmul.f32 1.442695, %v1968_v63  ;;  %v2051_v4 = vpop.permute.xlu1 %2050 }
 0x72d   : > { %4331 = vpow2.f32 %v1978_v0  ;;  %3897 = vmatprep.subr.bf16.mxu1 %v2051_v4  ;;  %v1959_v56 = vpop.xlane.xlu0 %1958 }
 0x72e   : > { %4333 = vpow2.f32 %v1976_v3  ;;  %v1971_v6 = vsub.f32 %v1938_v16, %v1959_v56  ;;  %3898 = vmatpush3.bf16.msra.mxu1 %v2051_v4 }
 0x730   : > { %v1982_v46 = vmul.f32 1.442695, %v1971_v6 }
 0x731   : > { %v5808_v9 = vpop.permute.xlu0 %2175 }
 0x732   : > { %4335 = vpow2.f32 %v1982_v46  ;;  %4043 = vmatprep.subr.msk.bf16.mxu1 %vm1490_vm0, %v5808_v9 }
 0x734   : > { %v5812_v57 = vpop.eup %4329 }
 0x735   : > { %1996 = vadd.xlane.f32.xlu1 %v5812_v57 }
 0x737   : > { %v4332_v44 = vpop.eup %4331 }
 0x738   : > { %v4334_v47 = vpop.eup %4333  ;;  %1994 = vadd.xlane.f32.xlu0 %v4332_v44 }
 0x739   : > { %1992 = vadd.xlane.f32.xlu1 %v4334_v47 }
 0x73c   : > { %v4336_v48 = vpop.eup %4335 }
 0x73d   : > { %1998 = vadd.xlane.f32.xlu1 %v4336_v48 }
 0x74e   : > { %2181 = vrot.lane.b32.xlu1 %v5486_v1, %s4829_s6  ;;  %2179 = vrot.lane.b32.xlu0 %v5480_v62, %s4829_s6 }
 0x752   : > { %2185 = vrot.lane.b32.xlu1 %v5501_v8, %s4829_s6 }
 0x756   : > { %2187 = vrot.lane.b32.xlu1 %v5507_v10, %s4829_s6 }
 0x75d   : > { %v1967_v11 = vpop.xlane.xlu1 %1966 }
 0x75e   : > { %v1975_v26 = vsub.f32 %v1942_v40, %v1967_v11  ;;  %v2204_v40 = vsel %vm1490_vm0, %v5808_v9, 0 }
 0x760   : > { %v1990_v19 = vmul.f32 1.442695, %v1975_v26 }
 0x761   : > { %v1963_v16 = vpop.xlane.xlu1 %1962 }
 0x762   : > { %v1965_v13 = vpop.xlane.xlu0 %1964  ;;  %v1973_v28 = vsub.f32 %v1940_v41, %v1963_v16 }
 0x763   : > { %v1974_v14 = vsub.f32 %v1941_v32, %v1965_v13 }
 0x764   : > { %v1986_v18 = vmul.f32 1.442695, %v1973_v28 }
 0x765   : > { %v1988_v15 = vmul.f32 1.442695, %v1974_v14 }
 0x766   : > { %v1961_v27 = vpop.xlane.xlu0 %1960 }
 0x767   : > { %4337 = vpow2.f32 %v1988_v15  ;;  %v1972_v29 = vsub.f32 %v1939_v39, %v1961_v27 }
 0x769   : > { %v1984_v1 = vmul.f32 1.442695, %v1972_v29 }
 0x76b   : > { %4339 = vpow2.f32 %v1984_v1 }
 0x76c   : > { %4341 = vpow2.f32 %v1990_v19 }
 0x76d   : > { %4343 = vpow2.f32 %v1986_v18 }
 0x771   : > { %v5823_v62 = vpop.eup %4337 }
 0x772   : > { %2004 = vadd.xlane.f32.xlu0 %v5823_v62 }
 0x775   : > { %v5826_v8 = vpop.eup %4339 }
 0x776   : > { %2000 = vadd.xlane.f32.xlu0 %v5826_v8  ;;  %v5829_v10 = vpop.eup %4341 }
 0x777   : > { %v5831_v20 = vpop.eup %4343 }
 0x77a   : > { %2002 = vadd.xlane.f32.xlu1 %v5831_v20  ;;  %2006 = vadd.xlane.f32.xlu0 %v5829_v10 }
 0x78b   : > { %2189 = vrot.lane.b32.xlu1 %v5513_v12, %s4829_s6 }
 0x78f   : > { %2169 = vrot.lane.b32.xlu1 %v5522_v23, %s4829_s6 }
 0x790   : > { %2183 = vrot.lane.b32.xlu0 %v5494_v5, %s4829_s6  ;;  %v2178_v5 = vpop.permute.xlu1 %2177 }
 0x791   : > { %v2207_v41 = vsel %vm1490_vm0, %v2178_v5, 0 }
 0x793   : > { %2173 = vrot.lane.b32.xlu1 %v5530_v34, %s4829_s6 }
 0x794   : > { %2167 = vrot.lane.b32.xlu0 %v5524_v24, %s4829_s6 }
 0x797   : > { %2387 = vrot.lane.b32.xlu1 %v5648_v54, %s4829_s6 }
 0x798   : > { %2171 = vrot.lane.b32.xlu0 %v5532_v36, %s4829_s6 }
 0x79b   : > { %2391 = vrot.lane.b32.xlu1 %v5657_v35, %s4829_s6 }
 0x79c   : > { %2385 = vrot.lane.b32.xlu0 %v5646_v33, %s4829_s6 }
 0x79f   : > { %2395 = vrot.lane.b32.xlu1 %v5665_v59, %s4829_s6 }
 0x7a0   : > { %2389 = vrot.lane.b32.xlu0 %v5653_v55, %s4829_s6 }
 0x7a4   : > { %2393 = vrot.lane.b32.xlu0 %v5661_v58, %s4829_s6 }
 0x7a8   : > { %2397 = vrot.lane.b32.xlu0 %v5686_v22, %s4829_s6 }
 0x7c2   : > { %v1997_v12 = vpop.xlane.xlu1 %1996 }
 0x7c5   : > { %v1995_v54 = vpop.xlane.xlu0 %1994 }
 0x7c6   : > { %4345 = vrcp.f32 %v1995_v54  ;;  %v1993_v35 = vpop.xlane.xlu1 %1992 }
 0x7c7   : > { %4347 = vrcp.f32 %v1993_v35 }
 0x7c8   : > { %4349 = vrcp.f32 %v1997_v12 }
 0x7c9   : > { %v2180_v43 = vpop.permute.xlu0 %2179 }
 0x7ca   : > { %v1999_v33 = vpop.xlane.xlu1 %1998  ;;  %v2210_v50 = vsel %vm1490_vm0, %v2180_v43, 0 }
 0x7cb   : > { %4351 = vrcp.f32 %v1999_v33 }
 0x7ce   : > { %v2182_v51 = vpop.permute.xlu1 %2181 }
 0x7cf   : > { %v2213_v52 = vsel %vm1490_vm0, %v2182_v51, 0 }
 0x7d0   : > { %v4346_v21 = vpop.eup %4345 }
 0x7d1   : > { %v4348_v59 = vpop.eup %4347  ;;  %v2017_v30 = vmul.f32 %v4346_v21, %v4332_v44 }
 0x7d2   : > { %v2016_v31 = vmul.f32 %v4348_v59, %v4334_v47  ;;  %v4350_v55 = vpop.eup %4349  ;;  %v2186_v53 = vpop.permute.xlu1 %2185 }
 0x7d3   : > { %v2018_v58 = vmul.f32 %v4350_v55, %v5812_v57  ;;  %v2219_v11 = vsel %vm1490_vm0, %v2186_v53, 0 }
 0x7d4   : > { %v2024_v32 = vpack.c.bf16 %v2017_v30, %v2016_v31 }
 0x7d5   : > { %v4352_v37 = vpop.eup %4351 }
 0x7d6   : > { %v2019_v39 = vmul.f32 %v4352_v37, %v4336_v48  ;;  %3899 = vmatprep.mubr.bf16.mxu1 %v2024_v32  ;;  %v2188_v63 = vpop.permute.xlu1 %2187 }
 0x7d7   : > { %v2222_v27 = vsel %vm1490_vm0, %v2188_v63, 0 }
 0x7d8   : > { %v2025_v22 = vpack.c.bf16 %v2019_v39, %v2018_v58 }
 0x7da   : > { %3900 = vmatmul.mubr.bf16.vlgmr.msra.gmra.mrb[8].mxu1 %v2025_v22 }
 0x7db   : > { %3908 = vmatpush3.bf16.xpose.msra.mxu1 %v2204_v40  ;;  %v3564_v40 = vld [vmem:[%s5394_s28 + $0x48] sm:$0xff]  }
 0x7dc   : > { %4044 = vmatprep.subr.msk.bf16.mxu1 %vm1490_vm0, %v2178_v5 }
 0x7e3   : > { %3910 = vmatpush3.bf16.xpose.msra.mxu1 %v2207_v41  ;;  %v3563_v41 = vld [vmem:[%s5394_s28 + $0x40] sm:$0xff]  }
 0x7e4   : > { %4045 = vmatprep.subr.msk.bf16.mxu1 %vm1490_vm0, %v2180_v43  ;;  %v3530_v43 = vunpack.c.l.bf16 %v3564_v40 }
 0x7eb   : > { %3912 = vmatpush3.bf16.xpose.msra.mxu1 %v2210_v50  ;;  %v3526_v50 = vunpack.c.l.bf16 %v3563_v41 }
 0x7ec   : > { %4046 = vmatprep.subr.msk.bf16.mxu1 %vm1490_vm0, %v2182_v51  ;;  %v3531_v51 = vunpack.c.h.bf16 %v3564_v40 }
 0x7f3   : > { %3914 = vmatpush3.bf16.xpose.msra.mxu1 %v2213_v52 }
 0x7ff   : > { %v2005_v60 = vpop.xlane.xlu0 %2004 }
 0x803   : > { %v2001_v0 = vpop.xlane.xlu0 %2000 }
 0x804   : > { %4353 = vrcp.f32 %v2001_v0 }
 0x805   : > { %4355 = vrcp.f32 %v2005_v60 }
 0x807   : > { %v2003_v3 = vpop.xlane.xlu1 %2002  ;;  %v2007_v4 = vpop.xlane.xlu0 %2006 }
 0x808   : > { %4357 = vrcp.f32 %v2003_v3 }
 0x809   : > { %4359 = vrcp.f32 %v2007_v4  ;;  %v3566_v4 = vld [vmem:[%s5394_s28 + $0x58] sm:$0xff]  }
 0x80b   : > { %v2184_v56 = vpop.permute.xlu0 %2183  ;;  %v2190_v28 = vpop.permute.xlu1 %2189 }
 0x80c   : > { %v2216_v6 = vsel %vm1490_vm0, %v2184_v56, 0  ;;  %4047 = vmatprep.subr.msk.bf16.mxu1 %vm1490_vm0, %v2184_v56  ;;  %v2225_v29 = vsel %vm1490_vm0, %v2190_v28, 0 }
 0x80d   : > { %3916 = vmatpush3.bf16.xpose.msra.mxu1 %v2216_v6 }
 0x80e   : > { %4048 = vmatprep.subr.msk.bf16.mxu1 %vm1490_vm0, %v2186_v53  ;;  %v4354_v46 = vpop.eup %4353  ;;  %v3527_v53 = vunpack.c.h.bf16 %v3563_v41 }
 0x80f   : > { %v4356_v9 = vpop.eup %4355  ;;  %v2020_v47 = vmul.f32 %v4354_v46, %v5826_v8  ;;  %v2168_v26 = vpop.permute.xlu0 %2167 }
 0x810   : > { %v2022_v13 = vmul.f32 %v4356_v9, %v5823_v62  ;;  %v2170_v1 = vpop.permute.xlu1 %2169  ;;  %v3565_v9 = vld [vmem:[%s5394_s28 + $0x50] sm:$0xff]  }
 0x812   : > { %v4358_v57 = vpop.eup %4357 }
 0x813   : > { %v4360_v44 = vpop.eup %4359  ;;  %v2021_v48 = vmul.f32 %v4358_v57, %v5831_v20  ;;  %v2172_v19 = vpop.permute.xlu0 %2171 }
 0x814   : > { %v2023_v14 = vmul.f32 %v4360_v44, %v5829_v10  ;;  %v2174_v18 = vpop.permute.xlu1 %2173 }
 0x815   : > { %3918 = vmatpush3.bf16.xpose.msra.mxu1 %v2219_v11  ;;  %v2026_v16 = vpack.c.bf16 %v2021_v48, %v2020_v47  ;;  %v3538_v47 = vunpack.c.l.bf16 %v3566_v4 }
 0x816   : > { %4049 = vmatprep.subr.msk.bf16.mxu1 %vm1490_vm0, %v2188_v63  ;;  %v2027_v15 = vpack.c.bf16 %v2023_v14, %v2022_v13  ;;  %v3534_v13 = vunpack.c.l.bf16 %v3565_v9  ;;  %v3539_v14 = vunpack.c.h.bf16 %v3566_v4 }
 0x817   : > { %3903 = vmatprep.mubr.bf16.mxu1 %v2026_v16  ;;  %v2386_v54 = vpop.permute.xlu0 %2385 }
 0x818   : > { %3904 = vmatmul.mubr.bf16.gmra.mrb[12].mxu1 %v2027_v15  ;;  %3931 = vmatprep.subr.bf16.mxu0 %v2386_v54  ;;  %v2388_v35 = vpop.permute.xlu1 %2387  ;;  %v3535_v15 = vunpack.c.h.bf16 %v3565_v9 }
 0x819   : > { %3923 = vmatprep.mubr.msk.bf16.mxu1 %vm1490_vm0, %v2168_v26  ;;  %3932 = vmatpush3.bf16.msra.mxu0 %v2386_v54 }
 0x81a   : > { %3933 = vmatprep.subr.bf16.mxu0 %v2388_v35 }
 0x81b   : > { %v2390_v33 = vpop.permute.xlu0 %2389 }
 0x81c   : > { %v2392_v21 = vpop.permute.xlu1 %2391 }
 0x81d   : > { %3920 = vmatpush3.bf16.xpose.msra.mxu1 %v2222_v27  ;;  %3934 = vmatpush3.bf16.msra.mxu0 %v2388_v35 }
 0x81e   : > { %4050 = vmatprep.subr.msk.bf16.mxu1 %vm1490_vm0, %v2190_v28  ;;  %3935 = vmatprep.subr.bf16.mxu0 %v2390_v33 }
 0x81f   : > { %v2394_v59 = vpop.permute.xlu0 %2393 }
 0x820   : > { %v2396_v30 = vpop.permute.xlu1 %2395 }
 0x821   : > { %3936 = vmatpush3.bf16.msra.mxu0 %v2390_v33 }
 0x822   : > { %3937 = vmatprep.subr.bf16.mxu0 %v2392_v21 }
 0x823   : > { %v2398_v31 = vpop.permute.xlu0 %2397 }
 0x825   : > { %3922 = vmatpush3.bf16.xpose.msra.mxu1 %v2225_v29  ;;  %3938 = vmatpush3.bf16.msra.mxu0 %v2392_v21 }
 0x826   : > { %3939 = vmatprep.subr.bf16.mxu0 %v2394_v59 }
 0x829   : > { %3940 = vmatpush3.bf16.msra.mxu0 %v2394_v59  ;;  %v4425_v59 = vld [vmem:[#allocation2] sm:$0xff] }
 0x82a   : > { %3941 = vmatprep.subr.bf16.mxu0 %v2396_v30 }
 0x82c   : > { %3924 = vmatmul.mubr.msk.bf16.vlgmr.msra.gmra.mrb[16].mxu1 %vm1490_vm0, %v2170_v1 }
 0x82d   : > { %3927 = vmatprep.mubr.msk.bf16.mxu1 %vm1490_vm0, %v2172_v19  ;;  %3942 = vmatpush3.bf16.msra.mxu0 %v2396_v30  ;;  %v4426_v30 = vld [vmem:[#allocation2 + $0x8] sm:$0xff] }
 0x82e   : > { %3943 = vmatprep.subr.bf16.mxu0 %v2398_v31 }
 0x831   : > { %3944 = vmatpush3.bf16.msra.mxu0 %v2398_v31 }
 0x834   : > { %3928 = vmatmul.mubr.msk.bf16.gmra.mrb[20].mxu1 %vm1490_vm0, %v2174_v18 }
 0x8ad   : > { %v5886_v62 = vpop.f32.mrb[8].mxu1 }
 0x8ae   : > { %v5888_v8 = vpop.f32.mrb[9].mxu1 }
 0x8af   : > { %v5890_v10 = vpop.f32.mrb[10].mxu1 }
 0x8b0   : > { %v2126_v20 = vpack.c.bf16 %v5890_v10, %v5886_v62  ;;  %v5894_v5 = vpop.f32.mrb[11].mxu1 }
 0x8b1   : > { %v2125_v12 = vpack.c.bf16 %v5894_v5, %v5888_v8 }
 0x8eb   : > { %v5898_v55 = vpop.f32.mrb[12].mxu1 }
 0x8ec   : > { %v5900_v32 = vpop.f32.mrb[13].mxu1 }
 0x8ed   : > { %v5902_v37 = vpop.f32.mrb[14].mxu1 }
 0x8ee   : > { %v2128_v58 = vpack.c.bf16 %v5902_v37, %v5898_v55  ;;  %v5906_v39 = vpop.f32.mrb[15].mxu1 }
 0x8ef   : > { %v2127_v22 = vpack.c.bf16 %v5906_v39, %v5900_v32 }
 0x8ff   : > { %v3925_v52 = vpop.f32.mrb[16].mxu1 }
 0x900   : > { %v2270_v60 = vadd.f32 %v3925_v52, %v3530_v43  ;;  %v2261_v63 = vpop.f32.mrb[17].mxu1 }
 0x901   : > { %v2262_v0 = vadd.f32 %v3526_v50, %v2261_v63  ;;  %v3926_v3 = vpop.f32.mrb[18].mxu1 }
 0x902   : > { %v2273_v56 = vadd.f32 %v3926_v3, %v3531_v51  ;;  %v2264_v6 = vpop.f32.mrb[19].mxu1  ;;  %v2294_v46 = vsel %vm5548_vm7, -32767.0, %v2270_v60 }
 0x903   : > { %v2265_v57 = vadd.f32 %v3527_v53, %v2264_v6  ;;  %2313 = vmax.xlane.f32.xlu0 %v2294_v46  ;;  %3445 = vst [vmem:[%s5406_s29 + $0x90] sm:$0xff] %v2294_v46  ;;  %v2292_v44 = vsel %vm5552_vm9, -32767.0, %v2262_v0 }
 0x904   : > { %3443 = vst [vmem:[%s5406_s29 + $0x80] sm:$0xff] %v2292_v44  ;;  %v2295_v48 = vsel %vm5556_vm11, -32767.0, %v2273_v56 }
 0x905   : > { %v2293_v11 = vsel %vm5566_vm12, -32767.0, %v2265_v57  ;;  %3446 = vst [vmem:[%s5406_s29 + $0x98] sm:$0xff] %v2295_v48  ;;  %v4427_v57 = vld [vmem:[#allocation2 + $0x18] sm:$0xff] }
 0x906   : > { %2311 = vmax.xlane.f32.xlu1 %v2293_v11  ;;  %3444 = vst [vmem:[%s5406_s29 + $0x88] sm:$0xff] %v2293_v11 }
 0x907   : > { %2309 = vmax.xlane.f32.xlu0 %v2292_v44  ;;  %v3929_v16 = vpop.f32.mrb[20].mxu1 }
 0x908   : > { %v2286_v26 = vadd.f32 %v3929_v16, %v3538_v47  ;;  %v2277_v27 = vpop.f32.mrb[21].mxu1  ;;  %v4429_v47 = vld [vmem:[#allocation2 + $0x28] sm:$0xff] }
 0x909   : > { %v2278_v28 = vadd.f32 %v3534_v13, %v2277_v27  ;;  %v3930_v29 = vpop.f32.mrb[22].mxu1 }
 0x90a   : > { %v2289_v1 = vadd.f32 %v3930_v29, %v3539_v14  ;;  %v2280_v19 = vpop.f32.mrb[23].mxu1  ;;  %v2298_v18 = vsel %vm5595_vm13, -32767.0, %v2286_v26 }
 0x90b   : > { %v2281_v54 = vadd.f32 %v3535_v15, %v2280_v19  ;;  %2315 = vmax.xlane.f32.xlu0 %v2295_v48  ;;  %3449 = vst [vmem:[%s5406_s29 + $0xb0] sm:$0xff] %v2298_v18  ;;  %v5931_v35 = vsel %vm5600_vm14, -32767.0, %v2278_v28 }
 0x90c   : > { %v5935_v33 = vsel %vm5604_vm15, -32767.0, %v2289_v1  ;;  %3447 = vst [vmem:[%s5406_s29 + $0xa0] sm:$0xff] %v5931_v35 }
 0x90d   : > { %3450 = vst [vmem:[%s5406_s29 + $0xb8] sm:$0xff] %v5935_v33  ;;  %v2297_v21 = vsel %vm5612_vm1, -32767.0, %v2281_v54 }
 0x90e   : > { %3448 = vst [vmem:[%s5406_s29 + $0xa8] sm:$0xff] %v2297_v21 }
 0x917   : > { %2399 = vrot.lane.b32.xlu1 %v5690_v25, %s4829_s6 }
 0x921   : > { %2524 = vrot.lane.b32.xlu0 %v4425_v59, %s4830_s30 }
 0x93b   : > { %2323 = vmax.xlane.f32.xlu1 %v5935_v33 }
 0x93f   : > { %2319 = vmax.xlane.f32.xlu1 %v2297_v21 }
 0x940   : > { %2321 = vmax.xlane.f32.xlu0 %v2298_v18 }
 0x944   : > { %2317 = vmax.xlane.f32.xlu0 %v5931_v35 }
 0x950   : > { %2526 = vrot.lane.b32.xlu1 %v4426_v30, %s4830_s30  ;;  %v4432_v30 = vld [vmem:[#allocation2 + $0x20] sm:$0xff] }
 0x990   : > { %v2314_v31 = vpop.xlane.xlu0 %2313 }
 0x991   : > { %v2327_v40 = vsub.f32 %v2294_v46, %v2314_v31 }
 0x993   : > { %v2337_v41 = vmul.f32 1.442695, %v2327_v40  ;;  %v2312_v43 = vpop.xlane.xlu1 %2311 }
 0x994   : > { %v2326_v50 = vsub.f32 %v2293_v11, %v2312_v43  ;;  %v2310_v51 = vpop.xlane.xlu0 %2309 }
 0x995   : > { %4361 = vpow2.f32 %v2337_v41  ;;  %v2325_v25 = vsub.f32 %v2292_v44, %v2310_v51  ;;  %v4428_v44 = vld [vmem:[#allocation2 + $0x10] sm:$0xff] }
 0x996   : > { %v2335_v52 = vmul.f32 1.442695, %v2326_v50 }
 0x997   : > { %v2333_v53 = vmul.f32 1.442695, %v2325_v25  ;;  %v2400_v60 = vpop.permute.xlu1 %2399 }
 0x998   : > { %4363 = vpow2.f32 %v2335_v52  ;;  %3945 = vmatprep.subr.bf16.mxu0 %v2400_v60  ;;  %v2316_v63 = vpop.xlane.xlu0 %2315 }
 0x999   : > { %4365 = vpow2.f32 %v2333_v53  ;;  %v2328_v0 = vsub.f32 %v2295_v48, %v2316_v63  ;;  %3946 = vmatpush3.bf16.msra.mxu0 %v2400_v60  ;;  %v4430_v48 = vld [vmem:[#allocation2 + $0x30] sm:$0xff] }
 0x99b   : > { %v2339_v3 = vmul.f32 1.442695, %v2328_v0 }
 0x99c   : > { %v5950_v4 = vpop.permute.xlu0 %2524 }
 0x99d   : > { %4367 = vpow2.f32 %v2339_v3  ;;  %4051 = vmatprep.subr.msk.bf16.mxu0 %vm1490_vm0, %v5950_v4  ;;  %v2553_v0 = vsel %vm1490_vm0, %v5950_v4, 0 }
 0x99f   : > { %v5954_v56 = vpop.eup %4361 }
 0x9a0   : > { %2353 = vadd.xlane.f32.xlu1 %v5954_v56 }
 0x9a2   : > { %v4364_v6 = vpop.eup %4363 }
 0x9a3   : > { %v4366_v46 = vpop.eup %4365  ;;  %2351 = vadd.xlane.f32.xlu0 %v4364_v6 }
 0x9a4   : > { %2349 = vadd.xlane.f32.xlu1 %v4366_v46 }
 0x9a7   : > { %v4368_v9 = vpop.eup %4367 }
 0x9a8   : > { %2355 = vadd.xlane.f32.xlu1 %v4368_v9 }
 0x9b9   : > { %2530 = vrot.lane.b32.xlu1 %v4427_v57, %s4830_s30  ;;  %2528 = vrot.lane.b32.xlu0 %v4428_v44, %s4830_s30 }
 0x9bd   : > { %2534 = vrot.lane.b32.xlu1 %v4429_v47, %s4830_s30 }
 0x9c1   : > { %2536 = vrot.lane.b32.xlu1 %v4430_v48, %s4830_s30 }
 0x9c8   : > { %v2324_v11 = vpop.xlane.xlu1 %2323 }
 0x9c9   : > { %v2332_v26 = vsub.f32 %v5935_v33, %v2324_v11 }
 0x9cb   : > { %v2347_v19 = vmul.f32 1.442695, %v2332_v26 }
 0x9cc   : > { %v2320_v16 = vpop.xlane.xlu1 %2319 }
 0x9cd   : > { %v2322_v13 = vpop.xlane.xlu0 %2321  ;;  %v2330_v28 = vsub.f32 %v2297_v21, %v2320_v16 }
 0x9ce   : > { %v2331_v14 = vsub.f32 %v2298_v18, %v2322_v13 }
 0x9cf   : > { %v2343_v54 = vmul.f32 1.442695, %v2330_v28 }
 0x9d0   : > { %v2345_v15 = vmul.f32 1.442695, %v2331_v14  ;;  %v2527_v31 = vpop.permute.xlu1 %2526 }
 0x9d1   : > { %v2318_v27 = vpop.xlane.xlu0 %2317  ;;  %v2556_v3 = vsel %vm1490_vm0, %v2527_v31, 0 }
 0x9d2   : > { %4369 = vpow2.f32 %v2345_v15  ;;  %v2329_v29 = vsub.f32 %v5931_v35, %v2318_v27  ;;  %v4431_v35 = vld [vmem:[#allocation2 + $0x38] sm:$0xff] }
 0x9d4   : > { %v2341_v1 = vmul.f32 1.442695, %v2329_v29 }
 0x9d6   : > { %4371 = vpow2.f32 %v2341_v1 }
 0x9d7   : > { %4373 = vpow2.f32 %v2347_v19 }
 0x9d8   : > { %4375 = vpow2.f32 %v2343_v54 }
 0x9dc   : > { %v5963_v59 = vpop.eup %4369 }
 0x9dd   : > { %2361 = vadd.xlane.f32.xlu0 %v5963_v59 }
 0x9e0   : > { %v5966_v18 = vpop.eup %4371 }
 0x9e1   : > { %2357 = vadd.xlane.f32.xlu0 %v5966_v18  ;;  %v5969_v33 = vpop.eup %4373 }
 0x9e2   : > { %v5971_v21 = vpop.eup %4375 }
 0x9e5   : > { %2359 = vadd.xlane.f32.xlu1 %v5971_v21  ;;  %2363 = vadd.xlane.f32.xlu0 %v5969_v33 }
 0x9f6   : > { %2538 = vrot.lane.b32.xlu1 %v4431_v35, %s4830_s30 }
 0x9fa   : > { %2518 = vrot.lane.b32.xlu1 %v5522_v23, %s4830_s30 }
 0x9fb   : > { %2532 = vrot.lane.b32.xlu0 %v4432_v30, %s4830_s30 }
 0x9fe   : > { %2522 = vrot.lane.b32.xlu1 %v5530_v34, %s4830_s30 }
 0x9ff   : > { %2516 = vrot.lane.b32.xlu0 %v5524_v24, %s4830_s30 }
 0xa03   : > { %2520 = vrot.lane.b32.xlu0 %v5532_v36, %s4830_s30 }
 0xa2d   : > { %v2354_v40 = vpop.xlane.xlu1 %2353 }
 0xa30   : > { %v2352_v41 = vpop.xlane.xlu0 %2351 }
 0xa31   : > { %4377 = vrcp.f32 %v2352_v41  ;;  %v2350_v43 = vpop.xlane.xlu1 %2349 }
 0xa32   : > { %4379 = vrcp.f32 %v2350_v43 }
 0xa33   : > { %4381 = vrcp.f32 %v2354_v40 }
 0xa34   : > { %v2529_v57 = vpop.permute.xlu0 %2528 }
 0xa35   : > { %v2356_v23 = vpop.xlane.xlu1 %2355 }
 0xa36   : > { %4383 = vrcp.f32 %v2356_v23 }
 0xa3b   : > { %v4378_v50 = vpop.eup %4377 }
 0xa3c   : > { %v4380_v51 = vpop.eup %4379  ;;  %v2374_v25 = vmul.f32 %v4378_v50, %v4364_v6  ;;  %v2559_v6 = vsel %vm1490_vm0, %v2529_v57, 0 }
 0xa3d   : > { %v2373_v52 = vmul.f32 %v4380_v51, %v4366_v46  ;;  %v4382_v34 = vpop.eup %4381  ;;  %v2531_v46 = vpop.permute.xlu1 %2530 }
 0xa3e   : > { %v2375_v24 = vmul.f32 %v4382_v34, %v5954_v56  ;;  %v2562_v56 = vsel %vm1490_vm0, %v2531_v46, 0 }
 0xa3f   : > { %v2381_v53 = vpack.c.bf16 %v2374_v25, %v2373_v52 }
 0xa40   : > { %v4384_v60 = vpop.eup %4383 }
 0xa41   : > { %v2376_v63 = vmul.f32 %v4384_v60, %v4368_v9  ;;  %3947 = vmatprep.mubr.bf16.mxu0 %v2381_v53  ;;  %v2535_v4 = vpop.permute.xlu1 %2534 }
 0xa42   : > { %v2568_v1 = vsel %vm1490_vm0, %v2535_v4, 0 }
 0xa43   : > { %v2382_v36 = vpack.c.bf16 %v2376_v63, %v2375_v24 }
 0xa45   : > { %3948 = vmatmul.mubr.bf16.vlgmr.msra.gmra.mrb[24].mxu0 %v2382_v36  ;;  %v2537_v44 = vpop.permute.xlu1 %2536 }
 0xa46   : > { %3956 = vmatpush3.bf16.xpose.msra.mxu0 %v2553_v0  ;;  %v3568_v0 = vld [vmem:[%s5394_s28 + $0x68] sm:$0xff]  }
 0xa47   : > { %4052 = vmatprep.subr.msk.bf16.mxu0 %vm1490_vm0, %v2527_v31 }
 0xa4e   : > { %3958 = vmatpush3.bf16.xpose.msra.mxu0 %v2556_v3  ;;  %v3567_v3 = vld [vmem:[%s5394_s28 + $0x60] sm:$0xff]  }
 0xa4f   : > { %4053 = vmatprep.subr.msk.bf16.mxu0 %vm1490_vm0, %v2529_v57  ;;  %v3546_v57 = vunpack.c.l.bf16 %v3568_v0 }
 0xa56   : > { %3960 = vmatpush3.bf16.xpose.msra.mxu0 %v2559_v6  ;;  %v3542_v6 = vunpack.c.l.bf16 %v3567_v3 }
 0xa57   : > { %4054 = vmatprep.subr.msk.bf16.mxu0 %vm1490_vm0, %v2531_v46  ;;  %v3547_v46 = vunpack.c.h.bf16 %v3568_v0  ;;  %v4435_v0 = vld [vmem:[#allocation3] sm:$0xff] }
 0xa5e   : > { %3962 = vmatpush3.bf16.xpose.msra.mxu0 %v2562_v56 }
 0xa6a   : > { %v2362_v9 = vpop.xlane.xlu0 %2361 }
 0xa6e   : > { %v2358_v47 = vpop.xlane.xlu0 %2357 }
 0xa6f   : > { %4385 = vrcp.f32 %v2358_v47 }
 0xa70   : > { %4387 = vrcp.f32 %v2362_v9 }
 0xa72   : > { %v2360_v48 = vpop.xlane.xlu1 %2359  ;;  %v2364_v11 = vpop.xlane.xlu0 %2363 }
 0xa73   : > { %4389 = vrcp.f32 %v2360_v48 }
 0xa74   : > { %4391 = vrcp.f32 %v2364_v11  ;;  %v3570_v11 = vld [vmem:[%s5394_s28 + $0x78] sm:$0xff]  }
 0xa75   : > { %v3555_v61 = vunpack.c.h.bf16 %v3570_v11 }
 0xa76   : > { %v2533_v13 = vpop.permute.xlu0 %2532  ;;  %v2539_v40 = vpop.permute.xlu1 %2538 }
 0xa77   : > { %v2565_v14 = vsel %vm1490_vm0, %v2533_v13, 0  ;;  %4055 = vmatprep.subr.msk.bf16.mxu0 %vm1490_vm0, %v2533_v13 }
 0xa78   : > { %3964 = vmatpush3.bf16.xpose.msra.mxu0 %v2565_v14 }
 0xa79   : > { %4056 = vmatprep.subr.msk.bf16.mxu0 %vm1490_vm0, %v2535_v4  ;;  %v4386_v16 = vpop.eup %4385  ;;  %v3543_v4 = vunpack.c.h.bf16 %v3567_v3  ;;  %v4437_v3 = vld [vmem:[#allocation3 + $0x18] sm:$0xff] }
 0xa7a   : > { %v4388_v15 = vpop.eup %4387  ;;  %v2377_v28 = vmul.f32 %v4386_v16, %v5966_v18  ;;  %v2517_v31 = vpop.permute.xlu0 %2516  ;;  %v2571_v18 = vsel %vm1490_vm0, %v2537_v44, 0 }
 0xa7b   : > { %v2379_v19 = vmul.f32 %v4388_v15, %v5963_v59  ;;  %v2574_v59 = vsel %vm1490_vm0, %v2539_v40, 0  ;;  %v3569_v15 = vld [vmem:[%s5394_s28 + $0x70] sm:$0xff]   ;;  %s6371_s28 = sld [smem:[#allocation38_spill]] }
 0xa7c   : > { %v3551_v2 = vunpack.c.h.bf16 %v3569_v15 }
 0xa7d   : > { %v4390_v26 = vpop.eup %4389 }
 0xa7e   : > { %v4392_v27 = vpop.eup %4391  ;;  %v2378_v29 = vmul.f32 %v4390_v26, %v5971_v21  ;;  %v2521_v21 = vpop.permute.xlu0 %2520 }
 0xa7f   : > { %v2380_v54 = vmul.f32 %v4392_v27, %v5969_v33  ;;  %v2519_v33 = vpop.permute.xlu1 %2518 }
 0xa80   : > { %3966 = vmatpush3.bf16.xpose.msra.mxu0 %v2568_v1  ;;  %v2383_v35 = vpack.c.bf16 %v2378_v29, %v2377_v28  ;;  %v3554_v28 = vunpack.c.l.bf16 %v3570_v11 }
 0xa81   : > { %4057 = vmatprep.subr.msk.bf16.mxu0 %vm1490_vm0, %v2537_v44  ;;  %v2384_v30 = vpack.c.bf16 %v2380_v54, %v2379_v19  ;;  %v3550_v19 = vunpack.c.l.bf16 %v3569_v15  ;;  %s3482_s1 = sshll.u32 %s6371_s28, 3 }
 0xa82   : > { %3951 = vmatprep.mubr.bf16.mxu0 %v2383_v35  ;;  %s3014_s16 = sadd.s32 %s3483_s20, %s3482_s1 }
 0xa83   : > { %3952 = vmatmul.mubr.bf16.gmra.mrb[28].mxu0 %v2384_v30  ;;  %v2523_v41 = vpop.permute.xlu1 %2522  ;;  %s3484_s24 = sshll.u32 %s3014_s16, 7 }
 0xa84   : > { %3971 = vmatprep.mubr.msk.bf16.mxu0 %vm1490_vm0, %v2517_v31 }
 0xa88   : > { %3968 = vmatpush3.bf16.xpose.msra.mxu0 %v2571_v18 }
 0xa89   : > { %4058 = vmatprep.subr.msk.bf16.mxu0 %vm1490_vm0, %v2539_v40 }
 0xa90   : > { %3970 = vmatpush3.bf16.xpose.msra.mxu0 %v2574_v59 }
 0xa97   : > { %3972 = vmatmul.mubr.msk.bf16.vlgmr.msra.gmra.mrb[32].mxu0 %vm1490_vm0, %v2519_v33 }
 0xa98   : > { %3975 = vmatprep.mubr.msk.bf16.mxu0 %vm1490_vm0, %v2521_v21 }
 0xa9f   : > { %3976 = vmatmul.mubr.msk.bf16.gmra.mrb[36].mxu0 %vm1490_vm0, %v2523_v41  ;;  %vm2145_vm0 = vcmask 523520  }
 0xb18   : > { %v6010_v43 = vpop.f32.mrb[24].mxu0 }
 0xb19   : > { %v6012_v23 = vpop.f32.mrb[25].mxu0 }
 0xb1a   : > { %v6014_v50 = vpop.f32.mrb[26].mxu0 }
 0xb1b   : > { %v2475_v51 = vpack.c.bf16 %v6014_v50, %v6010_v43  ;;  %v6018_v25 = vpop.f32.mrb[27].mxu0 }
 0xb1c   : > { %v2474_v52 = vpack.c.bf16 %v6018_v25, %v6012_v23 }
 0xb56   : > { %v6022_v34 = vpop.f32.mrb[28].mxu0 }
 0xb57   : > { %v6024_v53 = vpop.f32.mrb[29].mxu0 }
 0xb58   : > { %v6026_v60 = vpop.f32.mrb[30].mxu0 }
 0xb59   : > { %v2477_v24 = vpack.c.bf16 %v6026_v60, %v6022_v34  ;;  %v6030_v63 = vpop.f32.mrb[31].mxu0 }
 0xb5a   : > { %v2476_v36 = vpack.c.bf16 %v6030_v63, %v6024_v53 }
 0xb6a   : > { %v3973_v56 = vpop.f32.mrb[32].mxu0 }
 0xb6b   : > { %v2619_v9 = vadd.f32 %v3973_v56, %v3546_v57  ;;  %v2610_v44 = vpop.f32.mrb[33].mxu0 }
 0xb6c   : > { %v2611_v47 = vadd.f32 %v3542_v6, %v2610_v44  ;;  %v3974_v48 = vpop.f32.mrb[34].mxu0 }
 0xb6d   : > { %v2622_v13 = vadd.f32 %v3974_v48, %v3547_v46  ;;  %v2613_v14 = vpop.f32.mrb[35].mxu0  ;;  %v2643_v16 = vsel %vm5548_vm7, -32767.0, %v2619_v9 }
 0xb6e   : > { %v2614_v26 = vadd.f32 %v3543_v4, %v2613_v14  ;;  %2662 = vmax.xlane.f32.xlu0 %v2643_v16  ;;  %3465 = vst [vmem:[%s5406_s29 + $0xd0] sm:$0xff] %v2643_v16  ;;  %v2641_v27 = vsel %vm5552_vm9, -32767.0, %v2611_v47 }
 0xb6f   : > { %3463 = vst [vmem:[%s5406_s29 + $0xc0] sm:$0xff] %v2641_v27  ;;  %v2644_v29 = vsel %vm5556_vm11, -32767.0, %v2622_v13 }
 0xb70   : > { %v2642_v1 = vsel %vm5566_vm12, -32767.0, %v2614_v26  ;;  %3466 = vst [vmem:[%s5406_s29 + $0xd8] sm:$0xff] %v2644_v29 }
 0xb71   : > { %2660 = vmax.xlane.f32.xlu1 %v2642_v1  ;;  %3464 = vst [vmem:[%s5406_s29 + $0xc8] sm:$0xff] %v2642_v1 }
 0xb72   : > { %2658 = vmax.xlane.f32.xlu0 %v2641_v27  ;;  %v3977_v54 = vpop.f32.mrb[36].mxu0 }
 0xb73   : > { %v2635_v35 = vadd.f32 %v3977_v54, %v3554_v28  ;;  %v2626_v30 = vpop.f32.mrb[37].mxu0 }
 0xb74   : > { %v2627_v31 = vadd.f32 %v3550_v19, %v2626_v30  ;;  %v3978_v7 = vpop.f32.mrb[38].mxu0 }
 0xb75   : > { %v2638_v18 = vadd.f32 %v3978_v7, %v3555_v61  ;;  %v2629_v40 = vpop.f32.mrb[39].mxu0  ;;  %v2647_v17 = vsel %vm5595_vm13, -32767.0, %v2635_v35 }
 0xb76   : > { %v2630_v59 = vadd.f32 %v3551_v2, %v2629_v40  ;;  %2664 = vmax.xlane.f32.xlu0 %v2644_v29  ;;  %v2645_v33 = vsel %vm5600_vm14, -32767.0, %v2627_v31  ;;  %3469 = vst [vmem:[%s5406_s29 + $0xf0] sm:$0xff] %v2647_v17 }
 0xb77   : > { %3467 = vst [vmem:[%s5406_s29 + $0xe0] sm:$0xff] %v2645_v33  ;;  %v6058_v21 = vsel %vm5604_vm15, -32767.0, %v2638_v18 }
 0xb78   : > { %3470 = vst [vmem:[%s5406_s29 + $0xf8] sm:$0xff] %v6058_v21  ;;  %v6064_v41 = vsel %vm5612_vm1, -32767.0, %v2630_v59 }
 0xb79   : > { %3468 = vst [vmem:[%s5406_s29 + $0xe8] sm:$0xff] %v6064_v41 }
 0xb7a   : > { %2666 = vmax.xlane.f32.xlu0 %v2645_v33 }
 0xb7e   : > { %2670 = vmax.xlane.f32.xlu0 %v2647_v17 }
 0xb82   : > { %2736 = vrot.lane.b32.xlu1 %v4433_v38, %s4830_s30 }
 0xb86   : > { %2742 = vrot.lane.b32.xlu1 %v4434_v42, %s4830_s30 }
 0xb94   : > { %2734 = vrot.lane.b32.xlu0 %v4435_v0, %s4830_s30 }
 0xb98   : > { %2738 = vrot.lane.b32.xlu0 %v4436_v45, %s4830_s30 }
 0xb9c   : > { %2740 = vrot.lane.b32.xlu0 %v4437_v3, %s4830_s30 }
 0xbaa   : > { %2672 = vmax.xlane.f32.xlu1 %v6058_v21 }
 0xbae   : > { %2668 = vmax.xlane.f32.xlu1 %v6064_v41 }
 0xbbf   : > { %2744 = vrot.lane.b32.xlu1 %v4438_v49, %s4830_s30 }
 0xbfb   : > { %v2663_v57 = vpop.xlane.xlu0 %2662 }
 0xbfc   : > { %v2676_v6 = vsub.f32 %v2643_v16, %v2663_v57  ;;  %v4439_v57 = vld [vmem:[#allocation3 + $0x38] sm:$0xff] }
 0xbfe   : > { %v2686_v46 = vmul.f32 1.442695, %v2676_v6  ;;  %v2661_v9 = vpop.xlane.xlu1 %2660  ;;  %v4440_v6 = vld [vmem:[#allocation3 + $0x30] sm:$0xff] }
 0xbff   : > { %v2659_v56 = vpop.xlane.xlu0 %2658  ;;  %v2675_v48 = vsub.f32 %v2642_v1, %v2661_v9 }
 0xc00   : > { %4393 = vpow2.f32 %v2686_v46  ;;  %v2674_v4 = vsub.f32 %v2641_v27, %v2659_v56 }
 0xc01   : > { %v2684_v15 = vmul.f32 1.442695, %v2675_v48 }
 0xc02   : > { %v2682_v44 = vmul.f32 1.442695, %v2674_v4 }
 0xc03   : > { %v2665_v47 = vpop.xlane.xlu0 %2664 }
 0xc04   : > { %4395 = vpow2.f32 %v2682_v44  ;;  %v2677_v11 = vsub.f32 %v2644_v29, %v2665_v47  ;;  %v2737_v29 = vpop.permute.xlu1 %2736 }
 0xc06   : > { %v2688_v13 = vmul.f32 1.442695, %v2677_v11 }
 0xc07   : > { %v2667_v14 = vpop.xlane.xlu0 %2666 }
 0xc08   : > { %4397 = vpow2.f32 %v2688_v13  ;;  %v2678_v16 = vsub.f32 %v2645_v33, %v2667_v14  ;;  %v2743_v18 = vpop.permute.xlu1 %2742 }
 0xc09   : > { %4399 = vpow2.f32 %v2684_v15 }
 0xc0a   : > { %v6076_v26 = vpop.eup %4393  ;;  %v2690_v2 = vmul.f32 1.442695, %v2678_v16 }
 0xc0b   : > { %2702 = vadd.xlane.f32.xlu1 %v6076_v26  ;;  %v2671_v28 = vpop.xlane.xlu0 %2670 }
 0xc0c   : > { %v2680_v19 = vsub.f32 %v2647_v17, %v2671_v28 }
 0xc0e   : > { %v4396_v61 = vpop.eup %4395  ;;  %v2694_v27 = vmul.f32 1.442695, %v2680_v19 }
 0xc0f   : > { %2698 = vadd.xlane.f32.xlu1 %v4396_v61  ;;  %v2735_v54 = vpop.permute.xlu0 %2734 }
 0xc10   : > { %4401 = vpow2.f32 %v2694_v27  ;;  %3979 = vmatprep.subr.bf16.mxu1 %v2735_v54  ;;  %v4289_v27 = vld [vmem:[#allocation16] sm:$0xff]  }
 0xc11   : > { %3980 = vmatpush3.bf16.msra.mxu1 %v2735_v54  ;;  %4403 = vpow2.f32 %v2690_v2  ;;  %v4290_v54 = vld [vmem:[#allocation16 + $0x8] sm:$0xff]   ;;  %v4291_v2 = vld [vmem:[#allocation16 + $0x10] sm:$0xff]  }
 0xc12   : > { %v6079_v1 = vpop.eup %4397  ;;  %3981 = vmatprep.subr.bf16.mxu1 %v2737_v29 }
 0xc13   : > { %2704 = vadd.xlane.f32.xlu1 %v6079_v1  ;;  %v2739_v35 = vpop.permute.xlu0 %2738  ;;  %v4400_v30 = vpop.eup %4399 }
 0xc15   : > { %3982 = vmatpush3.bf16.msra.mxu1 %v2737_v29  ;;  %v4292_v29 = vld [vmem:[#allocation16 + $0x18] sm:$0xff]  }
 0xc16   : > { %3983 = vmatprep.subr.bf16.mxu1 %v2739_v35 }
 0xc17   : > { %2700 = vadd.xlane.f32.xlu1 %v4400_v30  ;;  %v2741_v31 = vpop.permute.xlu0 %2740 }
 0xc19   : > { %3984 = vmatpush3.bf16.msra.mxu1 %v2739_v35  ;;  %v4294_v35 = vld [vmem:[#allocation16 + $0x28] sm:$0xff]  }
 0xc1a   : > { %v6082_v7 = vpop.eup %4401  ;;  %3985 = vmatprep.subr.bf16.mxu1 %v2741_v31 }
 0xc1b   : > { %2710 = vadd.xlane.f32.xlu0 %v6082_v7  ;;  %v6085_v40 = vpop.eup %4403 }
 0xc1d   : > { %3986 = vmatpush3.bf16.msra.mxu1 %v2741_v31  ;;  %v4296_v31 = vld [vmem:[#allocation16 + $0x38] sm:$0xff]  }
 0xc1e   : > { %3987 = vmatprep.subr.bf16.mxu1 %v2743_v18 }
 0xc1f   : > { %2706 = vadd.xlane.f32.xlu0 %v6085_v40 }
 0xc21   : > { %3988 = vmatpush3.bf16.msra.mxu1 %v2743_v18 }
 0xc37   : > { %v2673_v17 = vpop.xlane.xlu1 %2672 }
 0xc38   : > { %v2681_v59 = vsub.f32 %v6058_v21, %v2673_v17 }
 0xc3a   : > { %v2696_v33 = vmul.f32 1.442695, %v2681_v59 }
 0xc3b   : > { %v2669_v38 = vpop.xlane.xlu1 %2668 }
 0xc3c   : > { %4405 = vpow2.f32 %v2696_v33  ;;  %v2679_v42 = vsub.f32 %v6064_v41, %v2669_v38 }
 0xc3e   : > { %v2692_v0 = vmul.f32 1.442695, %v2679_v42 }
 0xc3f   : > { %v2745_v45 = vpop.permute.xlu1 %2744 }
 0xc40   : > { %4407 = vpow2.f32 %v2692_v0  ;;  %3989 = vmatprep.subr.bf16.mxu1 %v2745_v45 }
 0xc41   : > { %3990 = vmatpush3.bf16.msra.mxu1 %v2745_v45 }
 0xc46   : > { %v4406_v3 = vpop.eup %4405 }
 0xc47   : > { %2712 = vadd.xlane.f32.xlu0 %v4406_v3 }
 0xc4a   : > { %v4408_v49 = vpop.eup %4407 }
 0xc4b   : > { %2708 = vadd.xlane.f32.xlu1 %v4408_v49 }
 0xc5c   : > { %2748 = vrot.lane.b32.xlu1 %v4439_v57, %s4830_s30 }
 0xc5d   : > { %2746 = vrot.lane.b32.xlu0 %v4440_v6, %s4830_s30 }
 0xc60   : > { %2135 = vrot.lane.b32.xlu1 %v2126_v20, %s4830_s30 }
 0xc61   : > { %2133 = vrot.lane.b32.xlu0 %v2125_v12, %s4830_s30 }
 0xc64   : > { %2484 = vrot.lane.b32.xlu1 %v2475_v51, %s4829_s6 }
 0xc65   : > { %2482 = vrot.lane.b32.xlu0 %v2474_v52, %s4829_s6 }
 0xc68   : > { %2139 = vrot.lane.b32.xlu1 %v2128_v58, %s4830_s30 }
 0xc69   : > { %2137 = vrot.lane.b32.xlu0 %v2127_v22, %s4830_s30  ;;  %s2997_s30 = scalar_lea.sflag [#allocation7], %s5365_s26 }
 0xc98   : > { %v2703_v62 = vpop.xlane.xlu1 %2702 }
 0xc9c   : > { %v2699_v8 = vpop.xlane.xlu1 %2698 }
 0xc9d   : > { %4409 = vrcp.f32 %v2699_v8 }
 0xca0   : > { %v2705_v10 = vpop.xlane.xlu1 %2704 }
 0xca4   : > { %v2701_v20 = vpop.xlane.xlu1 %2700 }
 0xca5   : > { %4411 = vrcp.f32 %v2701_v20 }
 0xca6   : > { %4413 = vrcp.f32 %v2705_v10  ;;  %v3471_v10 = vld [vmem:[%s6373_s27] ss:$0 sm:$0xff]  ;;  %s4669_s27 = sshll.u32 %s4831_s25, 4  ;;  %s4670_s27 = int_to_ptr.vmem [resolvable:$false] %s4669_s27 }
 0xca7   : > { %v4410_v5 = vpop.eup %4409  ;;  %4415 = vrcp.f32 %v2703_v62  ;;  %s4671_s20 = scalar_lea.vmem %s4670_s27, 2048  ;;  %p4672_p3 = scmp.lt.s32.totalorder %s6158_s19, %s4670_s27 }
 0xca8   : > { %v2722_v43 = vmul.f32 %v4410_v5, %v4396_v61  ;;  %v2711_v51 = vpop.xlane.xlu0 %2710  ;;  %p4673_p10 = scmp.lt.s32.totalorder %s4671_s20, %s4665_s0 }
 0xcaa   : > { %p4674_p1 = por %p4673_p10, %p4672_p3 }
 0xcac   : > { %v2707_v55 = vpop.xlane.xlu0 %2706  ;;  %p4675_p13 = pnand %p4674_p1, %p4668_p11 }
 0xcaf   : > { %v4412_v12 = vpop.eup %4411 }
 0xcb0   : > { %v2723_v23 = vmul.f32 %v4412_v12, %v4400_v30  ;;  %v4414_v32 = vpop.eup %4413  ;;  %v4295_v30 = vld [vmem:[#allocation16 + $0x30] sm:$0xff]  }
 0xcb1   : > { %v4416_v22 = vpop.eup %4415  ;;  %v2725_v25 = vmul.f32 %v4414_v32, %v6079_v1  ;;  %v4293_v1 = vld [vmem:[#allocation16 + $0x20] sm:$0xff]  }
 0xcb2   : > { %v2730_v50 = vpack.c.bf16 %v2723_v23, %v2722_v43  ;;  %v2724_v41 = vmul.f32 %v4416_v22, %v6076_v26 }
 0xcb4   : > { %3995 = vmatprep.mubr.bf16.mxu1 %v2730_v50  ;;  %v2731_v46 = vpack.c.bf16 %v2725_v25, %v2724_v41 }
 0xcd4   : > { %v2713_v37 = vpop.xlane.xlu0 %2712 }
 0xcd5   : > { %4417 = vrcp.f32 %v2713_v37 }
 0xcd6   : > { %4419 = vrcp.f32 %v2707_v55 }
 0xcd7   : > { %4421 = vrcp.f32 %v2711_v51 }
 0xcd8   : > { %v2709_v58 = vpop.xlane.xlu1 %2708  ;;  %v2747_v39 = vpop.permute.xlu0 %2746 }
 0xcd9   : > { %4423 = vrcp.f32 %v2709_v58  ;;  %3991 = vmatprep.subr.bf16.mxu1 %v2747_v39 }
 0xcda   : > { %3992 = vmatpush3.bf16.msra.mxu1 %v2747_v39 }
 0xcdc   : > { %v2749_v52 = vpop.permute.xlu1 %2748  ;;  %v2134_v21 = vpop.permute.xlu0 %2133 }
 0xcdd   : > { %2146 = vst.msk [vmem:[#allocation4] sm:$0xff] %vm2145_vm0, %v2134_v21  ;;  %3993 = vmatprep.subr.bf16.mxu1 %v2749_v52 }
 0xcde   : > { %3994 = vmatpush3.bf16.msra.mxu1 %v2749_v52 }
 0xcdf   : > { %v4418_v56 = vpop.eup %4417  ;;  %4003 = vmatprep.subr.bf16.mxu1 %v4289_v27 }
 0xce0   : > { %v2136_v4 = vpop.permute.xlu1 %2135  ;;  %v2483_v9 = vpop.permute.xlu0 %2482  ;;  %v2729_v11 = vmul.f32 %v4418_v56, %v4406_v3 }
 0xce1   : > { %v4420_v44 = vpop.eup %4419  ;;  %2147 = vst.msk [vmem:[#allocation4 + $0x8] sm:$0xff] %vm2145_vm0, %v2136_v4  ;;  %3996 = vmatmul.mubr.bf16.vlgmr.msra.gmra.mrb[24].mxu1 %v2731_v46 }
 0xce2   : > { %2495 = vst.msk [vmem:[#allocation4] sm:$0xff] %vm2494_vm2, %v2483_v9  ;;  %v4422_v47 = vpop.eup %4421  ;;  %v2726_v15 = vmul.f32 %v4420_v44, %v6085_v40  ;;  %4004 = vmatpush3.bf16.msra.mxu1 %v4289_v27 }
 0xce3   : > { %v4424_v48 = vpop.eup %4423  ;;  %v2728_v28 = vmul.f32 %v4422_v47, %v6082_v7  ;;  %4005 = vmatprep.subr.bf16.mxu1 %v4290_v54 }
 0xce4   : > { %v2485_v13 = vpop.permute.xlu1 %2484  ;;  %v2138_v14 = vpop.permute.xlu0 %2137  ;;  %v2727_v26 = vmul.f32 %v4424_v48, %v4408_v49 }
 0xce5   : > { %2496 = vst.msk [vmem:[#allocation4 + $0x8] sm:$0xff] %vm2494_vm2, %v2485_v13  ;;  %v2733_v19 = vpack.c.bf16 %v2729_v11, %v2728_v28 }
 0xce6   : > { %2148 = vst.msk [vmem:[#allocation4 + $0x10] sm:$0xff] %vm2145_vm0, %v2138_v14  ;;  %v2732_v16 = vpack.c.bf16 %v2727_v26, %v2726_v15  ;;  %4006 = vmatpush3.bf16.msra.mxu1 %v4290_v54 }
 0xce7   : > { %4007 = vmatprep.subr.bf16.mxu1 %v4291_v2 }
 0xce8   : > { %v2140_v61 = vpop.permute.xlu1 %2139  ;;  %3999 = vmatprep.mubr.bf16.mxu1 %v2732_v16 }
 0xce9   : > { %2149 = vst.msk [vmem:[#allocation4 + $0x18] sm:$0xff] %vm2145_vm0, %v2140_v61  ;;  %4000 = vmatmul.mubr.bf16.gmra.mrb[28].mxu1 %v2733_v19 }
 0xcea   : > { %4008 = vmatpush3.bf16.msra.mxu1 %v4291_v2 }
 0xceb   : > { %4009 = vmatprep.subr.bf16.mxu1 %v4292_v29 }
 0xcee   : > { %4010 = vmatpush3.bf16.msra.mxu1 %v4292_v29 }
 0xcef   : > { %4011 = vmatprep.subr.bf16.mxu1 %v4293_v1 }
 0xcf2   : > { %4012 = vmatpush3.bf16.msra.mxu1 %v4293_v1 }
 0xcf3   : > { %4013 = vmatprep.subr.bf16.mxu1 %v4294_v35 }
 0xcf6   : > { %4014 = vmatpush3.bf16.msra.mxu1 %v4294_v35 }
 0xcf7   : > { %4015 = vmatprep.subr.bf16.mxu1 %v4295_v30 }
 0xcfa   : > { %4016 = vmatpush3.bf16.msra.mxu1 %v4295_v30 }
 0xcfb   : > { %4017 = vmatprep.subr.bf16.mxu1 %v4296_v31 }
 0xcfe   : > { %4018 = vmatpush3.bf16.msra.mxu1 %v4296_v31 }
 0xdb4   : > { %v3997_v7 = vpop.f32.mrb[24].mxu1 }
 0xdb5   : > { %v2792_v18 = vpop.f32.mrb[25].mxu1 }
 0xdb6   : > { %v3998_v40 = vpop.f32.mrb[26].mxu1 }
 0xdb7   : > { %v2824_v17 = vpack.c.bf16 %v3998_v40, %v3997_v7  ;;  %v2795_v59 = vpop.f32.mrb[27].mxu1 }
 0xdb8   : > { %v2823_v33 = vpack.c.bf16 %v2795_v59, %v2792_v18 }
 0xdb9   : > { %2833 = vrot.lane.b32.xlu1 %v2824_v17, %s4828_s8 }
 0xdba   : > { %2831 = vrot.lane.b32.xlu0 %v2823_v33, %s4828_s8 }
 0xdbc   : > { %v4001_v38 = vpop.f32.mrb[28].mxu1 }
 0xdbd   : > { %2488 = vrot.lane.b32.xlu1 %v2477_v24, %s4829_s6  ;;  %v2808_v42 = vpop.f32.mrb[29].mxu1 }
 0xdbe   : > { %2486 = vrot.lane.b32.xlu0 %v2476_v36, %s4829_s6  ;;  %v4002_v0 = vpop.f32.mrb[30].mxu1 }
 0xdbf   : > { %v2826_v45 = vpack.c.bf16 %v4002_v0, %v4001_v38  ;;  %v2811_v3 = vpop.f32.mrb[31].mxu1 }
 0xdc0   : > { %v2825_v49 = vpack.c.bf16 %v2811_v3, %v2808_v42 }
 0xdc1   : > { %2837 = vrot.lane.b32.xlu1 %v2826_v45, %s4828_s8 }
 0xdc2   : > { %2835 = vrot.lane.b32.xlu0 %v2825_v49, %s4828_s8  ;;  %s6375_s8 = sld [smem:[#allocation57_spill]] }
 0xdc8   : > { %s6156_s6 = scalar_lea.hbm %s6375_s8, %s3484_s24 }
 0xe2b   : > { %v2834_v57 = vpop.permute.xlu1 %2833 }
 0xe2c   : > { %2845 = vst.msk [vmem:[#allocation4 + $0x8] sm:$0xff] %vm2843_vm3, %v2834_v57  ;;  %v2832_v6 = vpop.permute.xlu0 %2831 }
 0xe2d   : > { %2844 = vst.msk [vmem:[#allocation4] sm:$0xff] %vm2843_vm3, %v2832_v6 }
 0xe2f   : > { %v2489_v34 = vpop.permute.xlu1 %2488 }
 0xe30   : > { %2498 = vst.msk [vmem:[#allocation4 + $0x18] sm:$0xff] %vm2494_vm2, %v2489_v34  ;;  %v2487_v60 = vpop.permute.xlu0 %2486 }
 0xe31   : > { %2497 = vst.msk [vmem:[#allocation4 + $0x10] sm:$0xff] %vm2494_vm2, %v2487_v60 }
 0xe33   : > { %v2838_v53 = vpop.permute.xlu1 %2837  ;;  %v2849_v36 = vld [vmem:[#allocation4 + $0x8] sm:$0xff] }
 0xe34   : > { %2847 = vst.msk [vmem:[#allocation4 + $0x18] sm:$0xff] %vm2843_vm3, %v2838_v53  ;;  %v2836_v24 = vpop.permute.xlu0 %2835  ;;  %v2848_v63 = vld [vmem:[#allocation4] sm:$0xff] }
 0xe35   : > { %2846 = vst.msk [vmem:[#allocation4 + $0x10] sm:$0xff] %vm2843_vm3, %v2836_v24  ;;  %4019 = vmatprep.mubr.bf16.mxu1 %v2848_v63 }
 0xe36   : > { %4020 = vmatmul.mubr.bf16.vlgmr.msra.gmra.mrb[32].mxu1 %v2849_v36 }
 0xe3b   : > { %v2851_v8 = vld [vmem:[#allocation4 + $0x18] sm:$0xff] }
 0xe3c   : > { %v2850_v62 = vld [vmem:[#allocation4 + $0x10] sm:$0xff] }
 0xe3d   : > { %4023 = vmatprep.mubr.bf16.mxu1 %v2850_v62 }
 0xe3e   : > { %4024 = vmatmul.mubr.bf16.gmra.mrb[36].mxu1 %v2851_v8 }
 0xf09   : > { %v4021_v20 = vpop.f32.mrb[32].mxu1 }
 0xf0a   : > { %v2966_v5 = vadd.f32 %v4021_v20, %v3471_v10  ;;  %v2957_v12 = vpop.f32.mrb[33].mxu1 }
 0xf0b   : > { %v2958_v43 = vadd.f32 %v3471_v10, %v2957_v12  ;;  %v4022_v23 = vpop.f32.mrb[34].mxu1 }
 0xf0c   : > { %2990 = vst [vmem:[%s5404_s17 + $0x10] sm:$0xff] %v2966_v5  ;;  %v2969_v50 = vadd.f32 %v4022_v23, %v3471_v10  ;;  %v2960_v51 = vpop.f32.mrb[35].mxu1 }
 0xf0d   : > { %2988 = vst [vmem:[%s5404_s17] sm:$0xff] %v2958_v43  ;;  %v2961_v55 = vadd.f32 %v3471_v10, %v2960_v51 }
 0xf0e   : > { %2991 = vst [vmem:[%s5404_s17 + $0x18] sm:$0xff] %v2969_v50 }
 0xf0f   : > { %2989 = vst [vmem:[%s5404_s17 + $0x8] sm:$0xff] %v2961_v55 }
 0xf11   : > { %v4025_v37 = vpop.f32.mrb[36].mxu1 }
 0xf12   : > { %v2982_v32 = vadd.f32 %v4025_v37, %v3471_v10  ;;  %v2973_v58 = vpop.f32.mrb[37].mxu1 }
 0xf13   : > { %v2974_v39 = vadd.f32 %v3471_v10, %v2973_v58  ;;  %v4026_v22 = vpop.f32.mrb[38].mxu1 }
 0xf14   : > { %2994 = vst [vmem:[%s5404_s17 + $0x30] sm:$0xff] %v2982_v32  ;;  %v2985_v25 = vadd.f32 %v4026_v22, %v3471_v10  ;;  %v2976_v52 = vpop.f32.mrb[39].mxu1 }
 0xf15   : > { %2992 = vst [vmem:[%s5404_s17 + $0x20] sm:$0xff] %v2974_v39  ;;  %v2977_v21 = vadd.f32 %v3471_v10, %v2976_v52 }
 0xf16   : > { %2995 = vst [vmem:[%s5404_s17 + $0x38] sm:$0xff] %v2985_v25 }
 0xf17   : > { %2993 = vst [vmem:[%s5404_s17 + $0x28] sm:$0xff] %v2977_v21 }
 0xf18   : > { %4678 = shalt.err (!%p4675_p13)
}
 0xf19   : > { %s4679_s17 = scalar_lea.hbm %s6156_s6, 1024  ;;  %s4683_s10 = scalar_lea.hbm %s6375_s8, 4096 }
 0xf1a   : > { %p4680_p4 = scmp.ne.s32.totalorder %s6156_s6, %s4679_s17  ;;  %p4684_p9 = scmp.lt.u32.totalorder %s6156_s6, %s6375_s8 }
 0xf1b   : > { %p4685_p5 = scmp.lt.u32.totalorder %s4683_s10, %s4679_s17  ;;  %p4687_p0 = scmp.lt.u32.totalorder %s4679_s17, %s6156_s6 }
 0xf1c   : > { %p4681_p7 = pnand %p4680_p4, %p6376_p6 }
 0xf1d   : > { %p4686_p8 = por %p4685_p5, %p4684_p9 }
 0xf1e   : > { %p4682_p2 = pneg %p4681_p7 }
 0xf1f   : > { %p4688_p12 = por %p4687_p0, %p4686_p8 }
 0xf21   : > { %p4689_p11 = pnand %p4688_p12, %p4682_p2 }
 0xf23   : > { %4692 = shalt.err (!%p4689_p11)
}
 0xf24   : > { %s4832_s0 = smov 128   ;;  %s4833_s27 = smov 8  }
 0xf25   : > { %4092 = dma.vmem_to_hbm [thread:$0]  (%p6376_p6), %s6158_s19, 1024, %s6156_s6, %s2997_s30, %s4832_s0, %s4832_s0, %s4833_s27  }
 0xf26   : > { %s3002_s20 = scalar_lea.sflag [#allocation22], %s5365_s26 }
 0xf27   : > { %s3486_s17 = sshll.u32 %s6372_s14, 6  ;;  %s3051_s16 = sshll.u32 %s5406_s29, 4  ;;  %s3052_s16 = int_to_ptr.vmem [resolvable:$true] %s3051_s16 }
 0xf28   : > { %s3032_s24 = sadd.s32 %s3486_s17, %s3482_s1  ;;  %s6377_s19 = sld [smem:[#allocation58_spill]] }
 0xf29   : > { %s3487_s10 = sshll.u32 %s3032_s24, 7  ;;  %s4834_s6 = smov 1024  }
 0xf2a   : > { %4093 = sst [smem:[#allocation26]] (%p6376_p6), %s4834_s6  ;;  %s4835_s30 = smov 2048  }
 0xf2b   : > { %4094 = sst [smem:[#allocation26 + $0x1]] (%p6376_p6), %s4835_s30  ;;  %s4836_s0 = smov 8  }
 0xf2c   : > { %4095 = sst [smem:[#allocation26 + $0x2]] (%p6376_p6), %s4836_s0  ;;  %s4837_s14 = smov 128  }
 0xf2d   : > { %4096 = sst [smem:[#allocation26 + $0x3]] (%p6376_p6), %s4837_s14  ;;  %s4838_s29 = smov [#allocation25]  }
 0xf2e   : > { %s3034_s26 = scalar_lea.hbm %s6377_s19, %s3487_s10  ;;  %4097 = sst [smem:[#allocation26 + $0x4]] (%p6376_p6), %s4837_s14 }
 0xf2f   : > { %4098 = sst [smem:[#allocation26 + $0x5]] (%p6376_p6), %s4836_s0  ;;  %s4839_s28 = smov 0  }
 0xf30   : > { %4099 = dma.general (%p6376_p6), %s3052_s16, 4096, %s3034_s26, %s3002_s20, %s4838_s29, [#allocation26], %s4839_s28, 0  }
 0xf31 PF: > { %s6378_s1 = sld [smem:[#allocation36_spill]]  ;;  %s6379_s27 = sld [smem:[#allocation48_spill]] }
 0xf32   : > { %p4130_p3 = scmp.ge.s32.totalorder %s4807_s23, 2 }
 0xf37   : > { %s3079_s17 = sand.u32 1, %s6378_s1   ;;  %p6380_p10 = scmp.ne.s32.totalorder %s6379_s27, 0 }
 0xf38   : > { %s3080_s24 = scalar_lea.sflag [#allocation7], %s3079_s17 }
 0xf39   : > { %p4116_p1 = pnand %p4130_p3, %p6380_p10 }
 0xf3b   : > { %4758 = dma.done.wait (!%p4116_p1), %s3080_s24, 1024  }
 0xf3c   : > { %4760 = vsyncadd (!%p4116_p1), %s3080_s24, 4294966272  ;;  %s3089_s10 = scalar_lea.sflag [#allocation22], %s3079_s17 }
 0xf3d   : > { %4762 = dma.done.wait (!%p4116_p1), %s3089_s10, 4096  }
 0xf3e   : > { %4764 = vsyncadd (!%p4116_p1), %s3089_s10, 4294963200  ;;  %s42_s23 = sadd.s32 1, %s4807_s23   ;;  %s6381_s29 = sld [smem:[#allocation35_spill]] }
 0xf3f   : > { %p39_p13 = scmp.ge.s32.totalorder %s42_s23, 6   ;;  %s6382_s13 = sld [smem:[#allocation44_spill]] }
 0xf40   : > { %s6383_s16 = sld [smem:[#allocation37_spill]]  ;;  %s6384_s20 = sld [smem:[#allocation45_spill]] }
 0xf41   : > { %s6385_s4 = sld [smem:[#allocation41_spill]]  ;;  %s6386_s25 = sld [smem:[#allocation42_spill]] }
 0xf42   : > { %s6387_s30 = smov %s4775_s15  ;;  %s6389_s17 = smov %s4787_s18 }
 0xf43   : > { %s6391_s19 = smov %s4799_s21  ;;  %41 = sbr.rel (!%p39_p13) target bundleno = 27 (0x1b), region = 218 }
 0xf45   : > { %s6388_s15 = smov %s6382_s13 }
 0xf46   : > { %s6390_s18 = smov %s6384_s20  ;;  %s6392_s20 = smov %s4803_s22 }
 0xf47   : > { %s6393_s21 = smov %s6385_s4  ;;  %s6394_s22 = smov %s6386_s25 }
 0xf4a   :  { %3094 = vsyncpa [#allocation6], 1 }
 0xf4b   :  { %3096 = vsyncpa [#allocation6 + $0x1], 1 }
 0xf4c   :  { %3097 = vsyncpa [#allocation9], 1 }
 0xf4d   :  { %3099 = vsyncpa [#allocation9 + $0x1], 1 }
 0xf4e   :  { %3100 = vsyncpa [#allocation12], 1 }
 0xf4f   :  { %3101 = vsyncpa [#allocation15], 1 }
 0xf50   :  { %3102 = vsyncpa [#allocation18], 1 }
 0xf51   :  { %3104 = vsyncpa [#allocation18 + $0x1], 1 }
 0xf52   :  { %3105 = vsyncpa [#allocation7], 1 }
 0xf53   :  { %3107 = vsyncpa [#allocation7 + $0x1], 1 }
 0xf54   :  { %3108 = vsyncpa [#allocation22], 1 }
 0xf55   :  { %3110 = vsyncpa [#allocation22 + $0x1], 1 }

</bundles_post_ra>
